<compile_context>
chip_gen: v7x
topology: tpu7x:2x2x1
jax: 0.10.0
libtpu: 0.0.40
codegen_flags: <defaults>
</compile_context>

<pallas_src>
import functools

import jax
import jax.numpy as jnp
from jax import lax
from jax.experimental import pallas as pl
from jax.experimental.pallas import tpu as pltpu


def _basic_block_kernel(mask_ref, x_ref, w1_ref, w2_ref, b1_ref, b2_ref,
                        out_ref, mid_ref, *, R, W):
  """One (batch, row-tile) grid step.

  Flat-padded layouts: rows of width Wp = W+2 (1 zero col left/right),
  flattened row-major so every 3x3 tap is a contiguous sublane-offset slice.

    x_ref   : ((R+4)*Wp, C) bf16  padded input rows [t*R-2, t*R+R+2)
    mid_ref : ((R+3)*Wp, C) bf16  scratch: conv1 rows [t*R-1, t*R+R] (halo)
    out_ref : (R*Wp, C)     bf16  output rows [t*R, t*R+R); cols >= W are
                                  wrap-around garbage, stripped by the wrapper
    mask_ref: (L1, 1)       f32   1.0 where a conv1 flat position is a real col
    w*_ref  : (9, C, C)     bf16  tap-major weights, BN scale folded in
    b*_ref  : (1, C)        f32   folded BN bias
  """
  Wp = W + 2
  S_out = R * Wp
  L1 = (R + 2) * Wp - 2      # conv1 output length (R+2 rows, minus 2 tail garbage)
  C = out_ref.shape[-1]
  t = pl.program_id(1)

  def conv3x3(src_ref, w_ref, length):
    # 9 accumulating matmuls over contiguous shifted views (no im2col slab).
    acc = None
    for dh in range(3):
      for dw in range(3):
        k = dh * 3 + dw
        tap = src_ref[dh * Wp + dw: dh * Wp + dw + length, :]
        part = jnp.dot(tap, w_ref[k], preferred_element_type=jnp.float32)
        acc = part if acc is None else acc + part
    return acc

  # ---- conv1 (BN1 scale already folded into weights) + bias + ReLU + mask ----
  h1 = conv3x3(x_ref, w1_ref, L1) + b1_ref[...]
  h1 = jnp.maximum(h1, 0.0) * mask_ref[...]          # garbage cols -> exact 0
  # Store with a +1 shift so the zeroed wrap-around columns land exactly on
  # conv2's left/right padding columns.
  mid_ref[1:1 + L1, :] = h1.astype(mid_ref.dtype)
  zeros_1 = jnp.zeros((1, C), mid_ref.dtype)
  mid_ref[0:1, :] = zeros_1                                  # left pad of halo row 0
  mid_ref[(R + 2) * Wp - 1:(R + 2) * Wp, :] = zeros_1        # right pad of halo row R+1
  # (Positions >= (R+2)*Wp of mid are only ever read for stripped garbage
  #  output columns, so they may stay uninitialized.)

  # Image-boundary halo rows must be conv2's zero padding (not conv1 of pads).
  zeros_row = jnp.zeros((Wp, C), mid_ref.dtype)

  @pl.when(t == 0)
  def _():
    mid_ref[0:Wp, :] = zeros_row                             # global mid row -1

  @pl.when(t == pl.num_programs(1) - 1)
  def _():
    mid_ref[(R + 1) * Wp:(R + 2) * Wp, :] = zeros_row        # global mid row H

  # ---- conv2 (BN2 scale folded) + bias + residual add + ReLU ----
  h2 = conv3x3(mid_ref, w2_ref, S_out) + b2_ref[...]
  identity = x_ref[2 * Wp + 1: 2 * Wp + 1 + S_out, :].astype(jnp.float32)
  out_ref[...] = jnp.maximum(h2 + identity, 0.0).astype(out_ref.dtype)


def _pick_row_tile(H, target):
  """Largest divisor of H that is <= target (keeps boundary handling simple)."""
  r = max(1, min(int(target), int(H)))
  while H % r:
    r -= 1
  return r


def basic_block_pallas(x_nchw, w1, gamma1, beta1, mean1, var1,
                       w2, gamma2, beta2, mean2, var2,
                       eps=1e-5, row_tile=64):
  """BasicBlock forward (stride=1, padding=1, downsample=None).

  x_nchw : (N, C, H, W) float32 (PyTorch layout)
  w1, w2 : (C, C, 3, 3) float32 (PyTorch OIHW conv weights)
  returns: (N, C, H, W) float32
  """
  N, C, H, W = x_nchw.shape
  Wp = W + 2
  R = _pick_row_tile(H, row_tile)
  T = H // R
  P_in = (R + 4) * Wp            # per-tile flat padded input length
  P_mid = (R + 3) * Wp           # per-tile mid scratch length
  L1 = (R + 2) * Wp - 2          # conv1 output length
  S_out = R * Wp                 # conv2 / output length

  # ---- layout prep (fuses into the single HBM producer XLA needs anyway) ----
  x = jnp.transpose(x_nchw, (0, 2, 3, 1)).astype(jnp.bfloat16)   # NHWC bf16
  x = jnp.pad(x, ((0, 0), (2, 2), (1, 1), (0, 0)))               # rows(2,2) cols(1,1)
  # Overlapping row tiles (halo duplicated wrapper-side, ~4/R extra bytes).
  row_idx = jnp.arange(T)[:, None] * R + jnp.arange(R + 4)[None, :]
  x_tiles = x[:, row_idx].reshape(N, T, P_in, C)

  # ---- fold BN scale into the conv weights; bias stays in the epilogue ----
  s1 = gamma1 / jnp.sqrt(var1 + eps)
  s2 = gamma2 / jnp.sqrt(var2 + eps)
  b1 = (beta1 - mean1 * s1).astype(jnp.float32).reshape(1, C)
  b2 = (beta2 - mean2 * s2).astype(jnp.float32).reshape(1, C)

  def prep_w(w, s):  # OIHW * scale(O) -> (9, Cin, Cout) tap-major bf16
    w = w * s[:, None, None, None]
    return jnp.transpose(w, (2, 3, 1, 0)).reshape(9, C, C).astype(jnp.bfloat16)

  w1b, w2b = prep_w(w1, s1), prep_w(w2, s2)

  # ---- column-validity mask for conv1's flat output (hoisted constant) ----
  q = jnp.arange(L1, dtype=jnp.int32)
  mask = ((q % Wp) < W).astype(jnp.float32).reshape(L1, 1)

  kernel = functools.partial(_basic_block_kernel, R=R, W=W)

  flops = int(2 * 9 * C * C * N * T * (L1 + S_out))
  bytes_accessed = int(N * T * P_in * C * 2 + N * T * S_out * C * 2
                       + 2 * 9 * C * C * 2 + L1 * 4 + 2 * C * 4)

  # Per-step VMEM: double-buffered x/out tiles + mid scratch + constants.
  tile_bytes = 2 * (P_in * C * 2 + S_out * C * 2) + P_mid * C * 2 \
      + L1 * 4 + 2 * 9 * C * C * 2 + 2 * C * 4
  vmem_limit = int(min(48 * 1024 * 1024, max(16 * 1024 * 1024, 4 * tile_bytes)))

  const2 = lambda n, t: (0, 0)
  const3 = lambda n, t: (0, 0, 0)

  out_tiles = pl.pallas_call(
      kernel,
      out_shape=jax.ShapeDtypeStruct((N, T, S_out, C), jnp.bfloat16),
      grid_spec=pltpu.PrefetchScalarGridSpec(
          num_scalar_prefetch=0,
          grid=(N, T),
          in_specs=[
              pl.BlockSpec((L1, 1), const2),                              # mask
              pl.BlockSpec((None, None, P_in, C), lambda n, t: (n, t, 0, 0)),
              pl.BlockSpec((9, C, C), const3),                            # w1
              pl.BlockSpec((9, C, C), const3),                            # w2
              pl.BlockSpec((1, C), const2),                               # b1
              pl.BlockSpec((1, C), const2),                               # b2
          ],
          out_specs=pl.BlockSpec((None, None, S_out, C),
                                 lambda n, t: (n, t, 0, 0)),
          scratch_shapes=[pltpu.VMEM((P_mid, C), jnp.bfloat16)],
      ),
      compiler_params=pltpu.CompilerParams(
          dimension_semantics=("parallel", "parallel"),
          vmem_limit_bytes=vmem_limit),
      cost_estimate=pl.CostEstimate(
          flops=flops, transcendentals=0, bytes_accessed=bytes_accessed),
  )(mask, x_tiles, w1b, w2b, b1, b2)

  # strip the 2 wrap-around columns per row, back to NCHW f32
  out = out_tiles.reshape(N, H, Wp, C)[:, :, :W, :]
  return jnp.transpose(out, (0, 3, 1, 2)).astype(jnp.float32)


def _reference(x_nchw, w1, gamma1, beta1, mean1, var1,
               w2, gamma2, beta2, mean2, var2, eps=1e-5):
  """Pure-JAX NCHW reference mirroring the kernel's bf16/f32 precision."""
  def conv(x, w):
    return lax.conv_general_dilated(
        x.astype(jnp.bfloat16), w.astype(jnp.bfloat16),
        window_strides=(1, 1), padding=((1, 1), (1, 1)),
        dimension_numbers=("NCHW", "OIHW", "NCHW"),
        preferred_element_type=jnp.float32)

  def bn(x, g, b, m, v):
    s = g / jnp.sqrt(v + eps)
    return x * s.reshape(1, -1, 1, 1) + (b - m * s).reshape(1, -1, 1, 1)

  out = jnp.maximum(bn(conv(x_nchw, w1), gamma1, beta1, mean1, var1), 0.0)
  out = bn(conv(out, w2), gamma2, beta2, mean2, var2)
  identity = x_nchw.astype(jnp.bfloat16).astype(jnp.float32)
  out = jnp.maximum(out + identity, 0.0)
  return out.astype(jnp.bfloat16).astype(jnp.float32)


if __name__ == "__main__":
  key = jax.random.PRNGKey(0)
  N, C, H, W = 2, 8, 16, 16  # inplanes == planes (downsample=None residual)

  ks = jax.random.split(key, 11)
  x = jax.random.normal(ks[0], (N, C, H, W), jnp.float32)
  w1 = jax.random.normal(ks[1], (C, C, 3, 3), jnp.float32) * 0.1
  w2 = jax.random.normal(ks[2], (C, C, 3, 3), jnp.float32) * 0.1
  gamma1 = 1.0 + 0.1 * jax.random.normal(ks[3], (C,), jnp.float32)
  beta1 = 0.1 * jax.random.normal(ks[4], (C,), jnp.float32)
  mean1 = 0.1 * jax.random.normal(ks[5], (C,), jnp.float32)
  var1 = jnp.abs(jax.random.normal(ks[6], (C,), jnp.float32)) + 0.5
  gamma2 = 1.0 + 0.1 * jax.random.normal(ks[7], (C,), jnp.float32)
  beta2 = 0.1 * jax.random.normal(ks[8], (C,), jnp.float32)
  mean2 = 0.1 * jax.random.normal(ks[9], (C,), jnp.float32)
  var2 = jnp.abs(jax.random.normal(ks[10], (C,), jnp.float32)) + 0.5

  ref = _reference(x, w1, gamma1, beta1, mean1, var1,
                   w2, gamma2, beta2, mean2, var2)

  # row_tile=8 -> 2 spatial tiles per image; row_tile=16 -> single tile.
  for rt in (8, 16):
    out = basic_block_pallas(x, w1, gamma1, beta1, mean1, var1,
                             w2, gamma2, beta2, mean2, var2, row_tile=rt)
    out = jax.block_until_ready(out)
    assert out.shape == (N, C, H, W)
    err = float(jnp.max(jnp.abs(out - ref)))
    assert jnp.allclose(out, ref, rtol=2e-2, atol=2e-2), (rt, err)

  print("KERNEL_OK")
</pallas_src>

<mosaic_0001>
module attributes {stable_mosaic.version = 11 : i64} {
  func.func @_basic_block_kernel(%arg0: i32, %arg1: i32, %arg2: memref<178x1xf32, #tpu.memory_space<vmem>>, %arg3: memref<1x1x216x8xbf16, #tpu.memory_space<vmem>>, %arg4: memref<9x8x8xbf16, #tpu.memory_space<vmem>>, %arg5: memref<9x8x8xbf16, #tpu.memory_space<vmem>>, %arg6: memref<1x8xf32, #tpu.memory_space<vmem>>, %arg7: memref<1x8xf32, #tpu.memory_space<vmem>>, %arg8: memref<1x1x144x8xbf16, #tpu.memory_space<vmem>>, %arg9: memref<198x8xbf16, #tpu.memory_space<vmem>>) attributes {dimension_semantics = [#tpu.dimension_semantics<parallel>, #tpu.dimension_semantics<parallel>], iteration_bounds = array<i64: 2, 2>, scalar_prefetch = 0 : i64, scratch_operands = 1 : i64, tpu.core_type = #tpu.core_type<tc>, window_params = [{pipeline_mode = #tpu.pipeline_mode<synchronous>, transform_indices = @transform_0, window_bounds = array<i64: 178, 1>}, {transform_indices = @transform_1, window_bounds = array<i64: 1, 1, 216, 8>}, {pipeline_mode = #tpu.pipeline_mode<synchronous>, transform_indices = @transform_2, window_bounds = array<i64: 9, 8, 8>}, {pipeline_mode = #tpu.pipeline_mode<synchronous>, transform_indices = @transform_3, window_bounds = array<i64: 9, 8, 8>}, {pipeline_mode = #tpu.pipeline_mode<synchronous>, transform_indices = @transform_4, window_bounds = array<i64: 1, 8>}, {pipeline_mode = #tpu.pipeline_mode<synchronous>, transform_indices = @transform_5, window_bounds = array<i64: 1, 8>}, {transform_indices = @transform_6, window_bounds = array<i64: 1, 1, 144, 8>}]} {
    %c0 = arith.constant 0 : index
    %c0_0 = arith.constant 0 : index
    %c0_1 = arith.constant 0 : index
    %c0_2 = arith.constant 0 : index
    %0 = vector.load %arg3[%c0, %c0_0, %c0_1, %c0_2] : memref<1x1x216x8xbf16, #tpu.memory_space<vmem>>, vector<1x1x178x8xbf16>
    %1 = vector.shape_cast %0 : vector<1x1x178x8xbf16> to vector<178x8xbf16>
    %c0_3 = arith.constant 0 : index
    %c0_4 = arith.constant 0 : index
    %c0_5 = arith.constant 0 : index
    %2 = vector.load %arg4[%c0_3, %c0_4, %c0_5] : memref<9x8x8xbf16, #tpu.memory_space<vmem>>, vector<1x8x8xbf16>
    %3 = vector.shape_cast %2 : vector<1x8x8xbf16> to vector<8x8xbf16>
    %cst = arith.constant dense<0.000000e+00> : vector<178x8xf32>
    %4 = tpu.matmul %1, %3, %cst {dimension_numbers = #tpu.dot_dimension_numbers<[1], [0], [0], [1], [0, 0, 1, 1], [], []>} : vector<178x8xbf16>, vector<8x8xbf16>, vector<178x8xf32> -> vector<178x8xf32>
    %c0_6 = arith.constant 0 : index
    %c0_7 = arith.constant 0 : index
    %c1 = arith.constant 1 : index
    %c0_8 = arith.constant 0 : index
    %5 = vector.load %arg3[%c0_6, %c0_7, %c1, %c0_8] : memref<1x1x216x8xbf16, #tpu.memory_space<vmem>>, vector<1x1x178x8xbf16>
    %6 = vector.shape_cast %5 : vector<1x1x178x8xbf16> to vector<178x8xbf16>
    %c1_9 = arith.constant 1 : index
    %c0_10 = arith.constant 0 : index
    %c0_11 = arith.constant 0 : index
    %7 = vector.load %arg4[%c1_9, %c0_10, %c0_11] : memref<9x8x8xbf16, #tpu.memory_space<vmem>>, vector<1x8x8xbf16>
    %8 = vector.shape_cast %7 : vector<1x8x8xbf16> to vector<8x8xbf16>
    %cst_12 = arith.constant dense<0.000000e+00> : vector<178x8xf32>
    %9 = tpu.matmul %6, %8, %cst_12 {dimension_numbers = #tpu.dot_dimension_numbers<[1], [0], [0], [1], [0, 0, 1, 1], [], []>} : vector<178x8xbf16>, vector<8x8xbf16>, vector<178x8xf32> -> vector<178x8xf32>
    %10 = arith.addf %4, %9 : vector<178x8xf32>
    %c0_13 = arith.constant 0 : index
    %c0_14 = arith.constant 0 : index
    %c2 = arith.constant 2 : index
    %c0_15 = arith.constant 0 : index
    %11 = vector.load %arg3[%c0_13, %c0_14, %c2, %c0_15] : memref<1x1x216x8xbf16, #tpu.memory_space<vmem>>, vector<1x1x178x8xbf16>
    %12 = vector.shape_cast %11 : vector<1x1x178x8xbf16> to vector<178x8xbf16>
    %c2_16 = arith.constant 2 : index
    %c0_17 = arith.constant 0 : index
    %c0_18 = arith.constant 0 : index
    %13 = vector.load %arg4[%c2_16, %c0_17, %c0_18] : memref<9x8x8xbf16, #tpu.memory_space<vmem>>, vector<1x8x8xbf16>
    %14 = vector.shape_cast %13 : vector<1x8x8xbf16> to vector<8x8xbf16>
    %cst_19 = arith.constant dense<0.000000e+00> : vector<178x8xf32>
    %15 = tpu.matmul %12, %14, %cst_19 {dimension_numbers = #tpu.dot_dimension_numbers<[1], [0], [0], [1], [0, 0, 1, 1], [], []>} : vector<178x8xbf16>, vector<8x8xbf16>, vector<178x8xf32> -> vector<178x8xf32>
    %16 = arith.addf %10, %15 : vector<178x8xf32>
    %c0_20 = arith.constant 0 : index
    %c0_21 = arith.constant 0 : index
    %c18 = arith.constant 18 : index
    %c0_22 = arith.constant 0 : index
    %17 = vector.load %arg3[%c0_20, %c0_21, %c18, %c0_22] : memref<1x1x216x8xbf16, #tpu.memory_space<vmem>>, vector<1x1x178x8xbf16>
    %18 = vector.shape_cast %17 : vector<1x1x178x8xbf16> to vector<178x8xbf16>
    %c3 = arith.constant 3 : index
    %c0_23 = arith.constant 0 : index
    %c0_24 = arith.constant 0 : index
    %19 = vector.load %arg4[%c3, %c0_23, %c0_24] : memref<9x8x8xbf16, #tpu.memory_space<vmem>>, vector<1x8x8xbf16>
    %20 = vector.shape_cast %19 : vector<1x8x8xbf16> to vector<8x8xbf16>
    %cst_25 = arith.constant dense<0.000000e+00> : vector<178x8xf32>
    %21 = tpu.matmul %18, %20, %cst_25 {dimension_numbers = #tpu.dot_dimension_numbers<[1], [0], [0], [1], [0, 0, 1, 1], [], []>} : vector<178x8xbf16>, vector<8x8xbf16>, vector<178x8xf32> -> vector<178x8xf32>
    %22 = arith.addf %16, %21 : vector<178x8xf32>
    %c0_26 = arith.constant 0 : index
    %c0_27 = arith.constant 0 : index
    %c19 = arith.constant 19 : index
    %c0_28 = arith.constant 0 : index
    %23 = vector.load %arg3[%c0_26, %c0_27, %c19, %c0_28] : memref<1x1x216x8xbf16, #tpu.memory_space<vmem>>, vector<1x1x178x8xbf16>
    %24 = vector.shape_cast %23 : vector<1x1x178x8xbf16> to vector<178x8xbf16>
    %c4 = arith.constant 4 : index
    %c0_29 = arith.constant 0 : index
    %c0_30 = arith.constant 0 : index
    %25 = vector.load %arg4[%c4, %c0_29, %c0_30] : memref<9x8x8xbf16, #tpu.memory_space<vmem>>, vector<1x8x8xbf16>
    %26 = vector.shape_cast %25 : vector<1x8x8xbf16> to vector<8x8xbf16>
    %cst_31 = arith.constant dense<0.000000e+00> : vector<178x8xf32>
    %27 = tpu.matmul %24, %26, %cst_31 {dimension_numbers = #tpu.dot_dimension_numbers<[1], [0], [0], [1], [0, 0, 1, 1], [], []>} : vector<178x8xbf16>, vector<8x8xbf16>, vector<178x8xf32> -> vector<178x8xf32>
    %28 = arith.addf %22, %27 : vector<178x8xf32>
    %c0_32 = arith.constant 0 : index
    %c0_33 = arith.constant 0 : index
    %c20 = arith.constant 20 : index
    %c0_34 = arith.constant 0 : index
    %29 = vector.load %arg3[%c0_32, %c0_33, %c20, %c0_34] : memref<1x1x216x8xbf16, #tpu.memory_space<vmem>>, vector<1x1x178x8xbf16>
    %30 = vector.shape_cast %29 : vector<1x1x178x8xbf16> to vector<178x8xbf16>
    %c5 = arith.constant 5 : index
    %c0_35 = arith.constant 0 : index
    %c0_36 = arith.constant 0 : index
    %31 = vector.load %arg4[%c5, %c0_35, %c0_36] : memref<9x8x8xbf16, #tpu.memory_space<vmem>>, vector<1x8x8xbf16>
    %32 = vector.shape_cast %31 : vector<1x8x8xbf16> to vector<8x8xbf16>
    %cst_37 = arith.constant dense<0.000000e+00> : vector<178x8xf32>
    %33 = tpu.matmul %30, %32, %cst_37 {dimension_numbers = #tpu.dot_dimension_numbers<[1], [0], [0], [1], [0, 0, 1, 1], [], []>} : vector<178x8xbf16>, vector<8x8xbf16>, vector<178x8xf32> -> vector<178x8xf32>
    %34 = arith.addf %28, %33 : vector<178x8xf32>
    %c0_38 = arith.constant 0 : index
    %c0_39 = arith.constant 0 : index
    %c36 = arith.constant 36 : index
    %c0_40 = arith.constant 0 : index
    %35 = vector.load %arg3[%c0_38, %c0_39, %c36, %c0_40] : memref<1x1x216x8xbf16, #tpu.memory_space<vmem>>, vector<1x1x178x8xbf16>
    %36 = vector.shape_cast %35 : vector<1x1x178x8xbf16> to vector<178x8xbf16>
    %c6 = arith.constant 6 : index
    %c0_41 = arith.constant 0 : index
    %c0_42 = arith.constant 0 : index
    %37 = vector.load %arg4[%c6, %c0_41, %c0_42] : memref<9x8x8xbf16, #tpu.memory_space<vmem>>, vector<1x8x8xbf16>
    %38 = vector.shape_cast %37 : vector<1x8x8xbf16> to vector<8x8xbf16>
    %cst_43 = arith.constant dense<0.000000e+00> : vector<178x8xf32>
    %39 = tpu.matmul %36, %38, %cst_43 {dimension_numbers = #tpu.dot_dimension_numbers<[1], [0], [0], [1], [0, 0, 1, 1], [], []>} : vector<178x8xbf16>, vector<8x8xbf16>, vector<178x8xf32> -> vector<178x8xf32>
    %40 = arith.addf %34, %39 : vector<178x8xf32>
    %c0_44 = arith.constant 0 : index
    %c0_45 = arith.constant 0 : index
    %c37 = arith.constant 37 : index
    %c0_46 = arith.constant 0 : index
    %41 = vector.load %arg3[%c0_44, %c0_45, %c37, %c0_46] : memref<1x1x216x8xbf16, #tpu.memory_space<vmem>>, vector<1x1x178x8xbf16>
    %42 = vector.shape_cast %41 : vector<1x1x178x8xbf16> to vector<178x8xbf16>
    %c7 = arith.constant 7 : index
    %c0_47 = arith.constant 0 : index
    %c0_48 = arith.constant 0 : index
    %43 = vector.load %arg4[%c7, %c0_47, %c0_48] : memref<9x8x8xbf16, #tpu.memory_space<vmem>>, vector<1x8x8xbf16>
    %44 = vector.shape_cast %43 : vector<1x8x8xbf16> to vector<8x8xbf16>
    %cst_49 = arith.constant dense<0.000000e+00> : vector<178x8xf32>
    %45 = tpu.matmul %42, %44, %cst_49 {dimension_numbers = #tpu.dot_dimension_numbers<[1], [0], [0], [1], [0, 0, 1, 1], [], []>} : vector<178x8xbf16>, vector<8x8xbf16>, vector<178x8xf32> -> vector<178x8xf32>
    %46 = arith.addf %40, %45 : vector<178x8xf32>
    %c0_50 = arith.constant 0 : index
    %c0_51 = arith.constant 0 : index
    %c38 = arith.constant 38 : index
    %c0_52 = arith.constant 0 : index
    %47 = vector.load %arg3[%c0_50, %c0_51, %c38, %c0_52] : memref<1x1x216x8xbf16, #tpu.memory_space<vmem>>, vector<1x1x178x8xbf16>
    %48 = vector.shape_cast %47 : vector<1x1x178x8xbf16> to vector<178x8xbf16>
    %c8 = arith.constant 8 : index
    %c0_53 = arith.constant 0 : index
    %c0_54 = arith.constant 0 : index
    %49 = vector.load %arg4[%c8, %c0_53, %c0_54] : memref<9x8x8xbf16, #tpu.memory_space<vmem>>, vector<1x8x8xbf16>
    %50 = vector.shape_cast %49 : vector<1x8x8xbf16> to vector<8x8xbf16>
    %cst_55 = arith.constant dense<0.000000e+00> : vector<178x8xf32>
    %51 = tpu.matmul %48, %50, %cst_55 {dimension_numbers = #tpu.dot_dimension_numbers<[1], [0], [0], [1], [0, 0, 1, 1], [], []>} : vector<178x8xbf16>, vector<8x8xbf16>, vector<178x8xf32> -> vector<178x8xf32>
    %52 = arith.addf %46, %51 : vector<178x8xf32>
    %c0_56 = arith.constant 0 : index
    %c0_57 = arith.constant 0 : index
    %53 = vector.load %arg6[%c0_56, %c0_57] : memref<1x8xf32, #tpu.memory_space<vmem>>, vector<1x8xf32>
    %54 = vector.broadcast %53 : vector<1x8xf32> to vector<178x8xf32>
    %55 = arith.addf %52, %54 : vector<178x8xf32>
    %cst_58 = arith.constant 0.000000e+00 : f32
    %56 = vector.broadcast %cst_58 : f32 to vector<178x8xf32>
    %57 = arith.maximumf %55, %56 : vector<178x8xf32>
    %c0_59 = arith.constant 0 : index
    %c0_60 = arith.constant 0 : index
    %58 = vector.load %arg2[%c0_59, %c0_60] : memref<178x1xf32, #tpu.memory_space<vmem>>, vector<178x1xf32>
    %59 = vector.broadcast %58 : vector<178x1xf32> to vector<178x8xf32>
    %60 = arith.mulf %57, %59 : vector<178x8xf32>
    %61 = arith.truncf %60 : vector<178x8xf32> to vector<178x8xbf16>
    %c1_61 = arith.constant 1 : index
    %c0_62 = arith.constant 0 : index
    %62 = vector.load %arg9[%c1_61, %c0_62] : memref<198x8xbf16, #tpu.memory_space<vmem>>, vector<178x8xbf16>
    tpu.vector_store %arg9[%c1_61, %c0_62], %61 {strides = array<i32>} : memref<198x8xbf16, #tpu.memory_space<vmem>>, vector<178x8xbf16>,
    %cst_63 = arith.constant 0.000000e+00 : bf16
    %63 = vector.broadcast %cst_63 : bf16 to vector<1x8xbf16>
    %c0_64 = arith.constant 0 : index
    %c0_65 = arith.constant 0 : index
    %64 = vector.load %arg9[%c0_64, %c0_65] : memref<198x8xbf16, #tpu.memory_space<vmem>>, vector<1x8xbf16>
    tpu.vector_store %arg9[%c0_64, %c0_65], %63 {strides = array<i32>} : memref<198x8xbf16, #tpu.memory_space<vmem>>, vector<1x8xbf16>,
    %c179 = arith.constant 179 : index
    %c0_66 = arith.constant 0 : index
    %65 = vector.load %arg9[%c179, %c0_66] : memref<198x8xbf16, #tpu.memory_space<vmem>>, vector<1x8xbf16>
    tpu.vector_store %arg9[%c179, %c0_66], %63 {strides = array<i32>} : memref<198x8xbf16, #tpu.memory_space<vmem>>, vector<1x8xbf16>,
    %cst_67 = arith.constant 0.000000e+00 : bf16
    %66 = vector.broadcast %cst_67 : bf16 to vector<18x8xbf16>
    %c0_i32 = arith.constant 0 : i32
    %67 = arith.cmpi eq, %arg1, %c0_i32 : i32
    %68 = arith.extui %67 : i1 to i32
    %c0_i32_68 = arith.constant 0 : i32
    %69 = arith.cmpi ne, %68, %c0_i32_68 : i32
    scf.if %69 {
      %c0_135 = arith.constant 0 : index
      %c0_136 = arith.constant 0 : index
      %130 = vector.load %arg9[%c0_135, %c0_136] : memref<198x8xbf16, #tpu.memory_space<vmem>>, vector<18x8xbf16>
      tpu.vector_store %arg9[%c0_135, %c0_136], %66 {strides = array<i32>} : memref<198x8xbf16, #tpu.memory_space<vmem>>, vector<18x8xbf16>,
    } else {
    }
    %c1_i32 = arith.constant 1 : i32
    %70 = arith.cmpi eq, %arg1, %c1_i32 : i32
    %71 = arith.extui %70 : i1 to i32
    %c0_i32_69 = arith.constant 0 : i32
    %72 = arith.cmpi ne, %71, %c0_i32_69 : i32
    scf.if %72 {
      %c162 = arith.constant 162 : index
      %c0_135 = arith.constant 0 : index
      %130 = vector.load %arg9[%c162, %c0_135] : memref<198x8xbf16, #tpu.memory_space<vmem>>, vector<18x8xbf16>
      tpu.vector_store %arg9[%c162, %c0_135], %66 {strides = array<i32>} : memref<198x8xbf16, #tpu.memory_space<vmem>>, vector<18x8xbf16>,
    } else {
    }
    %c0_70 = arith.constant 0 : index
    %c0_71 = arith.constant 0 : index
    %73 = vector.load %arg9[%c0_70, %c0_71] : memref<198x8xbf16, #tpu.memory_space<vmem>>, vector<144x8xbf16>
    %c0_72 = arith.constant 0 : index
    %c0_73 = arith.constant 0 : index
    %c0_74 = arith.constant 0 : index
    %74 = vector.load %arg5[%c0_72, %c0_73, %c0_74] : memref<9x8x8xbf16, #tpu.memory_space<vmem>>, vector<1x8x8xbf16>
    %75 = vector.shape_cast %74 : vector<1x8x8xbf16> to vector<8x8xbf16>
    %cst_75 = arith.constant dense<0.000000e+00> : vector<144x8xf32>
    %76 = tpu.matmul %73, %75, %cst_75 {dimension_numbers = #tpu.dot_dimension_numbers<[1], [0], [0], [1], [0, 0, 1, 1], [], []>} : vector<144x8xbf16>, vector<8x8xbf16>, vector<144x8xf32> -> vector<144x8xf32>
    %c1_76 = arith.constant 1 : index
    %c0_77 = arith.constant 0 : index
    %77 = vector.load %arg9[%c1_76, %c0_77] : memref<198x8xbf16, #tpu.memory_space<vmem>>, vector<144x8xbf16>
    %c1_78 = arith.constant 1 : index
    %c0_79 = arith.constant 0 : index
    %c0_80 = arith.constant 0 : index
    %78 = vector.load %arg5[%c1_78, %c0_79, %c0_80] : memref<9x8x8xbf16, #tpu.memory_space<vmem>>, vector<1x8x8xbf16>
    %79 = vector.shape_cast %78 : vector<1x8x8xbf16> to vector<8x8xbf16>
    %cst_81 = arith.constant dense<0.000000e+00> : vector<144x8xf32>
    %80 = tpu.matmul %77, %79, %cst_81 {dimension_numbers = #tpu.dot_dimension_numbers<[1], [0], [0], [1], [0, 0, 1, 1], [], []>} : vector<144x8xbf16>, vector<8x8xbf16>, vector<144x8xf32> -> vector<144x8xf32>
    %81 = arith.addf %76, %80 : vector<144x8xf32>
    %c2_82 = arith.constant 2 : index
    %c0_83 = arith.constant 0 : index
    %82 = vector.load %arg9[%c2_82, %c0_83] : memref<198x8xbf16, #tpu.memory_space<vmem>>, vector<144x8xbf16>
    %c2_84 = arith.constant 2 : index
    %c0_85 = arith.constant 0 : index
    %c0_86 = arith.constant 0 : index
    %83 = vector.load %arg5[%c2_84, %c0_85, %c0_86] : memref<9x8x8xbf16, #tpu.memory_space<vmem>>, vector<1x8x8xbf16>
    %84 = vector.shape_cast %83 : vector<1x8x8xbf16> to vector<8x8xbf16>
    %cst_87 = arith.constant dense<0.000000e+00> : vector<144x8xf32>
    %85 = tpu.matmul %82, %84, %cst_87 {dimension_numbers = #tpu.dot_dimension_numbers<[1], [0], [0], [1], [0, 0, 1, 1], [], []>} : vector<144x8xbf16>, vector<8x8xbf16>, vector<144x8xf32> -> vector<144x8xf32>
    %86 = arith.addf %81, %85 : vector<144x8xf32>
    %c18_88 = arith.constant 18 : index
    %c0_89 = arith.constant 0 : index
    %87 = vector.load %arg9[%c18_88, %c0_89] : memref<198x8xbf16, #tpu.memory_space<vmem>>, vector<144x8xbf16>
    %c3_90 = arith.constant 3 : index
    %c0_91 = arith.constant 0 : index
    %c0_92 = arith.constant 0 : index
    %88 = vector.load %arg5[%c3_90, %c0_91, %c0_92] : memref<9x8x8xbf16, #tpu.memory_space<vmem>>, vector<1x8x8xbf16>
    %89 = vector.shape_cast %88 : vector<1x8x8xbf16> to vector<8x8xbf16>
    %cst_93 = arith.constant dense<0.000000e+00> : vector<144x8xf32>
    %90 = tpu.matmul %87, %89, %cst_93 {dimension_numbers = #tpu.dot_dimension_numbers<[1], [0], [0], [1], [0, 0, 1, 1], [], []>} : vector<144x8xbf16>, vector<8x8xbf16>, vector<144x8xf32> -> vector<144x8xf32>
    %91 = arith.addf %86, %90 : vector<144x8xf32>
    %c19_94 = arith.constant 19 : index
    %c0_95 = arith.constant 0 : index
    %92 = vector.load %arg9[%c19_94, %c0_95] : memref<198x8xbf16, #tpu.memory_space<vmem>>, vector<144x8xbf16>
    %c4_96 = arith.constant 4 : index
    %c0_97 = arith.constant 0 : index
    %c0_98 = arith.constant 0 : index
    %93 = vector.load %arg5[%c4_96, %c0_97, %c0_98] : memref<9x8x8xbf16, #tpu.memory_space<vmem>>, vector<1x8x8xbf16>
    %94 = vector.shape_cast %93 : vector<1x8x8xbf16> to vector<8x8xbf16>
    %cst_99 = arith.constant dense<0.000000e+00> : vector<144x8xf32>
    %95 = tpu.matmul %92, %94, %cst_99 {dimension_numbers = #tpu.dot_dimension_numbers<[1], [0], [0], [1], [0, 0, 1, 1], [], []>} : vector<144x8xbf16>, vector<8x8xbf16>, vector<144x8xf32> -> vector<144x8xf32>
    %96 = arith.addf %91, %95 : vector<144x8xf32>
    %c20_100 = arith.constant 20 : index
    %c0_101 = arith.constant 0 : index
    %97 = vector.load %arg9[%c20_100, %c0_101] : memref<198x8xbf16, #tpu.memory_space<vmem>>, vector<144x8xbf16>
    %c5_102 = arith.constant 5 : index
    %c0_103 = arith.constant 0 : index
    %c0_104 = arith.constant 0 : index
    %98 = vector.load %arg5[%c5_102, %c0_103, %c0_104] : memref<9x8x8xbf16, #tpu.memory_space<vmem>>, vector<1x8x8xbf16>
    %99 = vector.shape_cast %98 : vector<1x8x8xbf16> to vector<8x8xbf16>
    %cst_105 = arith.constant dense<0.000000e+00> : vector<144x8xf32>
    %100 = tpu.matmul %97, %99, %cst_105 {dimension_numbers = #tpu.dot_dimension_numbers<[1], [0], [0], [1], [0, 0, 1, 1], [], []>} : vector<144x8xbf16>, vector<8x8xbf16>, vector<144x8xf32> -> vector<144x8xf32>
    %101 = arith.addf %96, %100 : vector<144x8xf32>
    %c36_106 = arith.constant 36 : index
    %c0_107 = arith.constant 0 : index
    %102 = vector.load %arg9[%c36_106, %c0_107] : memref<198x8xbf16, #tpu.memory_space<vmem>>, vector<144x8xbf16>
    %c6_108 = arith.constant 6 : index
    %c0_109 = arith.constant 0 : index
    %c0_110 = arith.constant 0 : index
    %103 = vector.load %arg5[%c6_108, %c0_109, %c0_110] : memref<9x8x8xbf16, #tpu.memory_space<vmem>>, vector<1x8x8xbf16>
    %104 = vector.shape_cast %103 : vector<1x8x8xbf16> to vector<8x8xbf16>
    %cst_111 = arith.constant dense<0.000000e+00> : vector<144x8xf32>
    %105 = tpu.matmul %102, %104, %cst_111 {dimension_numbers = #tpu.dot_dimension_numbers<[1], [0], [0], [1], [0, 0, 1, 1], [], []>} : vector<144x8xbf16>, vector<8x8xbf16>, vector<144x8xf32> -> vector<144x8xf32>
    %106 = arith.addf %101, %105 : vector<144x8xf32>
    %c37_112 = arith.constant 37 : index
    %c0_113 = arith.constant 0 : index
    %107 = vector.load %arg9[%c37_112, %c0_113] : memref<198x8xbf16, #tpu.memory_space<vmem>>, vector<144x8xbf16>
    %c7_114 = arith.constant 7 : index
    %c0_115 = arith.constant 0 : index
    %c0_116 = arith.constant 0 : index
    %108 = vector.load %arg5[%c7_114, %c0_115, %c0_116] : memref<9x8x8xbf16, #tpu.memory_space<vmem>>, vector<1x8x8xbf16>
    %109 = vector.shape_cast %108 : vector<1x8x8xbf16> to vector<8x8xbf16>
    %cst_117 = arith.constant dense<0.000000e+00> : vector<144x8xf32>
    %110 = tpu.matmul %107, %109, %cst_117 {dimension_numbers = #tpu.dot_dimension_numbers<[1], [0], [0], [1], [0, 0, 1, 1], [], []>} : vector<144x8xbf16>, vector<8x8xbf16>, vector<144x8xf32> -> vector<144x8xf32>
    %111 = arith.addf %106, %110 : vector<144x8xf32>
    %c38_118 = arith.constant 38 : index
    %c0_119 = arith.constant 0 : index
    %112 = vector.load %arg9[%c38_118, %c0_119] : memref<198x8xbf16, #tpu.memory_space<vmem>>, vector<144x8xbf16>
    %c8_120 = arith.constant 8 : index
    %c0_121 = arith.constant 0 : index
    %c0_122 = arith.constant 0 : index
    %113 = vector.load %arg5[%c8_120, %c0_121, %c0_122] : memref<9x8x8xbf16, #tpu.memory_space<vmem>>, vector<1x8x8xbf16>
    %114 = vector.shape_cast %113 : vector<1x8x8xbf16> to vector<8x8xbf16>
    %cst_123 = arith.constant dense<0.000000e+00> : vector<144x8xf32>
    %115 = tpu.matmul %112, %114, %cst_123 {dimension_numbers = #tpu.dot_dimension_numbers<[1], [0], [0], [1], [0, 0, 1, 1], [], []>} : vector<144x8xbf16>, vector<8x8xbf16>, vector<144x8xf32> -> vector<144x8xf32>
    %116 = arith.addf %111, %115 : vector<144x8xf32>
    %c0_124 = arith.constant 0 : index
    %c0_125 = arith.constant 0 : index
    %117 = vector.load %arg7[%c0_124, %c0_125] : memref<1x8xf32, #tpu.memory_space<vmem>>, vector<1x8xf32>
    %118 = vector.broadcast %117 : vector<1x8xf32> to vector<144x8xf32>
    %119 = arith.addf %116, %118 : vector<144x8xf32>
    %c0_126 = arith.constant 0 : index
    %c0_127 = arith.constant 0 : index
    %c37_128 = arith.constant 37 : index
    %c0_129 = arith.constant 0 : index
    %120 = vector.load %arg3[%c0_126, %c0_127, %c37_128, %c0_129] : memref<1x1x216x8xbf16, #tpu.memory_space<vmem>>, vector<1x1x144x8xbf16>
    %121 = vector.shape_cast %120 : vector<1x1x144x8xbf16> to vector<144x8xbf16>
    %122 = arith.extf %121 : vector<144x8xbf16> to vector<144x8xf32>
    %123 = arith.addf %119, %122 : vector<144x8xf32>
    %cst_130 = arith.constant 0.000000e+00 : f32
    %124 = vector.broadcast %cst_130 : f32 to vector<144x8xf32>
    %125 = arith.maximumf %123, %124 : vector<144x8xf32>
    %126 = arith.truncf %125 : vector<144x8xf32> to vector<144x8xbf16>
    %c0_131 = arith.constant 0 : index
    %c0_132 = arith.constant 0 : index
    %c0_133 = arith.constant 0 : index
    %c0_134 = arith.constant 0 : index
    %127 = vector.load %arg8[%c0_131, %c0_132, %c0_133, %c0_134] : memref<1x1x144x8xbf16, #tpu.memory_space<vmem>>, vector<1x1x144x8xbf16>
    %128 = vector.shape_cast %127 : vector<1x1x144x8xbf16> to vector<144x8xbf16>
    %129 = vector.shape_cast %126 : vector<144x8xbf16> to vector<1x1x144x8xbf16>
    tpu.vector_store %arg8[%c0_131, %c0_132, %c0_133, %c0_134], %129 {strides = array<i32>} : memref<1x1x144x8xbf16, #tpu.memory_space<vmem>>, vector<1x1x144x8xbf16>,
    return
  }
  func.func @transform_0(%arg0: i32, %arg1: i32) -> (i32, i32) {
    %c0_i32 = arith.constant 0 : i32
    %c0_i32_0 = arith.constant 0 : i32
    %c0_i32_1 = arith.constant 0 : i32
    return %c0_i32, %c0_i32_0 : i32, i32
  }
  func.func @transform_1(%arg0: i32, %arg1: i32) -> (i32, i32, i32, i32) {
    %c0_i32 = arith.constant 0 : i32
    %c0_i32_0 = arith.constant 0 : i32
    %c0_i32_1 = arith.constant 0 : i32
    return %arg0, %arg1, %c0_i32, %c0_i32_0 : i32, i32, i32, i32
  }
  func.func @transform_2(%arg0: i32, %arg1: i32) -> (i32, i32, i32) {
    %c0_i32 = arith.constant 0 : i32
    %c0_i32_0 = arith.constant 0 : i32
    %c0_i32_1 = arith.constant 0 : i32
    %c0_i32_2 = arith.constant 0 : i32
    return %c0_i32, %c0_i32_0, %c0_i32_1 : i32, i32, i32
  }
  func.func @transform_3(%arg0: i32, %arg1: i32) -> (i32, i32, i32) {
    %c0_i32 = arith.constant 0 : i32
    %c0_i32_0 = arith.constant 0 : i32
    %c0_i32_1 = arith.constant 0 : i32
    %c0_i32_2 = arith.constant 0 : i32
    return %c0_i32, %c0_i32_0, %c0_i32_1 : i32, i32, i32
  }
  func.func @transform_4(%arg0: i32, %arg1: i32) -> (i32, i32) {
    %c0_i32 = arith.constant 0 : i32
    %c0_i32_0 = arith.constant 0 : i32
    %c0_i32_1 = arith.constant 0 : i32
    return %c0_i32, %c0_i32_0 : i32, i32
  }
  func.func @transform_5(%arg0: i32, %arg1: i32) -> (i32, i32) {
    %c0_i32 = arith.constant 0 : i32
    %c0_i32_0 = arith.constant 0 : i32
    %c0_i32_1 = arith.constant 0 : i32
    return %c0_i32, %c0_i32_0 : i32, i32
  }
  func.func @transform_6(%arg0: i32, %arg1: i32) -> (i32, i32, i32, i32) {
    %c0_i32 = arith.constant 0 : i32
    %c0_i32_0 = arith.constant 0 : i32
    %c0_i32_1 = arith.constant 0 : i32
    return %arg0, %arg1, %c0_i32, %c0_i32_0 : i32, i32, i32, i32
  }
}

</mosaic_0001>

<bundles_post_ra>
// kernel: tpu_custom_call.1
= control target key start
LH: loop header
LB: loop body
LE: loop exit
PB: predicated region body
PF: predicated region fallthrough
CT: control target
= control target key end

     0   :  { %s7093_s21 = smov 0   ;;  %s7095_s22 = smov 0   ;;  %s9069_s0 = inlined_call_operand.vmem [shape: f32[178,1], index: 0, kind: input, shape index: {}]   ;;  %s9070_s1 = inlined_call_operand.vmem [shape: bf16[2,2,216,8], index: 1, kind: input, shape index: {}]   ;;  %s9071_s2 = inlined_call_operand.vmem [shape: bf16[9,8,8], index: 2, kind: input, shape index: {}]   ;;  %s9072_s3 = inlined_call_operand.vmem [shape: bf16[9,8,8], index: 3, kind: input, shape index: {}]   ;;  %s9073_s4 = inlined_call_operand.vmem [shape: f32[1,8], index: 4, kind: input, shape index: {}]   ;;  %s9074_s5 = inlined_call_operand.vmem [shape: f32[1,8], index: 5, kind: input, shape index: {}]   ;;  %s9075_s6 = inlined_call_operand.vmem [shape: bf16[2,2,144,8], index: 6, kind: output, shape index: {}]  }
   0x1   :  { %s7097_s23 = smov 0   ;;  %s7099_s24 = smov 0  }
   0x2   :  { %s7101_s25 = smov 0  }
   0x3 LB: > { %s25_s26 = sadd.s32 1, %s7043_s23  ;;  %s28_s27 = sadd.s32 1, %s7047_s24  ;;  %s7051_s25 = sphi %s7101_s25, %s16_s25   ;;  %s7047_s24 = sphi %s7099_s24, %s9097_s24   ;;  %s7043_s23 = sphi %s7097_s23, %s9096_s23   ;;  %s7039_s22 = sphi %s7095_s22, %s9095_s22   ;;  %s7035_s21 = sphi %s7093_s21, %s9094_s21  }
   0x4   : > { %p26_p0 = scmp.ge.s32.totalorder %s25_s26, 2  ;;  %p5517_p1 = scmp.ge.s32.totalorder %s7051_s25, 1 }
   0x5   : > { %p232_p2 = scmp.lt.s32.totalorder %s7051_s25, 5 }
   0x6   : > { %s9099_s26 = smov (%p26_p0, %s25_s26), 0  ;;  %s9101_s27 = smov (!%p26_p0, %s28_s27), %s7047_s24 }
   0x7   : > { %p233_p3 = pnand %p5517_p1, %p232_p2  ;;  %p30_p4 = scmp.ge.s32.totalorder %s9101_s27, 2 }
   0x9   : > { %s9103_s27 = smov (%p30_p4, %s9101_s27), 0  ;;  %236 = sbr.rel (%p233_p3) target bundleno = 1421 (0x58d), region = 44 }
  0x10   : > { %v5520_v0 = vld [vmem:[%s9071_s2 + $0x4] sm:$0xf]  ;;  %vm507_vm0 = vcmask 1043456   ;;  %p270_p5 = scmp.lt.s32.totalorder %s7039_s22, 1  ;;  %p272_p6 = scmp.lt.s32.totalorder %s7035_s21, 1  ;;  %vm470_vm2 = vcmask 64512  }
  0x11   : > { %6875 = vmatprep.subr.msk.bf16.mxu0 %vm507_vm0, %v5520_v0  ;;  %v509_v1 = vsel %vm507_vm0, %v5520_v0, 0  ;;  %v312_v2 = vld [vmem:[%s9071_s2] sm:$0xf]  ;;  %6876 = vmatprep.subr.msk.bf16.mxu1 %vm507_vm0, %v5520_v0  ;;  %vm374_vm1 = vsmask.f32 7424  ;;  %vm804_vm3 = vcmask 1046528  }
  0x12   : > { %6138 = vmatpush3.bf16.msra.mxu0 %v509_v1  ;;  %s9105_s22 = smov (!%p270_p5, %s7039_s22), 1  ;;  %6714 = vmatpush3.bf16.msra.mxu1 %v509_v1  ;;  %v668_v30 = vsel %vm507_vm0, %v312_v2, 0  ;;  %v5558_v31 = vld [vmem:[%s9071_s2 + $0x8] sm:$0xf]  ;;  %vm1624_vm4 = vcmask 1045504   ;;  %vm2444_vm7 = vcmask 1044480  }
  0x13   : > { %s273_s8 = scalar_select %p272_p6, %s7035_s21, 1  ;;  %6877 = vmatprep.subr.msk.bf16.mxu0 %vm507_vm0, %v312_v2  ;;  %v865_v57 = vsel %vm507_vm0, %v5558_v31, 0  ;;  %vm1320_vm5 = vsmask.f32 6400  ;;  %vm9076_vm6 = vsmask.f32 5376 }
  0x14   : > { %s6886_s9 = smul.u32 54, %s9105_s22  ;;  %vm2942_vm8 = vsmask.f32 256  ;;  %vm2943_vm9 = vsmask.f32 4368  ;;  %vm3173_vm10 = vcmask 60416  }
  0x15   : > { %s6885_s10 = smul.u32 27, %s273_s8  ;;  %vm3174_vm11 = vsmask.f32 7938  ;;  %vm3207_vm12 = vcmask 57344   ;;  %vm7840_vm14 = vmor %vm2942_vm8, %vm2943_vm9  ;;  %vm3202_vm9 = vsmask.f32 1280 }
  0x16   : > { %s6887_s11 = smul.u32 18, %s273_s8  ;;  %vm7832_vm13 = vmand %vm3173_vm10, %vm3174_vm11  ;;  %p5702_p7 = scmp.ne.s32.totalorder %s7035_s21, 0 }
  0x17   : > { %s276_s12 = sadd.s32 %s6886_s9, %s6885_s10  ;;  %s6888_s13 = smul.u32 36, %s9105_s22  ;;  %vm7867_vm15 = vmand %vm3207_vm12, %vm2942_vm8  ;;  %vm3201_vm8 = vcmask 58368  }
  0x18   : > { %s5518_s14 = sshll.u32 %s276_s12, 2  ;;  %vm3203_vm11 = vmand %vm3201_vm8, %vm3202_vm9 }
  0x19   : > { %s7140_s17 = scalar_lea.vmem %s9070_s1, %s5518_s14  ;;  %s285_s18 = sadd.s32 %s6888_s13, %s6887_s11 }
  0x1a   : > { %s5519_s19 = sshll.u32 %s285_s18, 2  ;;  %v289_v3 = vld [vmem:[%s7140_s17] sm:$0xf]  ;;  %v7144_v4 = vld [vmem:[%s7140_s17 + $0x4] sm:$0xf]  ;;  %v7147_v5 = vld [vmem:[%s7140_s17 + $0x8] sm:$0xff]  }
  0x1b   : > { %s7152_s28 = scalar_lea.vmem %s9075_s6, %s5519_s19  ;;  %v5521_v6 = vcombine.low %v289_v3, %v7144_v4  ;;  %v383_v7 = vshll.u32 %v7147_v5, 16  ;;  %v387_v8 = vshrl.u32 %v7147_v5, 16  ;;  %v7158_v9 = vld [vmem:[%s7140_s17 + $0x10] sm:$0xff]   ;;  %v7161_v10 = vld [vmem:[%s7140_s17 + $0x18] sm:$0xff]   ;;  %v7168_v19 = vld [vmem:[%s7140_s17 + $0x20] sm:$0xff]  }
  0x1c   : > { %v391_v14 = vshll.u32 %v7158_v9, 16  ;;  %v395_v15 = vshrl.u32 %v7158_v9, 16  ;;  %v399_v16 = vshll.u32 %v7161_v10, 16  ;;  %v403_v18 = vshrl.u32 %v7161_v10, 16  ;;  %v7171_v20 = vld [vmem:[%s7140_s17 + $0x28] sm:$0xff]   ;;  %v7177_v28 = vld [vmem:[%s7140_s17 + $0x30] sm:$0xff]  }
  0x1d   : > { %v376_v11 = vshrl.u32 %v5521_v6, 16  ;;  %v378_v12 = vshll.u32 %v5521_v6, 16  ;;  %v385_v13 = vrot.slane %v383_v7, 1  ;;  %v407_v25 = vshll.u32 %v7168_v19, 16  ;;  %v7185_v34 = vld [vmem:[%s7140_s17 + $0x38] sm:$0xff]   ;;  %v7199_v45 = vld [vmem:[%s7140_s17 + $0x40] sm:$0xff]  }
  0x1e   : > { %v393_v22 = vrot.slane %v391_v14, 1  ;;  %v401_v23 = vrot.slane %v399_v16, 1  ;;  %v411_v26 = vshrl.u32 %v7168_v19, 16  ;;  %v415_v27 = vshll.u32 %v7171_v20, 16  ;;  %v7205_v48 = vld [vmem:[%s7140_s17 + $0x48] sm:$0xff]   ;;  %v6946_v60 = vld [vmem:[%s7140_s17 + $0x50] sm:$0xff]  }
  0x1f   : > { %v380_v17 = vrot.slane %v378_v12, 1  ;;  %v389_v21 = vor.u32 %v387_v8, %v385_v13  ;;  %v409_v36 = vrot.slane %v407_v25, 1  ;;  %v423_v38 = vshll.u32 %v7177_v28, 16  ;;  %v7220_v63 = vld [vmem:[%s7140_s17 + $0x58] ss:$0 sps:$4 sm:$0x33]  }
  0x20   : > { %v397_v32 = vor.u32 %v395_v15, %v393_v22  ;;  %v405_v33 = vor.u32 %v403_v18, %v401_v23  ;;  %v417_v37 = vrot.slane %v415_v27, 1  ;;  %v419_v40 = vshrl.u32 %v7171_v20, 16  ;;  %v5572_v3 = vld [vmem:[%s9071_s2 + $0xc] sm:$0xf] }
  0x21   : > { %v381_v24 = vor.u32 %v380_v17, %v376_v11  ;;  %v394_v29 = vsel %vm374_vm1, %v389_v21, %v393_v22  ;;  %v413_v42 = vor.u32 %v411_v26, %v409_v36  ;;  %v427_v43 = vshrl.u32 %v7177_v28, 16 }
  0x22   : > { %v402_v39 = vsel %vm374_vm1, %v397_v32, %v401_v23  ;;  %v410_v41 = vsel %vm374_vm1, %v405_v33, %v409_v36  ;;  %v431_v44 = vshll.u32 %v7185_v34, 16  ;;  %v425_v47 = vrot.slane %v423_v38, 1 }
  0x23   : > { %v386_v35 = vsel %vm374_vm1, %v381_v24, %v385_v13  ;;  %6143 = vmatprep.mubr.msk.bf16.mxu1 %vm470_vm2, %v402_v39  ;;  %v418_v46 = vsel %vm374_vm1, %v413_v42, %v417_v37  ;;  %v421_v49 = vor.u32 %v419_v40, %v417_v37  ;;  %v435_v52 = vshrl.u32 %v7185_v34, 16 }
  0x24   : > { %6139 = vmatprep.mubr.msk.bf16.mxu0 %vm470_vm2, %v386_v35  ;;  %6144 = vmatmul.mubr.msk.bf16.vlgmr.msra.gmra.mrb[0].mxu1 %vm470_vm2, %v410_v41  ;;  %v429_v50 = vor.u32 %v427_v43, %v425_v47  ;;  %v433_v51 = vrot.slane %v431_v44, 1  ;;  %v439_v53 = vshll.u32 %v7199_v45, 16  ;;  %v447_v54 = vshll.u32 %v7205_v48, 16  ;;  %v6948_v43 = vld [vmem:[%s7140_s17 + $0x58] ss:$0 sps:$4 sm:$0x11]  }
  0x25   : > { %6140 = vmatmul.mubr.msk.bf16.vlgmr.msra.gmra.mrb[0].mxu0 %vm470_vm2, %v394_v29  ;;  %6147 = vmatprep.mubr.msk.bf16.mxu1 %vm470_vm2, %v418_v46  ;;  %v808_v55 = vrot.slane %v7158_v9, 1  ;;  %v810_v56 = vrot.slane %v7161_v10, 1  ;;  %v426_v58 = vsel %vm374_vm1, %v421_v49, %v425_v47  ;;  %v443_v59 = vshrl.u32 %v7199_v45, 16  ;;  %v1019_v46 = vld [vmem:[%s7140_s17 + $0xc] sm:$0xf] }
  0x26   : > { %6164 = vmatpush3.bf16.msra.mxu0 %v668_v30  ;;  %6165 = vmatprep.mubr.msk.bf16.mxu0 %vm470_vm2, %v5521_v6  ;;  %v812_v61 = vrot.slane %v7168_v19, 1  ;;  %v434_v62 = vsel %vm374_vm1, %v429_v50, %v433_v51  ;;  %v437_v1 = vor.u32 %v435_v52, %v433_v51  ;;  %v441_v2 = vrot.slane %v439_v53, 1  ;;  %v1618_v47 = vld [vmem:[%s7140_s17 + $0x8] sm:$0xc] }
  0x27   : > { %6878 = vmatprep.subr.msk.bf16.mxu0 %vm507_vm0, %v5558_v31  ;;  %v7225_v0 = vsel %vm804_vm3, %v808_v55, %v810_v56  ;;  %v814_v7 = vrot.slane %v7171_v20, 1  ;;  %v449_v8 = vrot.slane %v447_v54, 1  ;;  %v816_v11 = vrot.slane %v7177_v28, 1  ;;  %v7335_v54 = vld [vmem:[%s7140_s17 + $0x20] sm:$0xff]  }
  0x28   : > { %v7231_v6 = vsel %vm804_vm3, %v810_v56, %v812_v61  ;;  %v818_v12 = vrot.slane %v7185_v34, 1  ;;  %v820_v13 = vrot.slane %v7199_v45, 1  ;;  %v445_v14 = vor.u32 %v443_v59, %v441_v2 }
  0x29   : > { %v7240_v15 = vsel %vm804_vm3, %v812_v61, %v814_v7  ;;  %v822_v16 = vrot.slane %v7205_v48, 1  ;;  %v824_v17 = vrot.slane %v6946_v60, 1  ;;  %v7246_v18 = vsel %vm804_vm3, %v814_v7, %v816_v11 }
  0x2a   : > { %v7249_v21 = vsel %vm804_vm3, %v816_v11, %v818_v12  ;;  %v7252_v22 = vsel %vm804_vm3, %v818_v12, %v820_v13  ;;  %v826_v23 = vrot.slane %v7220_v63, 1  ;;  %v455_v26 = vshll.u32 %v6946_v60, 16  ;;  %v7375_v11 = vld [vmem:[%s7140_s17 + $0x30] sm:$0xff]  }
  0x2b   : > { %v7258_v24 = vsel %vm804_vm3, %v820_v13, %v822_v16  ;;  %v7261_v25 = vsel %vm804_vm3, %v822_v16, %v824_v17  ;;  %v442_v29 = vsel %vm374_vm1, %v437_v1, %v441_v2  ;;  %v451_v30 = vshrl.u32 %v7205_v48, 16 }
  0x2c   : > { %6148 = vmatmul.mubr.msk.bf16.gmra.mrb[4].mxu1 %vm470_vm2, %v426_v58  ;;  %v7267_v27 = vsel %vm804_vm3, %v824_v17, %v826_v23  ;;  %v450_v31 = vsel %vm374_vm1, %v445_v14, %v449_v8  ;;  %v459_v32 = vshrl.u32 %v6946_v60, 16  ;;  %v463_v33 = vshll.u32 %v7220_v63, 16  ;;  %v7394_v17 = vld [vmem:[%s7140_s17 + $0x40] sm:$0xff]  }
  0x2d   : > { %6151 = vmatprep.mubr.msk.bf16.mxu1 %vm470_vm2, %v434_v62  ;;  %v457_v35 = vrot.slane %v455_v26, 1  ;;  %v453_v36 = vor.u32 %v451_v30, %v449_v8  ;;  %v467_v41 = vshrl.u32 %v7220_v63, 16  ;;  %v1161_v44 = vsel %vm507_vm0, %v5572_v3, 0  ;;  %v7380_v63 = vld [vmem:[%s9071_s2 + $0x14] sm:$0xf]  ;;  %v7414_v30 = vld [vmem:[%s7140_s17 + $0x58] sm:$0xff]  }
  0x2e   : > { %v465_v38 = vrot.slane %v463_v33, 1  ;;  %v5612_v49 = vcombine.low %v1618_v47, %v1019_v46  ;;  %v1630_v56 = vrot.slane %v7335_v54, 2  ;;  %v1110_v13 = vrot.slane %v7375_v11, 1 }
  0x2f   : > { %v461_v37 = vor.u32 %v459_v32, %v457_v35  ;;  %v458_v39 = vsel %vm374_vm1, %v453_v36, %v457_v35  ;;  %v6961_v32 = vld [vmem:[%s7140_s17 + $0x60] ss:$0 sps:$4 sm:$0x33]   ;;  %v1120_v33 = vrot.slane %v7414_v30, 1 }
  0x30   : > { %v1625_v51 = vrot.slane %v5612_v49, 2  ;;  %v1122_v36 = vrot.slane %v6961_v32, 1 }
  0x31   : > { %6166 = vmatmul.mubr.msk.bf16.vlgmr.msra.gmra.mrb[0].mxu0 %vm470_vm2, %v7147_v5  ;;  %v466_v40 = vsel %vm374_vm1, %v461_v37, %v465_v38 }
  0x32   : > { %6190 = vmatpush3.bf16.msra.mxu0 %v865_v57  ;;  %6169 = vmatprep.mubr.msk.bf16.mxu0 %vm470_vm2, %v7158_v9  ;;  %v7318_v9 = vld [vmem:[%s7140_s17 + $0x18] sm:$0xff]  }
  0x33   : > { %6879 = vmatprep.subr.msk.bf16.mxu0 %vm507_vm0, %v5572_v3  ;;  %v1628_v50 = vrot.slane %v7318_v9, 2  ;;  %v1104_v2 = vrot.slane %v7318_v9, 1  ;;  %v1106_v3 = vrot.slane %v7335_v54, 1 }
  0x34   : > { %6152 = vmatmul.mubr.msk.bf16.gmra.mrb[8].mxu1 %vm470_vm2, %v442_v29 }
  0x35   : > { %6155 = vmatprep.mubr.msk.bf16.mxu1 %vm470_vm2, %v450_v31  ;;  %v7347_v58 = vsel %vm1624_vm4, %v1628_v50, %v1630_v56  ;;  %v1107_v8 = vsel %vm804_vm3, %v1104_v2, %v1106_v3 }
  0x39   : > { %6170 = vmatmul.mubr.msk.bf16.gmra.mrb[4].mxu0 %vm470_vm2, %v7161_v10  ;;  %v469_v10 = vor.u32 %v467_v41, %v465_v38 }
  0x3a   : > { %6173 = vmatprep.mubr.msk.bf16.mxu0 %vm470_vm2, %v7168_v19  ;;  %v798_v19 = vld [vmem:[%s7140_s17] sm:$0xe] }
  0x3b   : > { %v5559_v42 = vcombine.low %v798_v19, %v7144_v4 }
  0x3c   : > { %6156 = vmatmul.mubr.msk.bf16.gmra.mrb[12].mxu1 %vm470_vm2, %v458_v39 }
  0x3d   : > { %6159 = vmatprep.mubr.msk.bf16.mxu1 %vm470_vm2, %v466_v40 }
  0x41   : > { %6174 = vmatmul.mubr.msk.bf16.gmra.mrb[8].mxu0 %vm470_vm2, %v7171_v20  ;;  %v805_v20 = vrot.slane %v5559_v42, 1 }
  0x42   : > { %6177 = vmatprep.mubr.msk.bf16.mxu0 %vm470_vm2, %v7177_v28  ;;  %v806_v28 = vrot.slane %v7147_v5, 1  ;;  %v7315_v5 = vld [vmem:[%s7140_s17 + $0x10] sm:$0xff]  }
  0x43   : > { %v1330_v38 = vshrl.u32 %v7315_v5, 16  ;;  %v1333_v39 = vshll.u32 %v7315_v5, 16 }
  0x44   : > { %6160 = vmatmul.mubr.msk.bf16.gmra.mrb[16].mxu1 %vm470_vm2, %v469_v10  ;;  %v809_v4 = vsel %vm804_vm3, %v806_v28, %v808_v55  ;;  %v7338_v55 = vld [vmem:[%s7140_s17 + $0x28] sm:$0xff]   ;;  %v1123_v10 = vsel %vm804_vm3, %v1120_v33, %v1122_v36 }
  0x45   : > { %v1632_v57 = vrot.slane %v7338_v55, 2  ;;  %v1108_v12 = vrot.slane %v7338_v55, 1  ;;  %v1332_v42 = vrot.slane %v1330_v38, 1 }
  0x47   : > { %v7352_v59 = vsel %vm1624_vm4, %v1630_v56, %v1632_v57  ;;  %v1109_v14 = vsel %vm804_vm3, %v1106_v3, %v1108_v12  ;;  %v1111_v16 = vsel %vm804_vm3, %v1108_v12, %v1110_v13 }
  0x49   : > { %6178 = vmatmul.mubr.msk.bf16.gmra.mrb[12].mxu0 %vm470_vm2, %v7185_v34  ;;  %v807_v34 = vsel %vm804_vm3, %v805_v20, %v806_v28  ;;  %v1335_v20 = vrot.slane %v1333_v39, 2  ;;  %v1339_v28 = vshrl.u32 %v7318_v9, 16 }
  0x4a   : > { %6181 = vmatprep.mubr.msk.bf16.mxu0 %vm470_vm2, %v7199_v45  ;;  %v5597_v45 = vld [vmem:[%s9071_s2 + $0x10] sm:$0xf] }
  0x4b   : > { %v1465_v7 = vsel %vm507_vm0, %v5597_v45, 0 }
  0x51   : > { %6182 = vmatmul.mubr.msk.bf16.gmra.mrb[16].mxu0 %vm470_vm2, %v7205_v48  ;;  %v1626_v48 = vrot.slane %v7315_v5, 2 }
  0x52   : > { %6185 = vmatprep.mubr.msk.bf16.mxu0 %vm470_vm2, %v6946_v60  ;;  %v1018_v60 = vld [vmem:[%s7140_s17 + $0x8] sm:$0xe] }
  0x53   : > { %v7329_v52 = vsel %vm1624_vm4, %v1626_v48, %v1628_v50  ;;  %v7332_v53 = vsel %vm1624_vm4, %v1625_v51, %v1626_v48  ;;  %v5573_v61 = vcombine.low %v1018_v60, %v1019_v46  ;;  %v1360_v51 = vshll.u32 %v7338_v55, 16 }
  0x54   : > { %v1366_v60 = vshrl.u32 %v7375_v11, 16 }
  0x55   : > { %v1101_v62 = vrot.slane %v5573_v61, 1  ;;  %v1322_v35 = vshrl.u32 %v5573_v61, 16  ;;  %v1325_v37 = vshll.u32 %v5573_v61, 16 }
  0x56   : > { %v1368_v3 = vrot.slane %v1366_v60, 1  ;;  %v5650_v60 = vld [vmem:[%s9071_s2 + $0x1c] sm:$0xf] }
  0x57   : > { %v1324_v41 = vrot.slane %v1322_v35, 1  ;;  %v1327_v19 = vrot.slane %v1325_v37, 2 }
  0x59   : > { %6186 = vmatmul.mubr.msk.bf16.gmra.mrb[20].mxu0 %vm470_vm2, %v6948_v43  ;;  %v1342_v43 = vshll.u32 %v7318_v9, 16  ;;  %v1357_v9 = vshrl.u32 %v7338_v55, 16 }
  0x5a   : > { %6191 = vmatprep.mubr.msk.bf16.mxu0 %vm470_vm2, %v807_v34  ;;  %v1328_v34 = vor.u32 %v1327_v19, %v1324_v41  ;;  %v7463_v19 = vld [vmem:[%s7140_s17 + $0x60] ss:$0 sps:$4 sm:$0x77]  }
  0x5b   : > { %v1344_v46 = vrot.slane %v1342_v43, 2 }
  0x61   : > { %6192 = vmatmul.mubr.msk.bf16.vlgmr.msra.gmra.mrb[0].mxu0 %vm470_vm2, %v809_v4  ;;  %v1336_v4 = vor.u32 %v1335_v20, %v1332_v42  ;;  %v1411_v20 = vshrl.u32 %v7414_v30, 16 }
  0x62   : > { %6216 = vmatpush3.bf16.msra.mxu0 %v1161_v44  ;;  %6195 = vmatprep.mubr.msk.bf16.mxu0 %vm470_vm2, %v7225_v0  ;;  %v1102_v0 = vrot.slane %v7315_v5, 1  ;;  %v1348_v44 = vshrl.u32 %v7335_v54, 16  ;;  %v1341_v5 = vrot.slane %v1339_v28, 1  ;;  %v1414_v28 = vshll.u32 %v7414_v30, 16 }
  0x63   : > { %6880 = vmatprep.subr.msk.bf16.mxu0 %vm507_vm0, %v5597_v45  ;;  %v1351_v45 = vshll.u32 %v7335_v54, 16  ;;  %v1337_v47 = vsel %vm1320_vm5, %v1328_v34, %v1336_v4  ;;  %v1369_v54 = vshll.u32 %v7375_v11, 16  ;;  %v1420_v34 = vshrl.u32 %v7463_v19, 16 }
  0x64   : > { %v1103_v1 = vsel %vm804_vm3, %v1101_v62, %v1102_v0  ;;  %v1350_v48 = vrot.slane %v1348_v44, 1  ;;  %v1345_v50 = vor.u32 %v1344_v46, %v1341_v5  ;;  %v1359_v62 = vrot.slane %v1357_v9, 1 }
  0x65   : > { %v1353_v49 = vrot.slane %v1351_v45, 2  ;;  %v1413_v45 = vrot.slane %v1411_v20, 1  ;;  %v1416_v5 = vrot.slane %v1414_v28, 2  ;;  %v2285_v20 = vsel %vm507_vm0, %v5650_v60, 0 }
  0x66   : > { %v1346_v61 = vsel %vm1320_vm5, %v1336_v4, %v1345_v50  ;;  %v1423_v4 = vshll.u32 %v7463_v19, 16 }
  0x67   : > { %v1354_v56 = vor.u32 %v1353_v49, %v1350_v48  ;;  %v1417_v49 = vor.u32 %v1416_v5, %v1413_v45  ;;  %v7593_v5 = vld [vmem:[%s7140_s17 + $0x40] sm:$0xff]  }
  0x68   : > { %v1425_v48 = vrot.slane %v1423_v4, 2 }
  0x69   : > { %6196 = vmatmul.mubr.msk.bf16.gmra.mrb[4].mxu0 %vm470_vm2, %v7231_v6  ;;  %v1105_v6 = vsel %vm804_vm3, %v1102_v0, %v1104_v2  ;;  %v1362_v0 = vrot.slane %v1360_v51, 2  ;;  %v1355_v2 = vsel %vm1320_vm5, %v1345_v50, %v1354_v56 }
  0x6a   : > { %6199 = vmatprep.mubr.msk.bf16.mxu0 %vm470_vm2, %v7240_v15  ;;  %v7390_v15 = vld [vmem:[%s7140_s17 + $0x38] sm:$0xff]  }
  0x6b   : > { %v1375_v12 = vshrl.u32 %v7390_v15, 16 }
  0x71   : > { %6200 = vmatmul.mubr.msk.bf16.gmra.mrb[8].mxu0 %vm470_vm2, %v7246_v18  ;;  %v1112_v18 = vrot.slane %v7390_v15, 1 }
  0x72   : > { %6203 = vmatprep.mubr.msk.bf16.mxu0 %vm470_vm2, %v7249_v21  ;;  %v1114_v21 = vrot.slane %v7394_v17, 1 }
  0x79   : > { %6204 = vmatmul.mubr.msk.bf16.gmra.mrb[12].mxu0 %vm470_vm2, %v7252_v22  ;;  %v1113_v22 = vsel %vm804_vm3, %v1110_v13, %v1112_v18  ;;  %v1378_v13 = vshll.u32 %v7390_v15, 16 }
  0x7a   : > { %6207 = vmatprep.mubr.msk.bf16.mxu0 %vm470_vm2, %v7258_v24  ;;  %v1115_v24 = vsel %vm804_vm3, %v1112_v18, %v1114_v21 }
  0x81   : > { %6208 = vmatmul.mubr.msk.bf16.gmra.mrb[16].mxu0 %vm470_vm2, %v7261_v25  ;;  %v7406_v25 = vld [vmem:[%s7140_s17 + $0x50] sm:$0xff]  }
  0x82   : > { %6211 = vmatprep.mubr.msk.bf16.mxu0 %vm470_vm2, %v7267_v27  ;;  %v1118_v27 = vrot.slane %v7406_v25, 1  ;;  %v1402_v35 = vshrl.u32 %v7406_v25, 16 }
  0x84   : > { %v1121_v40 = vsel %vm804_vm3, %v1118_v27, %v1120_v33  ;;  %v1404_v41 = vrot.slane %v1402_v35, 1 }
  0x89   : > { %6212 = vmatmul.mubr.msk.bf16.gmra.mrb[24].mxu0 %vm470_vm2, %v826_v23  ;;  %v7402_v23 = vld [vmem:[%s7140_s17 + $0x48] sm:$0xff]  }
  0x8a   : > { %6217 = vmatprep.mubr.msk.bf16.mxu0 %vm470_vm2, %v1103_v1  ;;  %v1116_v26 = vrot.slane %v7402_v23, 1  ;;  %v1685_v1 = vsel %vm507_vm0, %v7380_v63, 0  ;;  %v1396_v32 = vshll.u32 %v7402_v23, 16 }
  0x8c   : > { %v1117_v29 = vsel %vm804_vm3, %v1114_v21, %v1116_v26  ;;  %v1119_v31 = vsel %vm804_vm3, %v1116_v26, %v1118_v27  ;;  %v1377_v21 = vrot.slane %v1375_v12, 1  ;;  %v1398_v39 = vrot.slane %v1396_v32, 2 }
  0x91   : > { %6218 = vmatmul.mubr.msk.bf16.vlgmr.msra.gmra.mrb[0].mxu0 %vm470_vm2, %v1105_v6  ;;  %v1371_v6 = vrot.slane %v1369_v54, 2  ;;  %v1634_v54 = vrot.slane %v7375_v11, 2 }
  0x92   : > { %6242 = vmatpush3.bf16.msra.mxu0 %v1465_v7  ;;  %6221 = vmatprep.mubr.msk.bf16.mxu0 %vm470_vm2, %v1107_v8  ;;  %v5625_v7 = vld [vmem:[%s9071_s2 + $0x18] sm:$0xf]  ;;  %v1363_v8 = vor.u32 %v1362_v0, %v1359_v62  ;;  %v1638_v62 = vrot.slane %v7394_v17, 2 }
  0x93   : > { %6881 = vmatprep.subr.msk.bf16.mxu0 %vm507_vm0, %v7380_v63  ;;  %v1384_v63 = vshrl.u32 %v7394_v17, 16 }
  0x94   : > { %v1364_v18 = vsel %vm1320_vm5, %v1354_v56, %v1363_v8  ;;  %v1981_v56 = vsel %vm507_vm0, %v5625_v7, 0 }
  0x95   : > { %v1386_v26 = vrot.slane %v1384_v63, 1 }
  0x99   : > { %6222 = vmatmul.mubr.msk.bf16.gmra.mrb[4].mxu0 %vm470_vm2, %v1109_v14  ;;  %v1372_v14 = vor.u32 %v1371_v6, %v1368_v3 }
  0x9a   : > { %6225 = vmatprep.mubr.msk.bf16.mxu0 %vm470_vm2, %v1111_v16  ;;  %v1387_v16 = vshll.u32 %v7394_v17, 16  ;;  %v1642_v17 = vrot.slane %v7406_v25, 2 }
  0x9c   : > { %v1389_v27 = vrot.slane %v1387_v16, 2 }
  0x9e   : > { %v1390_v33 = vor.u32 %v1389_v27, %v1386_v26 }
  0xa1   : > { %6226 = vmatmul.mubr.msk.bf16.gmra.mrb[8].mxu0 %vm470_vm2, %v1113_v22  ;;  %v1380_v22 = vrot.slane %v1378_v13, 2  ;;  %v1838_v13 = vld [vmem:[%s7140_s17 + $0x10] sm:$0xc] }
  0xa2   : > { %6229 = vmatprep.mubr.msk.bf16.mxu0 %vm470_vm2, %v1115_v24  ;;  %v1373_v24 = vsel %vm1320_vm5, %v1363_v8, %v1372_v14 }
  0xa9   : > { %6230 = vmatmul.mubr.msk.bf16.gmra.mrb[12].mxu0 %vm470_vm2, %v1117_v29  ;;  %v1381_v29 = vor.u32 %v1380_v22, %v1377_v21  ;;  %v7546_v22 = vld [vmem:[%s7140_s17 + $0x18] sm:$0xff]  }
  0xaa   : > { %6233 = vmatprep.mubr.msk.bf16.mxu0 %vm470_vm2, %v1119_v31  ;;  %v1393_v31 = vshrl.u32 %v7402_v23, 16  ;;  %v1922_v27 = vrot.slane %v7546_v22, 2 }
  0xab   : > { %v1382_v37 = vsel %vm1320_vm5, %v1372_v14, %v1381_v29  ;;  %v7534_v14 = vld [vmem:[%s7140_s17 + $0x14] sm:$0xf] }
  0xac   : > { %v1395_v38 = vrot.slane %v1393_v31, 1 }
  0xae   : > { %v1399_v42 = vor.u32 %v1398_v39, %v1395_v38 }
  0xb0   : > { %v1400_v44 = vsel %vm1320_vm5, %v1390_v33, %v1399_v42 }
  0xb1   : > { %6234 = vmatmul.mubr.msk.bf16.gmra.mrb[16].mxu0 %vm470_vm2, %v1121_v40  ;;  %v1391_v40 = vsel %vm1320_vm5, %v1381_v29, %v1390_v33  ;;  %v7561_v33 = vld [vmem:[%s7140_s17 + $0x20] sm:$0xff]  }
  0xb2   : > { %6237 = vmatprep.mubr.msk.bf16.mxu0 %vm470_vm2, %v1123_v10 }
  0xb9   : > { %6238 = vmatmul.mubr.msk.bf16.gmra.mrb[28].mxu0 %vm470_vm2, %v1122_v36  ;;  %v1405_v36 = vshll.u32 %v7406_v25, 16  ;;  %v1646_v25 = vrot.slane %v7463_v19, 2 }
  0xba   : > { %6243 = vmatprep.mubr.msk.bf16.mxu0 %vm470_vm2, %v1337_v47  ;;  %v1422_v47 = vrot.slane %v1420_v34, 1  ;;  %v7583_v34 = vld [vmem:[%s9071_s2 + $0x20] sm:$0xf] }
  0xbb   : > { %v1407_v10 = vrot.slane %v1405_v36, 2  ;;  %v7565_v36 = vld [vmem:[%s7140_s17 + $0x28] sm:$0xff]  }
  0xbc   : > { %v1426_v50 = vor.u32 %v1425_v48, %v1422_v47  ;;  %v1926_v39 = vrot.slane %v7565_v36, 2  ;;  %v7597_v47 = vld [vmem:[%s7140_s17 + $0x48] sm:$0xff]   ;;  %v2711_v48 = vld [vmem:[%s9069_s0] sm:$0xff] }
  0xbd   : > { %v1408_v43 = vor.u32 %v1407_v10, %v1404_v41 }
  0xbe   : > { %v1427_v51 = vsel %vm1320_vm5, %v1417_v49, %v1426_v50 }
  0xbf   : > { %v1409_v46 = vsel %vm1320_vm5, %v1399_v42, %v1408_v43  ;;  %v1418_v9 = vsel %vm1320_vm5, %v1408_v43, %v1417_v49  ;;  %v7573_v42 = vld [vmem:[%s7140_s17 + $0x30] sm:$0xff]   ;;  %v7578_v43 = vld [vmem:[%s7140_s17 + $0x38] sm:$0xff]   ;;  %v1932_v49 = vrot.slane %v7593_v5, 2 }
  0xc0   : > { %v1928_v4 = vrot.slane %v7573_v42, 2 }
  0xc1   : > { %6244 = vmatmul.mubr.msk.bf16.vlgmr.msra.gmra.mrb[0].mxu0 %vm470_vm2, %v1346_v61  ;;  %v1636_v61 = vrot.slane %v7390_v15, 2 }
  0xc2   : > { %6268 = vmatpush3.bf16.msra.mxu0 %v1685_v1  ;;  %6247 = vmatprep.mubr.msk.bf16.mxu0 %vm470_vm2, %v1355_v2  ;;  %v1929_v45 = vsel %vm1624_vm4, %v1926_v39, %v1928_v4 }
  0xc3   : > { %6882 = vmatprep.subr.msk.bf16.mxu0 %vm507_vm0, %v5625_v7  ;;  %v1637_v55 = vsel %vm1624_vm4, %v1634_v54, %v1636_v61 }
  0xc9   : > { %6248 = vmatmul.mubr.msk.bf16.gmra.mrb[4].mxu0 %vm470_vm2, %v1364_v18 }
  0xca   : > { %6251 = vmatprep.mubr.msk.bf16.mxu0 %vm470_vm2, %v1373_v24 }
  0xd1   : > { %6252 = vmatmul.mubr.msk.bf16.gmra.mrb[8].mxu0 %vm470_vm2, %v1382_v37  ;;  %v1924_v37 = vrot.slane %v7561_v33, 2 }
  0xd2   : > { %6255 = vmatprep.mubr.msk.bf16.mxu0 %vm470_vm2, %v1391_v40 }
  0xd3   : > { %v1925_v19 = vsel %vm1624_vm4, %v1922_v27, %v1924_v37  ;;  %v1927_v28 = vsel %vm1624_vm4, %v1924_v37, %v1926_v39  ;;  %v2153_v39 = vshll.u32 %v7546_v22, 16 }
  0xd9   : > { %6256 = vmatmul.mubr.msk.bf16.gmra.mrb[12].mxu0 %vm470_vm2, %v1400_v44  ;;  %v1930_v44 = vrot.slane %v7578_v43, 2 }
  0xda   : > { %6259 = vmatprep.mubr.msk.bf16.mxu0 %vm470_vm2, %v1409_v46 }
  0xdb   : > { %v1931_v46 = vsel %vm1624_vm4, %v1928_v4, %v1930_v44  ;;  %v2732_v4 = vld [vmem:[%s9069_s0 + $0xa8] sm:$0xff] }
  0xe1   : > { %6260 = vmatmul.mubr.msk.bf16.gmra.mrb[16].mxu0 %vm470_vm2, %v1418_v9  ;;  %v1934_v9 = vrot.slane %v7597_v47, 2 }
  0xe2   : > { %6263 = vmatprep.mubr.msk.bf16.mxu0 %vm470_vm2, %v1427_v51 }
  0xe9   : > { %6264 = vmatmul.mubr.msk.bf16.gmra.mrb[32].mxu0 %vm470_vm2, %v1426_v50  ;;  %v7053_v50 = vmov 0  }
  0xea   : > { %6269 = vmatprep.mubr.msk.bf16.mxu0 %vm470_vm2, %v7332_v53  ;;  %v1635_v53 = vsel %vm1624_vm4, %v1632_v57, %v1634_v54  ;;  %v1639_v57 = vsel %vm1624_vm4, %v1636_v61, %v1638_v62  ;;  %6934 = vset.pattern.permute.xlu0 %v7053_v50 }
  0xeb   : > { %2736 = vperm.xlu0 %6934, %v2711_v48   ;;  %6935 = vset.pattern.permute.xlu1 %v7053_v50  ;;  %v2162_v48 = vshll.u32 %v7561_v33, 16 }
  0xec   : > { %2841 = vperm.xlu1 %6935, %v2732_v4  }
  0xf1   : > { %6270 = vmatmul.mubr.msk.bf16.vlgmr.msra.gmra.mrb[0].mxu0 %vm470_vm2, %v7329_v52 }
  0xf2   : > { %6294 = vmatpush3.bf16.msra.mxu0 %v1981_v56  ;;  %6273 = vmatprep.mubr.msk.bf16.mxu0 %vm470_vm2, %v7347_v58  ;;  %v2712_v56 = vld [vmem:[%s9069_s0 + $0x8] sm:$0xff] }
  0xf3   : > { %6883 = vmatprep.subr.msk.bf16.mxu0 %vm507_vm0, %v5650_v60  ;;  %2741 = vperm.xlu0 %6934, %v2712_v56   ;;  %v2714_v56 = vld [vmem:[%s9069_s0 + $0x18] sm:$0xff] }
  0xf7   : > { %v7499_v52 = vpop.f32.mrb[0].mxu1 }
  0xf8   : > { %v7502_v58 = vpop.f32.mrb[1].mxu1 }
  0xf9   : > { %6274 = vmatmul.mubr.msk.bf16.gmra.mrb[4].mxu0 %vm470_vm2, %v7352_v59  ;;  %v7504_v11 = vpop.f32.mrb[2].mxu1  ;;  %v1640_v59 = vrot.slane %v7402_v23, 2  ;;  %v1644_v23 = vrot.slane %v7414_v30, 2  ;;  %v7543_v30 = vcombine.low %v1838_v13, %v7534_v14  ;;  %v7629_v13 = vld [vmem:[%s7140_s17 + $0x60] sm:$0xff]  }
  0xfa   : > { %6277 = vmatprep.mubr.msk.bf16.mxu0 %vm470_vm2, %v1635_v53  ;;  %v7506_v0 = vpop.f32.mrb[3].mxu1 }
  0xfb   : > { %v1641_v6 = vsel %vm1624_vm4, %v1638_v62, %v1640_v59  ;;  %v1643_v7 = vsel %vm1624_vm4, %v1640_v59, %v1642_v17  ;;  %v1645_v18 = vsel %vm1624_vm4, %v1642_v17, %v1644_v23  ;;  %v1647_v21 = vsel %vm1624_vm4, %v1644_v23, %v1646_v25  ;;  %v7619_v17 = vld [vmem:[%s7140_s17 + $0x58] sm:$0xff]  }
  0xfc   : > { %v1921_v26 = vrot.slane %v7543_v30, 2  ;;  %v1933_v62 = vsel %vm1624_vm4, %v1930_v44, %v1932_v49  ;;  %v1935_v59 = vsel %vm1624_vm4, %v1932_v49, %v1934_v9  ;;  %v1938_v23 = vrot.slane %v7619_v17, 2  ;;  %v2733_v44 = vld [vmem:[%s9069_s0 + $0xb0] sm:$0x3] }
  0xfd   : > { %v2145_v37 = vshll.u32 %v7543_v30, 16  ;;  %2846 = vperm.xlu1 %6935, %v2733_v44   ;;  %v2723_v44 = vld [vmem:[%s9069_s0 + $0x60] sm:$0xff] }
  0xfe   : > { %v1923_v35 = vsel %vm1624_vm4, %v1921_v26, %v1922_v27  ;;  %v1940_v26 = vrot.slane %v7629_v13, 2 }
  0xff   : > { %v7513_v15 = vpop.f32.mrb[4].mxu1 }
 0x100   : > { %v7516_v1 = vpop.f32.mrb[5].mxu1 }
 0x101   : > { %6278 = vmatmul.mubr.msk.bf16.gmra.mrb[8].mxu0 %vm470_vm2, %v1637_v55  ;;  %v7518_v2 = vpop.f32.mrb[6].mxu1  ;;  %v7615_v55 = vld [vmem:[%s7140_s17 + $0x50] sm:$0xff]   ;;  %2751 = vperm.xlu1 %6935, %v2714_v56  }
 0x102   : > { %6281 = vmatprep.mubr.msk.bf16.mxu0 %vm470_vm2, %v1639_v57  ;;  %v7520_v3 = vpop.f32.mrb[7].mxu1 }
 0x107   : > { %v7527_v8 = vpop.f32.mrb[8].mxu1 }
 0x108   : > { %v7530_v12 = vpop.f32.mrb[9].mxu1 }
 0x109   : > { %6282 = vmatmul.mubr.msk.bf16.gmra.mrb[12].mxu0 %vm470_vm2, %v1641_v6  ;;  %v7536_v63 = vpop.f32.mrb[10].mxu1 }
 0x10a   : > { %6285 = vmatprep.mubr.msk.bf16.mxu0 %vm470_vm2, %v1643_v7  ;;  %v7538_v16 = vpop.f32.mrb[11].mxu1  ;;  %v1936_v7 = vrot.slane %v7615_v55, 2 }
 0x10f   : > { %v7550_v24 = vpop.f32.mrb[12].mxu1 }
 0x110   : > { %v7554_v29 = vpop.f32.mrb[13].mxu1 }
 0x111   : > { %6286 = vmatmul.mubr.msk.bf16.gmra.mrb[16].mxu0 %vm470_vm2, %v1645_v18  ;;  %v7556_v31 = vpop.f32.mrb[14].mxu1  ;;  %v6975_v18 = vld [vmem:[%s7140_s17 + $0x68] ss:$0 sps:$4 sm:$0x77]  }
 0x112   : > { %6289 = vmatprep.mubr.msk.bf16.mxu0 %vm470_vm2, %v1647_v21  ;;  %v7558_v32 = vpop.f32.mrb[15].mxu1  ;;  %v1939_v21 = vsel %vm1624_vm4, %v1936_v7, %v1938_v23  ;;  %v1942_v27 = vrot.slane %v6975_v18, 2 }
 0x117   : > { %v6161_v38 = vpop.f32.mrb[16].mxu1 }
 0x118   : > { %v625_v40 = vpop.f32.mrb[17].mxu1 }
 0x119   : > { %6290 = vmatmul.mubr.msk.bf16.gmra.mrb[36].mxu0 %vm470_vm2, %v1646_v25  ;;  %v6162_v41 = vpop.f32.mrb[18].mxu1  ;;  %v1937_v25 = vsel %vm1624_vm4, %v1934_v9, %v1936_v7  ;;  %v2168_v9 = vshrl.u32 %v7565_v36, 16 }
 0x11a   : > { %6295 = vmatprep.mubr.msk.bf16.mxu0 %vm470_vm2, %v1923_v35  ;;  %v628_v10 = vpop.f32.mrb[19].mxu1  ;;  %v2142_v35 = vshrl.u32 %v7543_v30, 16  ;;  %v1943_v41 = vsel %vm1624_vm4, %v1940_v26, %v1942_v27  ;;  %v2713_v30 = vld [vmem:[%s9069_s0 + $0x10] sm:$0xff] }
 0x11b   : > { %2746 = vperm.xlu0 %6934, %v2713_v30   ;;  %v2720_v30 = vld [vmem:[%s9069_s0 + $0x48] sm:$0xff] }
 0x121   : > { %6296 = vmatmul.mubr.msk.bf16.vlgmr.msra.gmra.mrb[0].mxu0 %vm470_vm2, %v1925_v19  ;;  %v2147_v19 = vrot.slane %v2145_v37, 3  ;;  %v2186_v37 = vshrl.u32 %v7578_v43, 16 }
 0x122   : > { %6320 = vmatpush3.bf16.msra.mxu0 %v2285_v20  ;;  %6299 = vmatprep.mubr.msk.bf16.mxu0 %vm470_vm2, %v1927_v28  ;;  %v2155_v28 = vrot.slane %v2153_v39, 3  ;;  %v2721_v39 = vld [vmem:[%s9069_s0 + $0x50] sm:$0xff] }
 0x123   : > { %6884 = vmatprep.subr.msk.bf16.mxu0 %vm507_vm0, %v7583_v34 }
 0x129   : > { %6300 = vmatmul.mubr.msk.bf16.gmra.mrb[4].mxu0 %vm470_vm2, %v1929_v45  ;;  %v2715_v45 = vld [vmem:[%s9069_s0 + $0x20] sm:$0xff] }
 0x12a   : > { %6303 = vmatprep.mubr.msk.bf16.mxu0 %vm470_vm2, %v1931_v46  ;;  %v2159_v46 = vshrl.u32 %v7561_v33, 16  ;;  %2756 = vperm.xlu0 %6934, %v2715_v45   ;;  %v2195_v45 = vshrl.u32 %v7593_v5, 16 }
 0x12c   : > { %v6187_v51 = vpop.f32.mrb[20].mxu0 }
 0x12d   : > { %v7609_v60 = vadd.f32 %v6187_v51, %v6161_v38  ;;  %v784_v54 = vpop.f32.mrb[21].mxu0  ;;  %v2150_v38 = vshrl.u32 %v7546_v22, 16  ;;  %v2171_v51 = vshll.u32 %v7565_v36, 16 }
 0x12e   : > { %v7611_v53 = vadd.f32 %v784_v54, %v625_v40  ;;  %v6188_v61 = vpop.f32.mrb[22].mxu0  ;;  %v1941_v40 = vsel %vm1624_vm4, %v1938_v23, %v1940_v26  ;;  %v2717_v54 = vld [vmem:[%s9069_s0 + $0x30] sm:$0xff]  ;;  %v2716_v23 = vld [vmem:[%s9069_s0 + $0x28] sm:$0xff]  ;;  %v2180_v26 = vshll.u32 %v7573_v42, 16 }
 0x12f   : > { %v787_v57 = vpop.f32.mrb[23].mxu0  ;;  %v2152_v20 = vrot.slane %v2150_v38, 2  ;;  %v2161_v61 = vrot.slane %v2159_v46, 2  ;;  %v2173_v7 = vrot.slane %v2171_v51, 3  ;;  %2766 = vperm.xlu0 %6934, %v2717_v54   ;;  %2761 = vperm.xlu1 %6935, %v2716_v23   ;;  %v2718_v38 = vld [vmem:[%s9069_s0 + $0x38] sm:$0xff]  ;;  %v2198_v46 = vshll.u32 %v7593_v5, 16 }
 0x130   : > { %v7621_v6 = vadd.f32 %v787_v57, %v628_v10  ;;  %v2144_v10 = vrot.slane %v2142_v35, 2  ;;  %v2725_v51 = vld [vmem:[%s9069_s0 + $0x70] sm:$0xff]  ;;  %v2197_v54 = vrot.slane %v2195_v45, 2  ;;  %v2727_v23 = vld [vmem:[%s9069_s0 + $0x80] sm:$0xff]  ;;  %v7736_v45 = vld [vmem:[%s7140_s17 + $0x68] ss:$0 sps:$4 sm:$0xff]  }
 0x131   : > { %6304 = vmatmul.mubr.msk.bf16.gmra.mrb[8].mxu0 %vm470_vm2, %v1933_v62  ;;  %v2156_v50 = vor.u32 %v2155_v28, %v2152_v20  ;;  %v2164_v62 = vrot.slane %v2162_v48, 3  ;;  %v2188_v28 = vrot.slane %v2186_v37, 2  ;;  %v2225_v37 = vshll.u32 %v7619_v17, 16 }
 0x132   : > { %6307 = vmatprep.mubr.msk.bf16.mxu0 %vm470_vm2, %v1935_v59  ;;  %v2148_v49 = vor.u32 %v2147_v19, %v2144_v10  ;;  %v2170_v59 = vrot.slane %v2168_v9, 2  ;;  %v2182_v10 = vrot.slane %v2180_v26, 3  ;;  %v2505_v19 = vsel %vm507_vm0, %v7583_v34, 0  ;;  %v2722_v9 = vld [vmem:[%s9069_s0 + $0x58] sm:$0xff] }
 0x133   : > { %v2165_v18 = vor.u32 %v2164_v62, %v2161_v61  ;;  %2771 = vperm.xlu1 %6935, %v2718_v38   ;;  %v2200_v61 = vrot.slane %v2198_v46, 3 }
 0x134   : > { %v2157_v57 = vsel %vm9076_vm6, %v2148_v49, %v2156_v50  ;;  %v2174_v35 = vor.u32 %v2173_v7, %v2170_v59  ;;  %v2204_v49 = vshrl.u32 %v7597_v47, 16  ;;  %v2724_v7 = vld [vmem:[%s9069_s0 + $0x68] sm:$0xff] }
 0x136   : > { %v2175_v20 = vsel %vm9076_vm6, %v2165_v18, %v2174_v35 }
 0x137   : > { %2781 = vperm.xlu1 %6935, %v2720_v30  }
 0x139   : > { %6308 = vmatmul.mubr.msk.bf16.gmra.mrb[12].mxu0 %vm470_vm2, %v1937_v25  ;;  %v2719_v25 = vld [vmem:[%s9069_s0 + $0x40] sm:$0xff] }
 0x13a   : > { %6311 = vmatprep.mubr.msk.bf16.mxu0 %vm470_vm2, %v1939_v21  ;;  %v2177_v21 = vshrl.u32 %v7573_v42, 16  ;;  %2776 = vperm.xlu0 %6934, %v2719_v25   ;;  %v2201_v25 = vor.u32 %v2200_v61, %v2197_v54  ;;  %v2730_v54 = vld [vmem:[%s9069_s0 + $0x98] sm:$0xff] }
 0x13b   : > { %2791 = vperm.xlu1 %6935, %v2722_v9   ;;  %v2234_v9 = vshll.u32 %v7629_v13, 16 }
 0x13e   : > { %2786 = vperm.xlu0 %6934, %v2721_v39  }
 0x13f   : > { %2801 = vperm.xlu1 %6935, %v2724_v7  }
 0x141   : > { %6312 = vmatmul.mubr.msk.bf16.gmra.mrb[16].mxu0 %vm470_vm2, %v1941_v40  ;;  %v2166_v40 = vsel %vm9076_vm6, %v2156_v50, %v2165_v18  ;;  %v2207_v50 = vshll.u32 %v7597_v47, 16  ;;  %v2213_v18 = vshrl.u32 %v7615_v55, 16 }
 0x142   : > { %6315 = vmatprep.mubr.msk.bf16.mxu0 %vm470_vm2, %v1943_v41  ;;  %v2179_v41 = vrot.slane %v2177_v21, 2  ;;  %2796 = vperm.xlu0 %6934, %v2723_v44   ;;  %v2216_v21 = vshll.u32 %v7615_v55, 16 }
 0x143   : > { %v2209_v59 = vrot.slane %v2207_v50, 3  ;;  %v2231_v50 = vshrl.u32 %v7629_v13, 16 }
 0x144   : > { %v2183_v34 = vor.u32 %v2182_v10, %v2179_v41  ;;  %v2729_v41 = vld [vmem:[%s9069_s0 + $0x90] sm:$0xff] }
 0x146   : > { %v2184_v56 = vsel %vm9076_vm6, %v2174_v35, %v2183_v34  ;;  %2806 = vperm.xlu0 %6934, %v2725_v51   ;;  %v2222_v35 = vshrl.u32 %v7619_v17, 16  ;;  %v2240_v51 = vshrl.u32 %v7736_v45, 16 }
 0x148   : > { %v2224_v44 = vrot.slane %v2222_v35, 2  ;;  %v2242_v7 = vrot.slane %v2240_v51, 2 }
 0x149   : > { %6316 = vmatmul.mubr.msk.bf16.gmra.mrb[40].mxu0 %vm470_vm2, %v1942_v27  ;;  %v2189_v27 = vshll.u32 %v7578_v43, 16 }
 0x14a   : > { %6321 = vmatprep.mubr.msk.bf16.mxu0 %vm470_vm2, %v2157_v57  ;;  %v2206_v57 = vrot.slane %v2204_v49, 2  ;;  %2816 = vperm.xlu0 %6934, %v2727_v23  }
 0x14b   : > { %v2191_v4 = vrot.slane %v2189_v27, 3 }
 0x14c   : > { %v2210_v26 = vor.u32 %v2209_v59, %v2206_v57  ;;  %v2236_v57 = vrot.slane %v2234_v9, 3 }
 0x14d   : > { %v2192_v48 = vor.u32 %v2191_v4, %v2188_v28  ;;  %v2215_v28 = vrot.slane %v2213_v18, 2  ;;  %v2218_v4 = vrot.slane %v2216_v21, 3  ;;  %v2438_v21 = vld [vmem:[%s7140_s17 + $0x10] sm:$0x8] }
 0x14e   : > { %2826 = vperm.xlu0 %6934, %v2729_v41   ;;  %v2448_v41 = vrot.slane %v7561_v33, 3  ;;  %v2456_v33 = vrot.slane %v7593_v5, 3  ;;  %v2460_v5 = vrot.slane %v7615_v55, 3 }
 0x14f   : > { %v2193_v62 = vsel %vm9076_vm6, %v2183_v34, %v2192_v48  ;;  %v2227_v34 = vrot.slane %v2225_v37, 3  ;;  %v2219_v49 = vor.u32 %v2218_v4, %v2215_v28  ;;  %v2454_v28 = vrot.slane %v7578_v43, 3 }
 0x151   : > { %6322 = vmatmul.mubr.msk.bf16.vlgmr.msra.gmra.mrb[0].mxu0 %vm470_vm2, %v2166_v40  ;;  %v2726_v40 = vld [vmem:[%s9069_s0 + $0x78] sm:$0xff]  ;;  %v2220_v61 = vsel %vm9076_vm6, %v2210_v26, %v2219_v49  ;;  %v2457_v43 = vsel %vm2444_vm7, %v2454_v28, %v2456_v33 }
 0x152   : > { %6346 = vmatpush3.bf16.msra.mxu0 %v2505_v19  ;;  %6325 = vmatprep.mubr.msk.bf16.mxu0 %vm470_vm2, %v2175_v20  ;;  %v2202_v20 = vsel %vm9076_vm6, %v2192_v48, %v2201_v25  ;;  %v2731_v48 = vld [vmem:[%s9069_s0 + $0xa0] sm:$0xff] }
 0x153   : > { %2811 = vperm.xlu1 %6935, %v2726_v40   ;;  %2836 = vperm.xlu0 %6934, %v2731_v48  }
 0x159   : > { %6326 = vmatmul.mubr.msk.bf16.gmra.mrb[4].mxu0 %vm470_vm2, %v2184_v56  ;;  %v2243_v56 = vshll.u32 %v7736_v45, 16 }
 0x15a   : > { %6329 = vmatprep.mubr.msk.bf16.mxu0 %vm470_vm2, %v2193_v62  ;;  %v2233_v62 = vrot.slane %v2231_v50, 2 }
 0x15b   : > { %v2245_v23 = vrot.slane %v2243_v56, 3 }
 0x15c   : > { %v6213_v27 = vpop.f32.mrb[24].mxu0 }
 0x15d   : > { %v7722_v38 = vadd.f32 %v6213_v27, %v7609_v60  ;;  %v981_v39 = vpop.f32.mrb[25].mxu0  ;;  %v2211_v60 = vsel %vm9076_vm6, %v2201_v25, %v2210_v26  ;;  %v2237_v25 = vor.u32 %v2236_v57, %v2233_v62  ;;  %v2246_v18 = vor.u32 %v2245_v23, %v2242_v7 }
 0x15e   : > { %v7731_v10 = vadd.f32 %v981_v39, %v7611_v53  ;;  %v6214_v19 = vpop.f32.mrb[26].mxu0  ;;  %v2728_v53 = vld [vmem:[%s9069_s0 + $0x88] sm:$0xff]  ;;  %v5665_v26 = vcombine.low %v2438_v21, %v7534_v14  ;;  %v2446_v39 = vrot.slane %v7546_v22, 3  ;;  %v2452_v22 = vrot.slane %v7573_v42, 3 }
 0x15f   : > { %v984_v30 = vpop.f32.mrb[27].mxu0  ;;  %2821 = vperm.xlu1 %6935, %v2728_v53   ;;  %v2247_v37 = vsel %vm9076_vm6, %v2237_v25, %v2246_v18  ;;  %v2450_v19 = vrot.slane %v7565_v36, 3  ;;  %v2458_v36 = vrot.slane %v7597_v47, 3  ;;  %v2462_v47 = vrot.slane %v7619_v17, 3 }
 0x160   : > { %v1016_v46 = vadd.f32 %v984_v30, %v7621_v6  ;;  %v2228_v6 = vor.u32 %v2227_v34, %v2224_v44  ;;  %v2445_v27 = vrot.slane %v5665_v26, 3  ;;  %v2449_v14 = vsel %vm2444_vm7, %v2446_v39, %v2448_v41 }
 0x161   : > { %6330 = vmatmul.mubr.msk.bf16.gmra.mrb[8].mxu0 %vm470_vm2, %v2202_v20  ;;  %v2451_v20 = vsel %vm2444_vm7, %v2448_v41, %v2450_v19  ;;  %v2453_v4 = vsel %vm2444_vm7, %v2450_v19, %v2452_v22  ;;  %v2455_v30 = vsel %vm2444_vm7, %v2452_v22, %v2454_v28  ;;  %v2463_v9 = vsel %vm2444_vm7, %v2460_v5, %v2462_v47 }
 0x162   : > { %6333 = vmatprep.mubr.msk.bf16.mxu0 %vm470_vm2, %v2211_v60  ;;  %v2229_v59 = vsel %vm9076_vm6, %v2219_v49, %v2228_v6  ;;  %v2238_v35 = vsel %vm9076_vm6, %v2228_v6, %v2237_v25  ;;  %v2447_v40 = vsel %vm2444_vm7, %v2445_v27, %v2446_v39  ;;  %v2459_v49 = vsel %vm2444_vm7, %v2456_v33, %v2458_v36 }
 0x163   : > { %2831 = vperm.xlu1 %6935, %v2730_v54  }
 0x169   : > { %6334 = vmatmul.mubr.msk.bf16.gmra.mrb[12].mxu0 %vm470_vm2, %v2220_v61 }
 0x16a   : > { %6337 = vmatprep.mubr.msk.bf16.mxu0 %vm470_vm2, %v2229_v59  ;;  %v2737_v41 = vpop.permute.xlu0 %2736 }
 0x171   : > { %6338 = vmatmul.mubr.msk.bf16.gmra.mrb[16].mxu0 %vm470_vm2, %v2238_v35 }
 0x172   : > { %6341 = vmatprep.mubr.msk.bf16.mxu0 %vm470_vm2, %v2247_v37  ;;  %v2742_v19 = vpop.permute.xlu0 %2741 }
 0x179   : > { %6342 = vmatmul.mubr.msk.bf16.gmra.mrb[44].mxu0 %vm470_vm2, %v2246_v18 }
 0x17a   : > { %6347 = vmatprep.mubr.msk.bf16.mxu0 %vm470_vm2, %v2447_v40 }
 0x181   : > { %6348 = vmatmul.mubr.msk.bf16.vlgmr.msra.gmra.mrb[0].mxu0 %vm470_vm2, %v2449_v14  ;;  %v7801_v14 = vpop.permute.xlu1 %2841 }
 0x182   : > { %6351 = vmatprep.mubr.msk.bf16.mxu0 %vm470_vm2, %v2451_v20 }
 0x189   : > { %6352 = vmatmul.mubr.msk.bf16.gmra.mrb[4].mxu0 %vm470_vm2, %v2453_v4 }
 0x18a   : > { %6355 = vmatprep.mubr.msk.bf16.mxu0 %vm470_vm2, %v2455_v30 }
 0x18c   : > { %v6239_v60 = vpop.f32.mrb[28].mxu0 }
 0x18d   : > { %v1313_v44 = vadd.f32 %v6239_v60, %v7722_v38  ;;  %v1277_v34 = vpop.f32.mrb[29].mxu0  ;;  %v2461_v38 = vsel %vm2444_vm7, %v2458_v36, %v2460_v5  ;;  %v7807_v60 = vpop.permute.xlu1 %2846 }
 0x18e   : > { %v1311_v42 = vadd.f32 %v1277_v34, %v7731_v10  ;;  %v6240_v53 = vpop.f32.mrb[30].mxu0  ;;  %v2464_v10 = vrot.slane %v7629_v13, 3  ;;  %v7814_v34 = vld [vmem:[%s9073_s4] ss:$0 sm:$0xff] }
 0x18f   : > { %v1280_v48 = vpop.f32.mrb[31].mxu0 }
 0x190   : > { %v1312_v50 = vadd.f32 %v1280_v48, %v1016_v46  ;;  %v2466_v46 = vrot.slane %v7736_v45, 3  ;;  %v2465_v6 = vsel %vm2444_vm7, %v2462_v47, %v2464_v10 }
 0x191   : > { %6356 = vmatmul.mubr.msk.bf16.gmra.mrb[8].mxu0 %vm470_vm2, %v2457_v43 }
 0x192   : > { %6359 = vmatprep.mubr.msk.bf16.mxu0 %vm470_vm2, %v2459_v49  ;;  %v2467_v51 = vsel %vm2444_vm7, %v2464_v10, %v2466_v46  ;;  %v2752_v49 = vpop.permute.xlu1 %2751 }
 0x199   : > { %6360 = vmatmul.mubr.msk.bf16.gmra.mrb[12].mxu0 %vm470_vm2, %v2461_v38 }
 0x19a   : > { %6363 = vmatprep.mubr.msk.bf16.mxu0 %vm470_vm2, %v2463_v9  ;;  %v2747_v33 = vpop.permute.xlu0 %2746 }
 0x1a1   : > { %6364 = vmatmul.mubr.msk.bf16.gmra.mrb[16].mxu0 %vm470_vm2, %v2465_v6 }
 0x1a2   : > { %6367 = vmatprep.mubr.msk.bf16.mxu0 %vm470_vm2, %v2467_v51 }
 0x1a9   : > { %6368 = vmatmul.mubr.msk.bf16.gmra.mrb[48].mxu0 %vm470_vm2, %v2466_v46  ;;  %v7816_v53 = vpop.permute.xlu0 %2756 }
 0x1bc   : > { %v6265_v55 = vpop.f32.mrb[32].mxu0 }
 0x1bd   : > { %v1617_v17 = vadd.f32 %v6265_v55, %v1313_v44  ;;  %v1581_v56 = vpop.f32.mrb[33].mxu0 }
 0x1be   : > { %v1615_v54 = vadd.f32 %v1581_v56, %v1311_v42  ;;  %v6266_v61 = vpop.f32.mrb[34].mxu0  ;;  %v2767_v56 = vpop.permute.xlu0 %2766 }
 0x1bf   : > { %v1584_v62 = vpop.f32.mrb[35].mxu0 }
 0x1c0   : > { %v1616_v57 = vadd.f32 %v1584_v62, %v1312_v50  ;;  %v7822_v62 = vpop.permute.xlu1 %2761 }
 0x1ec   : > { %v6291_v13 = vpop.f32.mrb[36].mxu0 }
 0x1ed   : > { %v1837_v59 = vadd.f32 %v6291_v13, %v1617_v17  ;;  %v1801_v45 = vpop.f32.mrb[37].mxu0 }
 0x1ee   : > { %v1835_v7 = vadd.f32 %v1801_v45, %v1615_v54  ;;  %v6292_v23 = vpop.f32.mrb[38].mxu0 }
 0x1ef   : > { %v1804_v25 = vpop.f32.mrb[39].mxu0 }
 0x1f0   : > { %v1836_v18 = vadd.f32 %v1804_v25, %v1616_v57 }
 0x21c   : > { %v6317_v21 = vpop.f32.mrb[40].mxu0 }
 0x21d   : > { %v2133_v35 = vadd.f32 %v6317_v21, %v1837_v59  ;;  %v2097_v37 = vpop.f32.mrb[41].mxu0 }
 0x21e   : > { %v2131_v26 = vadd.f32 %v2097_v37, %v1835_v7  ;;  %v6318_v27 = vpop.f32.mrb[42].mxu0 }
 0x21f   : > { %v2100_v39 = vpop.f32.mrb[43].mxu0 }
 0x220   : > { %v2132_v40 = vadd.f32 %v2100_v39, %v1836_v18 }
 0x24c   : > { %v6343_v20 = vpop.f32.mrb[44].mxu0 }
 0x24d   : > { %v7803_v22 = vadd.f32 %v6343_v20, %v2133_v35  ;;  %v2401_v28 = vpop.f32.mrb[45].mxu0 }
 0x24e   : > { %v7805_v4 = vadd.f32 %v2401_v28, %v2131_v26  ;;  %v6344_v30 = vpop.f32.mrb[46].mxu0 }
 0x24f   : > { %v2404_v36 = vpop.f32.mrb[47].mxu0 }
 0x250   : > { %v7809_v44 = vadd.f32 %v2404_v36, %v2132_v40 }
 0x254   : > { %v6349_v42 = vpop.f32.mrb[0].mxu0 }
 0x255   : > { %v2667_v43 = vadd.f32 %v6349_v42, %v7814_v34  ;;  %v2541_v48 = vpop.f32.mrb[1].mxu0  ;;  %v3176_v42 = vld [vmem:[#allocation2] sm:$0xf] }
 0x256   : > { %v2665_v50 = vadd.f32 %v7814_v34, %v2541_v48  ;;  %v6350_v5 = vpop.f32.mrb[2].mxu0 }
 0x257   : > { %v2690_v47 = vmax.f32 %v2667_v43, 0.0  ;;  %v2668_v38 = vadd.f32 %v6350_v5, %v7814_v34  ;;  %v2544_v9 = vpop.f32.mrb[3].mxu0 }
 0x258   : > { %v2688_v10 = vmax.f32 %v2665_v50, 0.0  ;;  %v2666_v46 = vadd.f32 %v7814_v34, %v2544_v9  ;;  %v2772_v50 = vpop.permute.xlu1 %2771 }
 0x259   : > { %v2851_v6 = vmul.f32 %v2747_v33, %v2690_v47  ;;  %v2691_v51 = vmax.f32 %v2668_v38, 0.0 }
 0x25a   : > { %v2849_v55 = vmul.f32 %v2737_v41, %v2688_v10  ;;  %v2689_v17 = vmax.f32 %v2666_v46, 0.0 }
 0x25b   : > { %v5851_v54 = vpack.c.bf16 %v2851_v6, %v2851_v6  ;;  %v2852_v61 = vmul.f32 %v2752_v49, %v2691_v51 }
 0x25c   : > { %v5849_v57 = vpack.c.bf16 %v2849_v55, %v2849_v55  ;;  %v2850_v13 = vmul.f32 %v2742_v19, %v2689_v17  ;;  %v6353_v59 = vpop.f32.mrb[4].mxu0 }
 0x25d   : > { %v2963_v45 = vshrl.u32 %v5851_v54, 16  ;;  %v5852_v7 = vpack.c.bf16 %v2852_v61, %v2852_v61  ;;  %v6715_v23 = vadd.f32 %v6353_v59, %v7499_v52  ;;  %v2557_v25 = vpop.f32.mrb[5].mxu0  ;;  %v2966_v18 = vshll.u32 %v5851_v54, 16  ;;  %v7828_v52 = vpop.permute.xlu0 %2776 }
 0x25e   : > { %v2946_v21 = vshrl.u32 %v5849_v57, 16  ;;  %v5850_v35 = vpack.c.bf16 %v2850_v13, %v2850_v13  ;;  %v6716_v37 = vadd.f32 %v2557_v25, %v7502_v58  ;;  %v6354_v26 = vpop.f32.mrb[6].mxu0  ;;  %v2949_v39 = vshll.u32 %v5849_v57, 16 }
 0x25f   : > { %v2965_v27 = vrot.slane %v2963_v45, 7  ;;  %v2972_v40 = vshrl.u32 %v5852_v7, 16  ;;  %v2671_v41 = vadd.f32 %v6715_v23, %v7814_v34  ;;  %v2560_v19 = vpop.f32.mrb[7].mxu0  ;;  %v2975_v28 = vshll.u32 %v5852_v7, 16 }
 0x260   : > { %v2948_v20 = vrot.slane %v2946_v21, 7  ;;  %v2954_v30 = vshrl.u32 %v5850_v35, 16  ;;  %v2669_v33 = vadd.f32 %v6716_v37, %v7814_v34  ;;  %v2957_v48 = vshll.u32 %v5850_v35, 16 }
 0x261   : > { %v2968_v36 = vor.u32 %v2966_v18, %v2965_v27  ;;  %v7836_v43 = vrot.slane %v2972_v40, 7  ;;  %v2694_v49 = vmax.f32 %v2671_v41, 0.0  ;;  %v2970_v5 = vrot.slane %v2965_v27, 4  ;;  %v2787_v35 = vpop.permute.xlu0 %2786  ;;  %v2782_v40 = vpop.permute.xlu1 %2781 }
 0x262   : > { %v2951_v38 = vor.u32 %v2949_v39, %v2948_v20  ;;  %v2956_v9 = vrot.slane %v2954_v30, 7  ;;  %v2692_v10 = vmax.f32 %v2669_v33, 0.0  ;;  %v2952_v46 = vrot.slane %v2948_v20, 4 }
 0x263   : > { %v2977_v6 = vor.u32 %v2975_v28, %v7836_v43  ;;  %v2855_v51 = vmul.f32 %v2767_v56, %v2694_v49  ;;  %v6717_v55 = vadd.f32 %v6354_v26, %v7504_v11  ;;  %v6718_v23 = vadd.f32 %v2560_v19, %v7506_v0 }
 0x264   : > { %v3177_v17 = vsel %vm7832_vm13, %v2951_v38, %v3176_v42  ;;  %v2959_v54 = vor.u32 %v2957_v48, %v2956_v9  ;;  %v2961_v61 = vrot.slane %v2956_v9, 4  ;;  %v2853_v57 = vmul.f32 %v7816_v53, %v2692_v10  ;;  %v6357_v13 = vpop.f32.mrb[8].mxu0 }
 0x265   : > { %3178 = vst [vmem:[#allocation2] sm:$0xf] %v3177_v17  ;;  %v2978_v59 = vsel %vm7840_vm14, %v2970_v5, %v2977_v6  ;;  %v5855_v45 = vpack.c.bf16 %v2855_v51, %v2855_v51  ;;  %v2672_v7 = vadd.f32 %v6717_v55, %v7814_v34  ;;  %v2573_v56 = vpop.f32.mrb[9].mxu0  ;;  %v6719_v18 = vadd.f32 %v6357_v13, %v7513_v15  ;;  %v7875_v17 = vpop.permute.xlu0 %2796 }
 0x266   : > { %3182 = vst.msk [vmem:[#allocation2 + $0xc] sm:$0xf] %vm3173_vm10, %v2978_v59  ;;  %v2960_v11 = vsel %vm7840_vm14, %v2952_v46, %v2959_v54  ;;  %v2969_v25 = vsel %vm7840_vm14, %v2961_v61, %v2968_v36  ;;  %v5853_v53 = vpack.c.bf16 %v2853_v57, %v2853_v57  ;;  %v6358_v21 = vpop.f32.mrb[10].mxu0  ;;  %v2670_v27 = vadd.f32 %v6718_v23, %v7814_v34 }
 0x267   : > { %3180 = vst.msk [vmem:[#allocation2 + $0x4] sm:$0xf] %vm3173_vm10, %v2960_v11  ;;  %3181 = vst.msk [vmem:[#allocation2 + $0x8] sm:$0xf] %vm3173_vm10, %v2969_v25  ;;  %v2999_v37 = vshrl.u32 %v5855_v45, 16  ;;  %v3002_v0 = vshll.u32 %v5855_v45, 16  ;;  %v2675_v20 = vadd.f32 %v6719_v18, %v7814_v34  ;;  %v6720_v28 = vadd.f32 %v2573_v56, %v7516_v1 }
 0x268   : > { %v2695_v26 = vmax.f32 %v2672_v7, 0.0  ;;  %v2576_v39 = vpop.f32.mrb[11].mxu0  ;;  %v2981_v41 = vshrl.u32 %v5853_v53, 16  ;;  %v2984_v19 = vshll.u32 %v5853_v53, 16  ;;  %v2693_v33 = vmax.f32 %v2670_v27, 0.0 }
 0x269   : > { %v3001_v15 = vrot.slane %v2999_v37, 7  ;;  %v6721_v36 = vadd.f32 %v6358_v21, %v7518_v2  ;;  %v2698_v48 = vmax.f32 %v2675_v20, 0.0  ;;  %v2673_v49 = vadd.f32 %v6720_v28, %v7814_v34 }
 0x26a   : > { %v2856_v30 = vmul.f32 %v2772_v50, %v2695_v26  ;;  %v2983_v42 = vrot.slane %v2981_v41, 7  ;;  %v6722_v5 = vadd.f32 %v2576_v39, %v7520_v3  ;;  %v2979_v38 = vrot.slane %v7836_v43, 4  ;;  %v2792_v43 = vpop.permute.xlu1 %2791 }
 0x26b   : > { %v3004_v1 = vor.u32 %v3002_v0, %v3001_v15  ;;  %v2854_v50 = vmul.f32 %v7822_v62, %v2693_v33  ;;  %v3006_v2 = vrot.slane %v3001_v15, 4  ;;  %v2859_v6 = vmul.f32 %v2787_v35, %v2698_v48  ;;  %v2807_v15 = vpop.permute.xlu0 %2806 }
 0x26c   : > { %v5856_v9 = vpack.c.bf16 %v2856_v30, %v2856_v30  ;;  %v3209_v10 = vld [vmem:[#allocation2] sm:$0x1]  ;;  %v2986_v46 = vor.u32 %v2984_v19, %v2983_v42  ;;  %v2696_v51 = vmax.f32 %v2673_v49, 0.0  ;;  %v6361_v55 = vpop.f32.mrb[12].mxu0  ;;  %v2988_v61 = vrot.slane %v2983_v42, 4 }
 0x26d   : > { %v3210_v54 = vsel %vm7867_vm15, 0, %v3209_v10  ;;  %v5854_v3 = vpack.c.bf16 %v2854_v50, %v2854_v50  ;;  %v2589_v13 = vpop.f32.mrb[13].mxu0  ;;  %v5859_v59 = vpack.c.bf16 %v2859_v6, %v2859_v6  ;;  %v2676_v7 = vadd.f32 %v6721_v36, %v7814_v34 }
 0x26e   : > { %v3008_v57 = vshrl.u32 %v5856_v9, 16  ;;  %3211 = vst [vmem:[#allocation2] sm:$0x1] %v3210_v54  ;;  %v2987_v62 = vsel %vm7840_vm14, %v2979_v38, %v2986_v46  ;;  %v2857_v45 = vmul.f32 %v7828_v52, %v2696_v51  ;;  %v6362_v23 = vpop.f32.mrb[14].mxu0  ;;  %v3011_v11 = vshll.u32 %v5856_v9, 16  ;;  %v2802_v42 = vpop.permute.xlu1 %2801 }
 0x26f   : > { %3183 = vst.msk [vmem:[#allocation2 + $0x10] sm:$0xf] %vm3173_vm10, %v2987_v62  ;;  %v2990_v25 = vshrl.u32 %v5854_v3, 16  ;;  %v2674_v53 = vadd.f32 %v6722_v5, %v7814_v34  ;;  %v2592_v18 = vpop.f32.mrb[15].mxu0  ;;  %v2993_v21 = vshll.u32 %v5854_v3, 16  ;;  %v3035_v35 = vshrl.u32 %v5859_v59, 16 }
 0x270   : > { %v3010_v56 = vrot.slane %v3008_v57, 7  ;;  %v5857_v37 = vpack.c.bf16 %v2857_v45, %v2857_v45  ;;  %v2699_v0 = vmax.f32 %v2676_v7, 0.0  ;;  %v3038_v39 = vshll.u32 %v5859_v59, 16 }
 0x271   : > { %v2992_v27 = vrot.slane %v2990_v25, 7  ;;  %v2697_v41 = vmax.f32 %v2674_v53, 0.0  ;;  %v3037_v19 = vrot.slane %v3035_v35, 7  ;;  %v6724_v59 = vadd.f32 %v2589_v13, %v7530_v12 }
 0x272   : > { %v3013_v26 = vor.u32 %v3011_v11, %v3010_v56  ;;  %v3015_v52 = vrot.slane %v3010_v56, 4  ;;  %v3017_v20 = vshrl.u32 %v5857_v37, 16  ;;  %v2860_v28 = vmul.f32 %v2792_v43, %v2699_v0  ;;  %v7905_v56 = vpop.permute.xlu0 %2816  ;;  %v2812_v13 = vpop.permute.xlu1 %2811 }
 0x273   : > { %v2995_v33 = vor.u32 %v2993_v21, %v2992_v27  ;;  %v2997_v36 = vrot.slane %v2992_v27, 4  ;;  %v2858_v58 = vmul.f32 %v2782_v40, %v2697_v41  ;;  %v3040_v48 = vor.u32 %v3038_v39, %v3037_v19 }
 0x274   : > { %v3014_v30 = vsel %vm7840_vm14, %v3006_v2, %v3013_v26  ;;  %v3019_v49 = vrot.slane %v3017_v20, 7  ;;  %v3020_v5 = vshll.u32 %v5857_v37, 16  ;;  %v5860_v38 = vpack.c.bf16 %v2860_v28, %v2860_v28  ;;  %v6365_v9 = vpop.f32.mrb[16].mxu0 }
 0x275   : > { %3186 = vst.msk [vmem:[#allocation2 + $0x1c] sm:$0xf] %vm3173_vm10, %v3014_v30  ;;  %v2996_v50 = vsel %vm7840_vm14, %v2988_v61, %v2995_v33  ;;  %v3005_v10 = vsel %vm7840_vm14, %v2997_v36, %v3004_v1  ;;  %v5858_v46 = vpack.c.bf16 %v2858_v58, %v2858_v58  ;;  %v6723_v2 = vadd.f32 %v6361_v55, %v7527_v8  ;;  %v2605_v6 = vpop.f32.mrb[17].mxu0 }
 0x276   : > { %3184 = vst.msk [vmem:[#allocation2 + $0x14] sm:$0xf] %vm3173_vm10, %v2996_v50  ;;  %3185 = vst.msk [vmem:[#allocation2 + $0x18] sm:$0xf] %vm3173_vm10, %v3005_v10  ;;  %v3042_v40 = vrot.slane %v3037_v19, 4  ;;  %v3022_v51 = vor.u32 %v3020_v5, %v3019_v49  ;;  %v3044_v54 = vshrl.u32 %v5860_v38, 16  ;;  %v6725_v45 = vadd.f32 %v6362_v23, %v7536_v63  ;;  %v2827_v5 = vpop.permute.xlu0 %2826  ;;  %v2822_v10 = vpop.permute.xlu1 %2821 }
 0x277   : > { %v3047_v57 = vshll.u32 %v5860_v38, 16  ;;  %v6366_v3 = vpop.f32.mrb[18].mxu0  ;;  %v3026_v43 = vshrl.u32 %v5858_v46, 16  ;;  %v3029_v62 = vshll.u32 %v5858_v46, 16  ;;  %v2679_v61 = vadd.f32 %v6723_v2, %v7814_v34 }
 0x278   : > { %v7897_v1 = vpop.f32.mrb[19].mxu0  ;;  %v3023_v8 = vsel %vm7840_vm14, %v3015_v52, %v3022_v51  ;;  %v7901_v55 = vrot.slane %v3044_v54, 7  ;;  %v6726_v7 = vadd.f32 %v2592_v18, %v7538_v16  ;;  %v2677_v53 = vadd.f32 %v6724_v59, %v7814_v34 }
 0x279   : > { %3187 = vst.msk [vmem:[#allocation2 + $0x20] sm:$0xf] %vm3173_vm10, %v3023_v8  ;;  %v3028_v11 = vrot.slane %v3026_v43, 7  ;;  %v2702_v25 = vmax.f32 %v2679_v61, 0.0  ;;  %v6727_v12 = vadd.f32 %v6365_v9, %v7550_v24  ;;  %v3024_v21 = vrot.slane %v3019_v49, 4 }
 0x27a   : > { %v3049_v35 = vor.u32 %v3047_v57, %v7901_v55  ;;  %v2680_v37 = vadd.f32 %v6725_v45, %v7814_v34  ;;  %v2678_v63 = vadd.f32 %v6726_v7, %v7814_v34  ;;  %v2700_v0 = vmax.f32 %v2677_v53, 0.0 }
 0x27b   : > { %v3031_v23 = vor.u32 %v3029_v62, %v3028_v11  ;;  %v3033_v16 = vrot.slane %v3028_v11, 4  ;;  %v2863_v18 = vmul.f32 %v2807_v15, %v2702_v25  ;;  %v2683_v41 = vadd.f32 %v6727_v12, %v7814_v34 }
 0x27c   : > { %v3050_v26 = vsel %vm7840_vm14, %v3042_v40, %v3049_v35  ;;  %v2703_v27 = vmax.f32 %v2680_v37, 0.0  ;;  %v2701_v39 = vmax.f32 %v2678_v63, 0.0  ;;  %v7916_v24 = vpop.f32.mrb[48].mxu0  ;;  %v2861_v28 = vmul.f32 %v7875_v17, %v2700_v0 }
 0x27d   : > { %3190 = vst.msk [vmem:[#allocation2 + $0x2c] sm:$0xf] %vm3173_vm10, %v3050_v26  ;;  %v3032_v52 = vsel %vm7840_vm14, %v3024_v21, %v3031_v23  ;;  %v3041_v19 = vsel %vm7840_vm14, %v3033_v16, %v3040_v48  ;;  %v5863_v20 = vpack.c.bf16 %v2863_v18, %v2863_v18  ;;  %v2621_v15 = vpop.f32.mrb[49].mxu0  ;;  %v2706_v36 = vmax.f32 %v2683_v41, 0.0 }
 0x27e   : > { %3188 = vst.msk [vmem:[#allocation2 + $0x24] sm:$0xf] %vm3173_vm10, %v3032_v52  ;;  %3189 = vst.msk [vmem:[#allocation2 + $0x28] sm:$0xf] %vm3173_vm10, %v3041_v19  ;;  %v2864_v30 = vmul.f32 %v2812_v13, %v2703_v27  ;;  %v2862_v33 = vmul.f32 %v2802_v42, %v2701_v39  ;;  %v6728_v58 = vadd.f32 %v2605_v6, %v7554_v29  ;;  %v6370_v49 = vpop.f32.mrb[50].mxu0  ;;  %v3051_v11 = vrot.slane %v7901_v55, 4  ;;  %v2832_v13 = vpop.permute.xlu1 %2831 }
 0x27f   : > { %v3071_v38 = vshrl.u32 %v5863_v20, 16  ;;  %v5861_v9 = vpack.c.bf16 %v2861_v28, %v2861_v28  ;;  %v6729_v50 = vadd.f32 %v6366_v3, %v7556_v31  ;;  %v2624_v48 = vpop.f32.mrb[51].mxu0  ;;  %v2867_v2 = vmul.f32 %v2827_v5, %v2706_v36 }
 0x280   : > { %v5864_v46 = vpack.c.bf16 %v2864_v30, %v2864_v30  ;;  %v5862_v17 = vpack.c.bf16 %v2862_v33, %v2862_v33  ;;  %v2681_v40 = vadd.f32 %v6728_v58, %v7814_v34  ;;  %v3074_v57 = vshll.u32 %v5863_v20, 16 }
 0x281   : > { %v3073_v51 = vrot.slane %v3071_v38, 7  ;;  %v3053_v54 = vshrl.u32 %v5861_v9, 16  ;;  %v2684_v42 = vadd.f32 %v6729_v50, %v7814_v34  ;;  %v3056_v43 = vshll.u32 %v5861_v9, 16 }
 0x282   : > { %v3080_v29 = vshrl.u32 %v5864_v46, 16  ;;  %v3062_v6 = vshrl.u32 %v5862_v17, 16  ;;  %v3083_v61 = vshll.u32 %v5864_v46, 16  ;;  %v3065_v59 = vshll.u32 %v5862_v17, 16 }
 0x283   : > { %v3055_v62 = vrot.slane %v3053_v54, 7  ;;  %v7930_v8 = vpack.c.bf16 %v2867_v2, %v2867_v2  ;;  %v2704_v45 = vmax.f32 %v2681_v40, 0.0  ;;  %v2707_v7 = vmax.f32 %v2684_v42, 0.0 }
 0x284   : > { %v3082_v31 = vrot.slane %v3080_v29, 7  ;;  %v3064_v3 = vrot.slane %v3062_v6, 7  ;;  %v3076_v25 = vor.u32 %v3074_v57, %v3073_v51  ;;  %v3078_v53 = vrot.slane %v3073_v51, 4 }
 0x285   : > { %v3058_v12 = vor.u32 %v3056_v43, %v3055_v62  ;;  %v3060_v21 = vrot.slane %v3055_v62, 4  ;;  %v3107_v16 = vshrl.u32 %v7930_v8, 16  ;;  %v2865_v18 = vmul.f32 %v7905_v56, %v2704_v45 }
 0x286   : > { %v3085_v35 = vor.u32 %v3083_v61, %v3082_v31  ;;  %v3067_v37 = vor.u32 %v3065_v59, %v3064_v3  ;;  %v3069_v63 = vrot.slane %v3064_v3, 4  ;;  %v2868_v0 = vmul.f32 %v2832_v13, %v2707_v7 }
 0x287   : > { %v3059_v23 = vsel %vm7840_vm14, %v3051_v11, %v3058_v12  ;;  %v6730_v39 = vadd.f32 %v7897_v1, %v7558_v32  ;;  %v5865_v56 = vpack.c.bf16 %v2865_v18, %v2865_v18  ;;  %v2657_v19 = vadd.f32 %v7916_v24, %v7803_v22 }
 0x288   : > { %3191 = vst.msk [vmem:[#allocation2 + $0x30] sm:$0xf] %vm3173_vm10, %v3059_v23  ;;  %v3086_v55 = vsel %vm7840_vm14, %v3078_v53, %v3085_v35  ;;  %v3068_v26 = vsel %vm7840_vm14, %v3060_v21, %v3067_v37  ;;  %v3077_v27 = vsel %vm7840_vm14, %v3069_v63, %v3076_v25  ;;  %v5868_v41 = vpack.c.bf16 %v2868_v0, %v2868_v0 }
 0x289   : > { %3194 = vst.msk [vmem:[#allocation2 + $0x3c] sm:$0xf] %vm3173_vm10, %v3086_v55  ;;  %3192 = vst.msk [vmem:[#allocation2 + $0x34] sm:$0xf] %vm3173_vm10, %v3068_v26  ;;  %v2682_v52 = vadd.f32 %v6730_v39, %v7814_v34  ;;  %v2655_v20 = vadd.f32 %v2621_v15, %v7805_v4  ;;  %v2656_v28 = vadd.f32 %v2624_v48, %v7809_v44  ;;  %v3109_v30 = vrot.slane %v3107_v16, 7  ;;  %v2837_v15 = vpop.permute.xlu0 %2836 }
 0x28a   : > { %3193 = vst.msk [vmem:[#allocation2 + $0x38] sm:$0xf] %vm3173_vm10, %v3077_v27  ;;  %v3089_v33 = vshrl.u32 %v5865_v56, 16  ;;  %v3116_v32 = vshrl.u32 %v5868_v41, 16  ;;  %v2687_v36 = vadd.f32 %v7814_v34, %v2657_v19  ;;  %v3092_v38 = vshll.u32 %v5865_v56, 16 }
 0x28b   : > { %v2705_v1 = vmax.f32 %v2682_v52, 0.0  ;;  %v2685_v58 = vadd.f32 %v7814_v34, %v2655_v20  ;;  %v2686_v49 = vadd.f32 %v7814_v34, %v2656_v28  ;;  %v3119_v50 = vshll.u32 %v5868_v41, 16  ;;  %v3204_v26 = vld [vmem:[#allocation2 + $0x58] sm:$0x3] }
 0x28c   : > { %v3091_v5 = vrot.slane %v3089_v33, 7  ;;  %v3118_v9 = vrot.slane %v3116_v32, 7  ;;  %v2710_v22 = vmax.f32 %v2687_v36, 0.0  ;;  %v3087_v44 = vrot.slane %v3082_v31, 4 }
 0x28d   : > { %v2866_v46 = vmul.f32 %v2822_v10, %v2705_v1  ;;  %v2708_v24 = vmax.f32 %v2685_v58, 0.0  ;;  %v2709_v4 = vmax.f32 %v2686_v49, 0.0  ;;  %v3114_v48 = vrot.slane %v3109_v30, 4 }
 0x28e   : > { %v3094_v17 = vor.u32 %v3092_v38, %v3091_v5  ;;  %v3121_v2 = vor.u32 %v3119_v50, %v3118_v9  ;;  %v2871_v51 = vmul.f32 %v7807_v60, %v2710_v22  ;;  %v3110_v6 = vshll.u32 %v7930_v8, 16 }
 0x28f   : > { %v5866_v40 = vpack.c.bf16 %v2866_v46, %v2866_v46  ;;  %v2869_v54 = vmul.f32 %v2837_v15, %v2708_v24  ;;  %v2870_v42 = vmul.f32 %v7801_v14, %v2709_v4  ;;  %v3096_v3 = vrot.slane %v3091_v5, 4 }
 0x290   : > { %v3095_v34 = vsel %vm7840_vm14, %v3087_v44, %v3094_v17  ;;  %v3122_v10 = vsel %vm7840_vm14, %v3114_v48, %v3121_v2  ;;  %v5871_v43 = vpack.c.bf16 %v2871_v51, %v2871_v51  ;;  %v3112_v31 = vor.u32 %v3110_v6, %v3109_v30 }
 0x291   : > { %3195 = vst.msk [vmem:[#allocation2 + $0x40] sm:$0xf] %vm3173_vm10, %v3095_v34  ;;  %3198 = vst.msk [vmem:[#allocation2 + $0x4c] sm:$0xf] %vm3173_vm10, %v3122_v10  ;;  %v3098_v57 = vshrl.u32 %v5866_v40, 16  ;;  %v5869_v29 = vpack.c.bf16 %v2869_v54, %v2869_v54  ;;  %v5870_v62 = vpack.c.bf16 %v2870_v42, %v2870_v42  ;;  %v3101_v14 = vshll.u32 %v5866_v40, 16 }
 0x292   : > { %v3143_v61 = vshrl.u32 %v5871_v43, 16  ;;  %v3146_v13 = vshll.u32 %v5871_v43, 16  ;;  %v3123_v37 = vrot.slane %v3118_v9, 4  ;;  %vm3212_vm13 = vcmask 58369  }
 0x293   : > { %v3100_v60 = vrot.slane %v3098_v57, 7  ;;  %v3125_v59 = vshrl.u32 %v5869_v29, 16  ;;  %v3128_v45 = vshll.u32 %v5869_v29, 16  ;;  %v3134_v7 = vshrl.u32 %v5870_v62, 16 }
 0x294   : > { %v3145_v53 = vrot.slane %v3143_v61, 7  ;;  %v3137_v35 = vshll.u32 %v5870_v62, 16  ;;  %vm3213_vm15 = vsmask.f32 7942  ;;  %v7054_v20 = vmov (!%p5702_p7), 0  }
 0x295   : > { %v3103_v11 = vor.u32 %v3101_v14, %v3100_v60  ;;  %v3105_v25 = vrot.slane %v3100_v60, 4  ;;  %v3127_v12 = vrot.slane %v3125_v59, 7  ;;  %v3136_v21 = vrot.slane %v3134_v7, 7  ;;  %vm3214_vm6 = vmand %vm3212_vm13, %vm3213_vm15  ;;  %3222 = vst.msk [vmem:[#allocation2] sm:$0xf] (!%p5702_p7), %vm3173_vm10, %v7054_v20 }
 0x296   : > { %v3148_v16 = vor.u32 %v3146_v13, %v3145_v53  ;;  %3223 = vst.msk [vmem:[#allocation2 + $0x4] sm:$0xf] (!%p5702_p7), %vm3173_vm10, %v7054_v20 }
 0x297   : > { %v3104_v8 = vsel %vm7840_vm14, %v3096_v3, %v3103_v11  ;;  %v3113_v63 = vsel %vm7840_vm14, %v3105_v25, %v3112_v31  ;;  %v3130_v23 = vor.u32 %v3128_v45, %v3127_v12  ;;  %v3132_v18 = vrot.slane %v3127_v12, 4  ;;  %3225 = vst.msk [vmem:[#allocation2 + $0x8] sm:$0x1] (!%p5702_p7), %vm3207_vm12, %v7054_v20 }
 0x298   : > { %3196 = vst.msk [vmem:[#allocation2 + $0x44] sm:$0xf] %vm3173_vm10, %v3104_v8  ;;  %3197 = vst.msk [vmem:[#allocation2 + $0x48] sm:$0xf] %vm3173_vm10, %v3113_v63  ;;  %v3139_v0 = vor.u32 %v3137_v35, %v3136_v21  ;;  %v3141_v55 = vrot.slane %v3136_v21, 4 }
 0x299   : > { %v3131_v27 = vsel %vm7840_vm14, %v3123_v37, %v3130_v23 }
 0x29a   : > { %3199 = vst.msk [vmem:[#allocation2 + $0x50] sm:$0xf] %vm3173_vm10, %v3131_v27  ;;  %v3140_v39 = vsel %vm7840_vm14, %v3132_v18, %v3139_v0  ;;  %v3149_v56 = vsel %vm7840_vm14, %v3141_v55, %v3148_v16 }
 0x29b   : > { %3200 = vst.msk [vmem:[#allocation2 + $0x54] sm:$0xf] %vm3173_vm10, %v3140_v39  ;;  %v3205_v41 = vsel %vm3203_vm11, %v3149_v56, %v3204_v26 }
 0x29c   : > { %3206 = vst [vmem:[#allocation2 + $0x58] sm:$0x3] %v3205_v41 }
 0x29f   : > { %3221 = sbr.rel (%p5702_p7) target bundleno = 678 (0x2a6), region = 48 }
 0x2a3   : > { %v3215_v52 = vld [vmem:[#allocation2 + $0x58] sm:$0x2] }
 0x2a4   : > { %v3216_v19 = vsel %vm3214_vm6, 0, %v3215_v52 }
 0x2a5   : > { %3217 = vst [vmem:[#allocation2 + $0x58] sm:$0x2] %v3216_v19 }
 0x2a6 PF: > { %p5703_p8 = scmp.ne.s32.totalorder %s7035_s21, 1 }
 0x2a7   : > { %vm3230_vm14 = vcmask (!%p5703_p8), 60417   ;;  %v7055_v47 = vmov (!%p5703_p8), 0  }
 0x2a8   : > { %3229 = sbr.rel (%p5703_p8) target bundleno = 687 (0x2af), region = 52  ;;  %3231 = vst.msk [vmem:[#allocation2 + $0x50] sm:$0xe] (!%p5703_p8), %vm3230_vm14, %v7055_v47 }
 0x2a9   : > { %3232 = vst.msk [vmem:[#allocation2 + $0x54] sm:$0xf] (!%p5703_p8), %vm3173_vm10, %v7055_v47 }
 0x2aa   : > { %3234 = vst.msk [vmem:[#allocation2 + $0x58] sm:$0x3] (!%p5703_p8), %vm3201_vm8, %v7055_v47 }
 0x2af PF: > { %v5704_v28 = vld [vmem:[%s9072_s3 + $0x4] sm:$0xf]  ;;  %v3235_v30 = vld [vmem:[#allocation2] sm:$0xf]  ;;  %v7056_v33 = vmov 0.0   ;;  %vm7057_vm6 = vmmov 0  }
 0x2b0   : > { %6371 = vmatprep.subr.bf16.mxu1 %v7056_v33  ;;  %v3409_v32 = vsel %vm507_vm0, %v5704_v28, 0  ;;  %6373 = vmatprep.mubr.msk.bf16.mxu1 %vm7057_vm6, %v7056_v33  ;;  %v7996_v1 = vld [vmem:[#allocation2 + $0x4] sm:$0xf]  ;;  %v7998_v36 = vld [vmem:[#allocation2 + $0x8] sm:$0xff]   ;;  %v8006_v5 = vld [vmem:[#allocation2 + $0x10] sm:$0xff]  }
 0x2b1   : > { %6372 = vmatpush3.bf16.msra.mxu1 %v3409_v32  ;;  %v8001_v58 = vcombine.low %v3235_v30, %v7996_v1  ;;  %6599 = vmatprep.subr.bf16.mxu0 %v7056_v33  ;;  %v3313_v49 = vshll.u32 %v7998_v36, 16  ;;  %v3253_v50 = vld [vmem:[%s9072_s3] sm:$0xf]  ;;  %v3317_v4 = vshrl.u32 %v7998_v36, 16  ;;  %v3321_v15 = vshll.u32 %v8006_v5, 16  ;;  %v8022_v40 = vld [vmem:[#allocation2 + $0x18] sm:$0xff]  }
 0x2b2   : > { %6409 = vmatprep.subr.bf16.mxu1 %v7056_v33  ;;  %6601 = vmatprep.mubr.msk.bf16.mxu0 %vm7057_vm6, %v7056_v33  ;;  %v3535_v44 = vsel %vm507_vm0, %v3253_v50, 0  ;;  %v3325_v54 = vshrl.u32 %v8006_v5, 16  ;;  %v3329_v42 = vshll.u32 %v8022_v40, 16  ;;  %v8028_v34 = vld [vmem:[#allocation2 + $0x20] sm:$0xff]   ;;  %v3333_v43 = vshrl.u32 %v8022_v40, 16  ;;  %v8039_v14 = vld [vmem:[#allocation2 + $0x28] sm:$0xff]  }
 0x2b3   : > { %v3306_v38 = vshrl.u32 %v8001_v58, 16  ;;  %v3308_v9 = vshll.u32 %v8001_v58, 16  ;;  %v3315_v22 = vrot.slane %v3313_v49, 1  ;;  %v3323_v2 = vrot.slane %v3321_v15, 1  ;;  %v8047_v7 = vld [vmem:[#allocation2 + $0x30] sm:$0xff]   ;;  %v8055_v21 = vld [vmem:[#allocation2 + $0x38] sm:$0xff]  }
 0x2b4   : > { %v3331_v57 = vrot.slane %v3329_v42, 1  ;;  %v3337_v29 = vshll.u32 %v8028_v34, 16  ;;  %v3341_v59 = vshrl.u32 %v8028_v34, 16  ;;  %v3345_v31 = vshll.u32 %v8039_v14, 16  ;;  %v8063_v16 = vld [vmem:[#allocation2 + $0x40] sm:$0xff]  }
 0x2b5   : > { %v3310_v46 = vrot.slane %v3308_v9, 1  ;;  %v3319_v17 = vor.u32 %v3317_v4, %v3315_v22  ;;  %v3327_v10 = vor.u32 %v3325_v54, %v3323_v2  ;;  %v3349_v25 = vshrl.u32 %v8039_v14, 16  ;;  %v8071_v39 = vld [vmem:[#allocation2 + $0x48] ss:$0 sps:$4 sm:$0x11]  }
 0x2b6   : > { %v3335_v62 = vor.u32 %v3333_v43, %v3331_v57  ;;  %v3339_v60 = vrot.slane %v3337_v29, 1  ;;  %v3347_v45 = vrot.slane %v3345_v31, 1  ;;  %v3353_v53 = vshll.u32 %v8047_v7, 16  ;;  %v5733_v28 = vld [vmem:[%s9072_s3 + $0x8] sm:$0xf]  ;;  %v8177_v29 = vld [vmem:[#allocation2 + $0x10] sm:$0xff]  }
 0x2b7   : > { %v3311_v24 = vor.u32 %v3310_v46, %v3306_v38  ;;  %v3324_v51 = vsel %vm374_vm1, %v3319_v17, %v3323_v2  ;;  %v3332_v6 = vsel %vm374_vm1, %v3327_v10, %v3331_v57  ;;  %v3357_v37 = vshrl.u32 %v8047_v7, 16  ;;  %v3642_v32 = vld [vmem:[#allocation2] sm:$0xe]  ;;  %v5744_v9 = vld [vmem:[%s9072_s3 + $0xc] sm:$0xf] }
 0x2b8   : > { %v3340_v61 = vsel %vm374_vm1, %v3335_v62, %v3339_v60  ;;  %v3343_v3 = vor.u32 %v3341_v59, %v3339_v60  ;;  %v3351_v12 = vor.u32 %v3349_v25, %v3347_v45  ;;  %v3355_v13 = vrot.slane %v3353_v53, 1  ;;  %v8171_v10 = vld [vmem:[#allocation2 + $0xc] sm:$0xf] }
 0x2b9   : > { %v3316_v48 = vsel %vm374_vm1, %v3311_v24, %v3315_v22  ;;  %v3361_v8 = vshll.u32 %v8055_v21, 16  ;;  %v3365_v0 = vshrl.u32 %v8055_v21, 16  ;;  %v3369_v55 = vshll.u32 %v8063_v16, 16 }
 0x2ba   : > { %6374 = vmatmul.mubr.msk.bf16.vlgmr.msra.gmra.mrb[20].mxu1 %vm470_vm2, %v3316_v48  ;;  %v3348_v11 = vsel %vm374_vm1, %v3343_v3, %v3347_v45  ;;  %v3356_v35 = vsel %vm374_vm1, %v3351_v12, %v3355_v13  ;;  %v3359_v63 = vor.u32 %v3357_v37, %v3355_v13  ;;  %v3373_v41 = vshrl.u32 %v8063_v16, 16  ;;  %v8192_v3 = vld [vmem:[#allocation2 + $0x18] sm:$0xff]  }
 0x2bb   : > { %6410 = vmatpush3.bf16.msra.mxu1 %v3535_v44  ;;  %6377 = vmatprep.mubr.msk.bf16.mxu1 %vm7057_vm6, %v7056_v33  ;;  %v3363_v23 = vrot.slane %v3361_v8, 1  ;;  %v3371_v27 = vrot.slane %v3369_v55, 1  ;;  %v3377_v52 = vshll.u32 %v8071_v39, 16  ;;  %v3695_v30 = vsel %vm507_vm0, %v5733_v28, 0  ;;  %v4487_v8 = vld [vmem:[#allocation2 + $0x10] sm:$0xc] }
 0x2bc   : > { %6447 = vmatprep.subr.bf16.mxu1 %v7056_v33  ;;  %v3649_v38 = vrot.slane %v7998_v36, 1  ;;  %v3936_v46 = vsel %vm507_vm0, %v5744_v9, 0  ;;  %v3653_v22 = vrot.slane %v8022_v40, 1  ;;  %v3657_v15 = vrot.slane %v8039_v14, 1  ;;  %v5817_v28 = vld [vmem:[%s9072_s3 + $0x20] sm:$0xf] }
 0x2bd   : > { %v3364_v18 = vsel %vm374_vm1, %v3359_v63, %v3363_v23  ;;  %v3367_v26 = vor.u32 %v3365_v0, %v3363_v23  ;;  %v3375_v19 = vor.u32 %v3373_v41, %v3371_v27  ;;  %v3379_v20 = vrot.slane %v3377_v52, 1  ;;  %v8211_v63 = vld [vmem:[#allocation2 + $0x14] sm:$0xf]  ;;  %v5786_v23 = vld [vmem:[%s9072_s3 + $0x18] sm:$0xf]  ;;  %v8229_v52 = vld [vmem:[#allocation2 + $0x28] sm:$0xff]  }
 0x2be   : > { %v3659_v48 = vrot.slane %v8047_v7, 1  ;;  %v3661_v2 = vrot.slane %v8055_v21, 1  ;;  %v3665_v42 = vrot.slane %v8071_v39, 1  ;;  %v3890_v62 = vrot.slane %v8177_v29, 1 }
 0x2bf   : > { %v3372_v56 = vsel %vm374_vm1, %v3367_v26, %v3371_v27  ;;  %v3380_v47 = vsel %vm374_vm1, %v3375_v19, %v3379_v20  ;;  %v4603_v55 = vsel %vm507_vm0, %v5786_v23, 0 }
 0x2c0   : > { %v3660_v17 = vsel %vm804_vm3, %v3657_v15, %v3659_v48  ;;  %6600 = vmatpush3.bf16.msra.mxu0 %v4603_v55 }
 0x2c1   : > { %6675 = vmatprep.subr.bf16.mxu0 %v7056_v33 }
 0x2c2   : > { %6378 = vmatmul.mubr.msk.bf16.gmra.mrb[24].mxu1 %vm470_vm2, %v3324_v51  ;;  %v3663_v51 = vrot.slane %v8063_v16, 1 }
 0x2c3   : > { %6381 = vmatprep.mubr.msk.bf16.mxu1 %vm7057_vm6, %v7056_v33 }
 0x2c4   : > { %v3664_v54 = vsel %vm804_vm3, %v3661_v2, %v3663_v51  ;;  %v3666_v57 = vsel %vm804_vm3, %v3663_v51, %v3665_v42 }
 0x2ca   : > { %6382 = vmatmul.mubr.msk.bf16.gmra.mrb[28].mxu1 %vm470_vm2, %v3332_v6 }
 0x2cb   : > { %6385 = vmatprep.mubr.msk.bf16.mxu1 %vm7057_vm6, %v7056_v33 }
 0x2d2   : > { %6386 = vmatmul.mubr.msk.bf16.gmra.mrb[32].mxu1 %vm470_vm2, %v3340_v61 }
 0x2d3   : > { %6389 = vmatprep.mubr.msk.bf16.mxu1 %vm7057_vm6, %v7056_v33 }
 0x2da   : > { %6390 = vmatmul.mubr.msk.bf16.gmra.mrb[36].mxu1 %vm470_vm2, %v3348_v11  ;;  %v3892_v11 = vrot.slane %v8192_v3, 1 }
 0x2db   : > { %6393 = vmatprep.mubr.msk.bf16.mxu1 %vm7057_vm6, %v7056_v33 }
 0x2dc   : > { %v3893_v13 = vsel %vm804_vm3, %v3890_v62, %v3892_v11 }
 0x2e2   : > { %6394 = vmatmul.mubr.msk.bf16.gmra.mrb[40].mxu1 %vm470_vm2, %v3356_v35 }
 0x2e3   : > { %6397 = vmatprep.mubr.msk.bf16.mxu1 %vm7057_vm6, %v7056_v33 }
 0x2ea   : > { %6398 = vmatmul.mubr.msk.bf16.gmra.mrb[44].mxu1 %vm470_vm2, %v3364_v18  ;;  %v8219_v18 = vld [vmem:[#allocation2 + $0x18] sm:$0xff]  }
 0x2eb   : > { %6401 = vmatprep.mubr.msk.bf16.mxu1 %vm7057_vm6, %v7056_v33  ;;  %v4557_v39 = vrot.slane %v8219_v18, 2 }
 0x2f2   : > { %6402 = vmatmul.mubr.msk.bf16.gmra.mrb[48].mxu1 %vm470_vm2, %v3372_v56 }
 0x2f3   : > { %6405 = vmatprep.mubr.msk.bf16.mxu1 %vm7057_vm6, %v7056_v33 }
 0x2fa   : > { %6406 = vmatmul.mubr.msk.bf16.gmra.mrb[52].mxu1 %vm470_vm2, %v3380_v47  ;;  %v3896_v47 = vrot.slane %v8229_v52, 1 }
 0x2fb   : > { %6411 = vmatprep.mubr.msk.bf16.mxu1 %vm7057_vm6, %v7056_v33 }
 0x302   : > { %6412 = vmatmul.mubr.msk.bf16.vlgmr.msra.gmra.mrb[56].mxu1 %vm470_vm2, %v8001_v58  ;;  %v5734_v58 = vcombine.low %v3642_v32, %v7996_v1  ;;  %v3651_v1 = vrot.slane %v8006_v5, 1  ;;  %v8244_v32 = vld [vmem:[#allocation2 + $0x20] sm:$0xff]  }
 0x303   : > { %6448 = vmatpush3.bf16.msra.mxu1 %v3695_v30  ;;  %6415 = vmatprep.mubr.msk.bf16.mxu1 %vm7057_vm6, %v7056_v33  ;;  %v5029_v30 = vsel %vm507_vm0, %v5817_v28, 0 }
 0x304   : > { %6485 = vmatprep.subr.bf16.mxu1 %v7056_v33  ;;  %v3648_v49 = vrot.slane %v5734_v58, 1  ;;  %v3654_v24 = vsel %vm804_vm3, %v3651_v1, %v3653_v22 }
 0x306   : > { %v3650_v50 = vsel %vm804_vm3, %v3648_v49, %v3649_v38 }
 0x30a   : > { %6416 = vmatmul.mubr.msk.bf16.gmra.mrb[60].mxu1 %vm470_vm2, %v7998_v36  ;;  %v3652_v36 = vsel %vm804_vm3, %v3649_v38, %v3651_v1  ;;  %v4559_v38 = vrot.slane %v8244_v32, 2 }
 0x30b   : > { %6419 = vmatprep.mubr.msk.bf16.mxu1 %vm7057_vm6, %v7056_v33 }
 0x312   : > { %6420 = vmatmul.mubr.msk.bf16.gmra.mrb[64].mxu1 %vm470_vm2, %v8006_v5  ;;  %v3655_v5 = vrot.slane %v8028_v34, 1 }
 0x313   : > { %6423 = vmatprep.mubr.msk.bf16.mxu1 %vm7057_vm6, %v7056_v33 }
 0x314   : > { %v3656_v4 = vsel %vm804_vm3, %v3653_v22, %v3655_v5  ;;  %v3658_v44 = vsel %vm804_vm3, %v3655_v5, %v3657_v15 }
 0x31a   : > { %6424 = vmatmul.mubr.msk.bf16.gmra.mrb[68].mxu1 %vm470_vm2, %v8022_v40  ;;  %v3662_v40 = vsel %vm804_vm3, %v3659_v48, %v3661_v2 }
 0x31b   : > { %6427 = vmatprep.mubr.msk.bf16.mxu1 %vm7057_vm6, %v7056_v33 }
 0x322   : > { %6428 = vmatmul.mubr.msk.bf16.gmra.mrb[72].mxu1 %vm470_vm2, %v8028_v34  ;;  %v3820_v34 = vld [vmem:[#allocation2 + $0x8] sm:$0xe] }
 0x323   : > { %6431 = vmatprep.mubr.msk.bf16.mxu1 %vm7057_vm6, %v7056_v33  ;;  %v8175_v43 = vcombine.low %v3820_v34, %v8171_v10 }
 0x325   : > { %v3889_v6 = vrot.slane %v8175_v43, 1 }
 0x327   : > { %v3891_v31 = vsel %vm804_vm3, %v3889_v6, %v3890_v62 }
 0x32a   : > { %6432 = vmatmul.mubr.msk.bf16.gmra.mrb[76].mxu1 %vm470_vm2, %v8039_v14  ;;  %v5764_v14 = vld [vmem:[%s9072_s3 + $0x10] sm:$0xf] }
 0x32b   : > { %6435 = vmatprep.mubr.msk.bf16.mxu1 %vm7057_vm6, %v7056_v33 }
 0x332   : > { %6436 = vmatmul.mubr.msk.bf16.gmra.mrb[80].mxu1 %vm470_vm2, %v8047_v7  ;;  %v4184_v7 = vsel %vm507_vm0, %v5764_v14, 0  ;;  %v8288_v14 = vld [vmem:[#allocation2 + $0x40] sm:$0xff]  }
 0x333   : > { %6439 = vmatprep.mubr.msk.bf16.mxu1 %vm7057_vm6, %v7056_v33 }
 0x33a   : > { %6440 = vmatmul.mubr.msk.bf16.gmra.mrb[84].mxu1 %vm470_vm2, %v8055_v21  ;;  %v8205_v21 = vld [vmem:[#allocation2 + $0x20] sm:$0xff]  }
 0x33b   : > { %6443 = vmatprep.mubr.msk.bf16.mxu1 %vm7057_vm6, %v7056_v33  ;;  %v3894_v37 = vrot.slane %v8205_v21, 1 }
 0x33d   : > { %v3895_v41 = vsel %vm804_vm3, %v3892_v11, %v3894_v37 }
 0x342   : > { %6444 = vmatmul.mubr.msk.bf16.gmra.mrb[88].mxu1 %vm470_vm2, %v8063_v16  ;;  %v8217_v16 = vcombine.low %v4487_v8, %v8211_v63  ;;  %v8306_v8 = vld [vmem:[#allocation2 + $0x48] sm:$0xff]  }
 0x343   : > { %6449 = vmatprep.mubr.msk.bf16.mxu1 %vm7057_vm6, %v7056_v33 }
 0x344   : > { %v4556_v27 = vrot.slane %v8217_v16, 2 }
 0x346   : > { %v4558_v20 = vsel %vm1624_vm4, %v4556_v27, %v4557_v39  ;;  %v8316_v27 = vld [vmem:[#allocation2 + $0x40] sm:$0xff]  }
 0x347   : > { %6602 = vmatmul.mubr.msk.bf16.vlgmr.msra.gmra.mrb[52].mxu0 %vm470_vm2, %v4558_v20  ;;  %v4567_v20 = vrot.slane %v8316_v27, 2 }
 0x348   : > { %6605 = vmatprep.mubr.msk.bf16.mxu0 %vm7057_vm6, %v7056_v33  ;;  %6676 = vmatpush3.bf16.msra.mxu0 %v5029_v30 }
 0x34a   : > { %6450 = vmatmul.mubr.msk.bf16.vlgmr.msra.gmra.mrb[92].mxu1 %vm470_vm2, %v3650_v50  ;;  %v3897_v50 = vsel %vm804_vm3, %v3894_v37, %v3896_v47 }
 0x34b   : > { %6486 = vmatpush3.bf16.msra.mxu1 %v3936_v46  ;;  %6453 = vmatprep.mubr.msk.bf16.mxu1 %vm7057_vm6, %v7056_v33  ;;  %v8252_v46 = vld [vmem:[#allocation2 + $0x30] sm:$0xff]  }
 0x34c   : > { %6523 = vmatprep.subr.bf16.mxu1 %v7056_v33  ;;  %v3898_v22 = vrot.slane %v8252_v46, 1 }
 0x34e   : > { %v3899_v48 = vsel %vm804_vm3, %v3896_v47, %v3898_v22 }
 0x352   : > { %6454 = vmatmul.mubr.msk.bf16.gmra.mrb[96].mxu1 %vm470_vm2, %v3652_v36  ;;  %v4560_v36 = vsel %vm1624_vm4, %v4557_v39, %v4559_v38 }
 0x353   : > { %6457 = vmatprep.mubr.msk.bf16.mxu1 %vm7057_vm6, %v7056_v33  ;;  %6606 = vmatmul.mubr.msk.bf16.gmra.mrb[56].mxu0 %vm470_vm2, %v4560_v36  ;;  %v4076_v36 = vshrl.u32 %v8177_v29, 16 }
 0x354   : > { %6609 = vmatprep.mubr.msk.bf16.mxu0 %vm7057_vm6, %v7056_v33 }
 0x35a   : > { %6458 = vmatmul.mubr.msk.bf16.gmra.mrb[100].mxu1 %vm470_vm2, %v3654_v24  ;;  %v8262_v24 = vld [vmem:[#allocation2 + $0x28] sm:$0xff]  }
 0x35b   : > { %6461 = vmatprep.mubr.msk.bf16.mxu1 %vm7057_vm6, %v7056_v33  ;;  %v4561_v15 = vrot.slane %v8262_v24, 2 }
 0x362   : > { %6462 = vmatmul.mubr.msk.bf16.gmra.mrb[104].mxu1 %vm470_vm2, %v3656_v4 }
 0x363   : > { %6465 = vmatprep.mubr.msk.bf16.mxu1 %vm7057_vm6, %v7056_v33 }
 0x36a   : > { %6466 = vmatmul.mubr.msk.bf16.gmra.mrb[108].mxu1 %vm470_vm2, %v3658_v44 }
 0x36b   : > { %6469 = vmatprep.mubr.msk.bf16.mxu1 %vm7057_vm6, %v7056_v33 }
 0x372   : > { %6470 = vmatmul.mubr.msk.bf16.gmra.mrb[112].mxu1 %vm470_vm2, %v3660_v17  ;;  %v8270_v17 = vld [vmem:[#allocation2 + $0x38] sm:$0xff]  }
 0x373   : > { %6473 = vmatprep.mubr.msk.bf16.mxu1 %vm7057_vm6, %v7056_v33  ;;  %v3900_v51 = vrot.slane %v8270_v17, 1 }
 0x375   : > { %v3901_v62 = vsel %vm804_vm3, %v3898_v22, %v3900_v51  ;;  %v4079_v22 = vshll.u32 %v8177_v29, 16 }
 0x37a   : > { %6474 = vmatmul.mubr.msk.bf16.gmra.mrb[116].mxu1 %vm470_vm2, %v3662_v40  ;;  %v4562_v40 = vsel %vm1624_vm4, %v4559_v38, %v4561_v15 }
 0x37b   : > { %6477 = vmatprep.mubr.msk.bf16.mxu1 %vm7057_vm6, %v7056_v33  ;;  %6610 = vmatmul.mubr.msk.bf16.gmra.mrb[60].mxu0 %vm470_vm2, %v4562_v40 }
 0x37c   : > { %6613 = vmatprep.mubr.msk.bf16.mxu0 %vm7057_vm6, %v7056_v33 }
 0x382   : > { %6478 = vmatmul.mubr.msk.bf16.gmra.mrb[120].mxu1 %vm470_vm2, %v3664_v54  ;;  %v8280_v54 = vld [vmem:[#allocation2 + $0x30] sm:$0xff]  }
 0x383   : > { %6481 = vmatprep.mubr.msk.bf16.mxu1 %vm7057_vm6, %v7056_v33 }
 0x38a   : > { %6482 = vmatmul.mubr.msk.bf16.gmra.mrb[124].mxu1 %vm470_vm2, %v3666_v57  ;;  %v4563_v57 = vrot.slane %v8280_v54, 2 }
 0x38b   : > { %6487 = vmatprep.mubr.msk.bf16.mxu1 %vm7057_vm6, %v7056_v33 }
 0x38d   : > { %v8184_v60 = vpop.f32.mrb[20].mxu1 }
 0x38e   : > { %v6375_v61 = vpop.f32.mrb[21].mxu1 }
 0x38f   : > { %v8189_v59 = vpop.f32.mrb[22].mxu1 }
 0x390   : > { %v6376_v45 = vpop.f32.mrb[23].mxu1 }
 0x391   : > { %v3902_v45 = vrot.slane %v8288_v14, 1 }
 0x392   : > { %6488 = vmatmul.mubr.msk.bf16.vlgmr.msra.gmra.mrb[128].mxu1 %vm470_vm2, %v3891_v31  ;;  %v4564_v31 = vsel %vm1624_vm4, %v4561_v15, %v4563_v57 }
 0x393   : > { %6524 = vmatpush3.bf16.msra.mxu1 %v4184_v7  ;;  %6491 = vmatprep.mubr.msk.bf16.mxu1 %vm7057_vm6, %v7056_v33  ;;  %v8298_v7 = vld [vmem:[#allocation2 + $0x38] sm:$0xff]   ;;  %v3903_v37 = vsel %vm804_vm3, %v3900_v51, %v3902_v45 }
 0x394   : > { %6561 = vmatprep.subr.bf16.mxu1 %v7056_v33  ;;  %6614 = vmatmul.mubr.msk.bf16.gmra.mrb[64].mxu0 %vm470_vm2, %v4564_v31 }
 0x395   : > { %v8200_v25 = vpop.f32.mrb[24].mxu1  ;;  %6617 = vmatprep.mubr.msk.bf16.mxu0 %vm7057_vm6, %v7056_v33 }
 0x396   : > { %v6379_v53 = vpop.f32.mrb[25].mxu1 }
 0x397   : > { %v8202_v12 = vpop.f32.mrb[26].mxu1 }
 0x398   : > { %v6380_v35 = vpop.f32.mrb[27].mxu1 }
 0x39a   : > { %6492 = vmatmul.mubr.msk.bf16.gmra.mrb[132].mxu1 %vm470_vm2, %v3893_v13  ;;  %v4565_v13 = vrot.slane %v8298_v7, 2 }
 0x39b   : > { %6495 = vmatprep.mubr.msk.bf16.mxu1 %vm7057_vm6, %v7056_v33 }
 0x39c   : > { %v4566_v55 = vsel %vm1624_vm4, %v4563_v57, %v4565_v13 }
 0x39d   : > { %v8221_v0 = vpop.f32.mrb[28].mxu1  ;;  %6618 = vmatmul.mubr.msk.bf16.gmra.mrb[68].mxu0 %vm470_vm2, %v4566_v55 }
 0x39e   : > { %v6383_v26 = vpop.f32.mrb[29].mxu1  ;;  %6621 = vmatprep.mubr.msk.bf16.mxu0 %vm7057_vm6, %v7056_v33 }
 0x39f   : > { %v8226_v56 = vpop.f32.mrb[30].mxu1  ;;  %v3904_v26 = vrot.slane %v8306_v8, 1 }
 0x3a0   : > { %v6384_v19 = vpop.f32.mrb[31].mxu1 }
 0x3a1   : > { %v6998_v19 = vld [vmem:[#allocation2 + $0x50] ss:$0 sps:$4 sm:$0x11]   ;;  %v3905_v28 = vsel %vm804_vm3, %v3902_v45, %v3904_v26 }
 0x3a2   : > { %6496 = vmatmul.mubr.msk.bf16.gmra.mrb[136].mxu1 %vm470_vm2, %v3895_v41  ;;  %v3906_v38 = vrot.slane %v6998_v19, 1 }
 0x3a3   : > { %6499 = vmatprep.mubr.msk.bf16.mxu1 %vm7057_vm6, %v7056_v33 }
 0x3a5   : > { %v8246_v58 = vpop.f32.mrb[32].mxu1 }
 0x3a6   : > { %v6387_v49 = vpop.f32.mrb[33].mxu1 }
 0x3a7   : > { %v8249_v9 = vpop.f32.mrb[34].mxu1  ;;  %v4568_v49 = vsel %vm1624_vm4, %v4565_v13, %v4567_v20  ;;  %v4085_v13 = vshrl.u32 %v8192_v3, 16 }
 0x3a8   : > { %v6388_v1 = vpop.f32.mrb[35].mxu1  ;;  %6622 = vmatmul.mubr.msk.bf16.gmra.mrb[72].mxu0 %vm470_vm2, %v4568_v49 }
 0x3a9   : > { %6625 = vmatprep.mubr.msk.bf16.mxu0 %vm7057_vm6, %v7056_v33  ;;  %v4071_v1 = vshll.u32 %v8175_v43, 16  ;;  %v4087_v49 = vrot.slane %v4085_v13, 1 }
 0x3aa   : > { %6500 = vmatmul.mubr.msk.bf16.gmra.mrb[140].mxu1 %vm470_vm2, %v3897_v50  ;;  %v4068_v50 = vshrl.u32 %v8175_v43, 16 }
 0x3ab   : > { %6503 = vmatprep.mubr.msk.bf16.mxu1 %vm7057_vm6, %v7056_v33  ;;  %v4073_v57 = vrot.slane %v4071_v1, 2 }
 0x3ad   : > { %v8264_v5 = vpop.f32.mrb[36].mxu1 }
 0x3ae   : > { %v6391_v4 = vpop.f32.mrb[37].mxu1 }
 0x3af   : > { %v8267_v44 = vpop.f32.mrb[38].mxu1  ;;  %v8335_v4 = vld [vmem:[#allocation2 + $0x48] sm:$0xff]  }
 0x3b0   : > { %v6392_v2 = vpop.f32.mrb[39].mxu1  ;;  %v4569_v40 = vrot.slane %v8335_v4, 2 }
 0x3b1   : > { %v3907_v2 = vsel %vm804_vm3, %v3904_v26, %v3906_v38  ;;  %v5775_v26 = vld [vmem:[%s9072_s3 + $0x14] sm:$0xf] }
 0x3b2   : > { %6504 = vmatmul.mubr.msk.bf16.gmra.mrb[144].mxu1 %vm470_vm2, %v3899_v48  ;;  %v4570_v31 = vsel %vm1624_vm4, %v4567_v20, %v4569_v40 }
 0x3b3   : > { %6507 = vmatprep.mubr.msk.bf16.mxu1 %vm7057_vm6, %v7056_v33  ;;  %6626 = vmatmul.mubr.msk.bf16.gmra.mrb[76].mxu0 %vm470_vm2, %v4570_v31 }
 0x3b4   : > { %6629 = vmatprep.mubr.msk.bf16.mxu0 %vm7057_vm6, %v7056_v33 }
 0x3b5   : > { %v8282_v42 = vpop.f32.mrb[40].mxu1 }
 0x3b6   : > { %v6395_v34 = vpop.f32.mrb[41].mxu1 }
 0x3b7   : > { %v8285_v6 = vpop.f32.mrb[42].mxu1  ;;  %v4070_v34 = vrot.slane %v4068_v50, 1 }
 0x3b8   : > { %v6396_v61 = vpop.f32.mrb[43].mxu1 }
 0x3b9   : > { %v4081_v61 = vrot.slane %v4079_v22, 2  ;;  %v4074_v45 = vor.u32 %v4073_v57, %v4070_v34 }
 0x3ba   : > { %6508 = vmatmul.mubr.msk.bf16.gmra.mrb[148].mxu1 %vm470_vm2, %v3901_v62  ;;  %v4078_v62 = vrot.slane %v4076_v36, 1  ;;  %v4362_v36 = vsel %vm507_vm0, %v5775_v26, 0  ;;  %v4106_v26 = vshll.u32 %v8229_v52, 16 }
 0x3bb   : > { %6511 = vmatprep.mubr.msk.bf16.mxu1 %vm7057_vm6, %v7056_v33 }
 0x3bd   : > { %v8300_v11 = vpop.f32.mrb[44].mxu1 }
 0x3be   : > { %v6399_v53 = vpop.f32.mrb[45].mxu1 }
 0x3bf   : > { %v8303_v35 = vpop.f32.mrb[46].mxu1  ;;  %v4082_v53 = vor.u32 %v4081_v61, %v4078_v62 }
 0x3c0   : > { %v6400_v23 = vpop.f32.mrb[47].mxu1 }
 0x3c1   : > { %v8352_v23 = vld [vmem:[#allocation2 + $0x50] sm:$0xff]  }
 0x3c2   : > { %6512 = vmatmul.mubr.msk.bf16.gmra.mrb[152].mxu1 %vm470_vm2, %v3903_v37  ;;  %v4088_v37 = vshll.u32 %v8192_v3, 16  ;;  %v4571_v20 = vrot.slane %v8352_v23, 2 }
 0x3c3   : > { %6515 = vmatprep.mubr.msk.bf16.mxu1 %vm7057_vm6, %v7056_v33 }
 0x3c4   : > { %v4090_v38 = vrot.slane %v4088_v37, 2  ;;  %v4572_v22 = vsel %vm1624_vm4, %v4569_v40, %v4571_v20 }
 0x3c5   : > { %v8318_v39 = vpop.f32.mrb[48].mxu1  ;;  %6630 = vmatmul.mubr.msk.bf16.gmra.mrb[80].mxu0 %vm470_vm2, %v4572_v22 }
 0x3c6   : > { %v6403_v41 = vpop.f32.mrb[49].mxu1  ;;  %6633 = vmatprep.mubr.msk.bf16.mxu0 %vm7057_vm6, %v7056_v33 }
 0x3c7   : > { %v8321_v47 = vpop.f32.mrb[50].mxu1 }
 0x3c8   : > { %v6404_v30 = vpop.f32.mrb[51].mxu1 }
 0x3c9   : > { %v4083_v30 = vsel %vm1320_vm5, %v4074_v45, %v4082_v53 }
 0x3ca   : > { %6516 = vmatmul.mubr.msk.bf16.gmra.mrb[156].mxu1 %vm470_vm2, %v3905_v28 }
 0x3cb   : > { %6519 = vmatprep.mubr.msk.bf16.mxu1 %vm7057_vm6, %v7056_v33 }
 0x3cd   : > { %v8337_v15 = vpop.f32.mrb[52].mxu1 }
 0x3ce   : > { %v6407_v48 = vpop.f32.mrb[53].mxu1 }
 0x3cf   : > { %v8341_v51 = vpop.f32.mrb[54].mxu1  ;;  %v4097_v48 = vshll.u32 %v8205_v21, 16 }
 0x3d0   : > { %v6408_v43 = vpop.f32.mrb[55].mxu1 }
 0x3d1   : > { %v4099_v45 = vrot.slane %v4097_v48, 2 }
 0x3d2   : > { %6520 = vmatmul.mubr.msk.bf16.gmra.mrb[160].mxu1 %vm470_vm2, %v3907_v2  ;;  %v7010_v2 = vld [vmem:[#allocation2 + $0x58] ss:$0 sps:$4 sm:$0x33]  }
 0x3d3   : > { %6525 = vmatprep.mubr.msk.bf16.mxu1 %vm7057_vm6, %v7056_v33  ;;  %v4573_v62 = vrot.slane %v7010_v2, 2 }
 0x3d5   : > { %v3571_v55 = vpop.f32.mrb[56].mxu1 }
 0x3d6   : > { %v8358_v41 = vadd.f32 %v3571_v55, %v8184_v60  ;;  %v6413_v19 = vpop.f32.mrb[57].mxu1  ;;  %v4091_v60 = vor.u32 %v4090_v38, %v4087_v49  ;;  %v4574_v55 = vsel %vm1624_vm4, %v4571_v20, %v4573_v62  ;;  %v4983_v38 = vrot.slane %v8219_v18, 3 }
 0x3d7   : > { %v3574_v28 = vpop.f32.mrb[58].mxu1  ;;  %6634 = vmatmul.mubr.msk.bf16.gmra.mrb[84].mxu0 %vm470_vm2, %v4574_v55 }
 0x3d8   : > { %v8363_v50 = vadd.f32 %v3574_v28, %v8189_v59  ;;  %v6414_v1 = vpop.f32.mrb[59].mxu1  ;;  %v4094_v59 = vshrl.u32 %v8205_v21, 16  ;;  %v4092_v43 = vsel %vm1320_vm5, %v4082_v53, %v4091_v60  ;;  %6677 = vmatprep.mubr.msk.bf16.mxu0 %vm7057_vm6, %v7056_v33  ;;  %v4103_v53 = vshrl.u32 %v8229_v52, 16 }
 0x3da   : > { %6526 = vmatmul.mubr.msk.bf16.vlgmr.msra.gmra.mrb[164].mxu1 %vm470_vm2, %v4083_v30  ;;  %v4096_v31 = vrot.slane %v4094_v59, 1  ;;  %v4105_v22 = vrot.slane %v4103_v53, 1  ;;  %v4108_v59 = vrot.slane %v4106_v26, 2 }
 0x3db   : > { %6562 = vmatpush3.bf16.msra.mxu1 %v4362_v36  ;;  %6529 = vmatprep.mubr.msk.bf16.mxu1 %vm7057_vm6, %v7056_v33 }
 0x3dc   : > { %6637 = vmatprep.subr.bf16.mxu1 %v7056_v33 }
 0x3dd   : > { %v3579_v40 = vpop.f32.mrb[60].mxu1 }
 0x3de   : > { %v8377_v34 = vadd.f32 %v3579_v40, %v8200_v25  ;;  %v6417_v57 = vpop.f32.mrb[61].mxu1  ;;  %v4100_v25 = vor.u32 %v4099_v45, %v4096_v31 }
 0x3df   : > { %v3582_v61 = vpop.f32.mrb[62].mxu1 }
 0x3e0   : > { %v8381_v13 = vadd.f32 %v3582_v61, %v8202_v12  ;;  %v6418_v37 = vpop.f32.mrb[63].mxu1  ;;  %v4976_v12 = vld [vmem:[#allocation2 + $0x10] sm:$0x8]  ;;  %v4101_v36 = vsel %vm1320_vm5, %v4091_v60, %v4100_v25  ;;  %v4115_v60 = vshll.u32 %v8252_v46, 16  ;;  %v4985_v61 = vrot.slane %v8244_v32, 3 }
 0x3e1   : > { %v5818_v19 = vcombine.low %v4976_v12, %v8211_v63  ;;  %v4109_v63 = vor.u32 %v4108_v59, %v4105_v22  ;;  %v4124_v12 = vshll.u32 %v8270_v17, 16 }
 0x3e2   : > { %6530 = vmatmul.mubr.msk.bf16.gmra.mrb[168].mxu1 %vm470_vm2, %v4092_v43  ;;  %v4117_v37 = vrot.slane %v4115_v60, 2  ;;  %v4986_v26 = vsel %vm2444_vm7, %v4983_v38, %v4985_v61 }
 0x3e3   : > { %6533 = vmatprep.mubr.msk.bf16.mxu1 %vm7057_vm6, %v7056_v33  ;;  %v4982_v49 = vrot.slane %v5818_v19, 3  ;;  %v4110_v31 = vsel %vm1320_vm5, %v4100_v25, %v4109_v63  ;;  %v4121_v25 = vshrl.u32 %v8270_v17, 16 }
 0x3e5   : > { %v3587_v28 = vpop.f32.mrb[64].mxu1  ;;  %v4984_v40 = vsel %vm2444_vm7, %v4982_v49, %v4983_v38 }
 0x3e6   : > { %v8394_v20 = vadd.f32 %v3587_v28, %v8221_v0  ;;  %v6421_v30 = vpop.f32.mrb[65].mxu1  ;;  %6678 = vmatmul.mubr.msk.bf16.vlgmr.msra.gmra.mrb[88].mxu0 %vm470_vm2, %v4984_v40  ;;  %v4112_v0 = vshrl.u32 %v8252_v46, 16  ;;  %v4130_v40 = vshrl.u32 %v8288_v14, 16 }
 0x3e7   : > { %v3590_v1 = vpop.f32.mrb[66].mxu1  ;;  %6681 = vmatprep.mubr.msk.bf16.mxu0 %vm7057_vm6, %v7056_v33  ;;  %v4987_v30 = vrot.slane %v8262_v24, 3 }
 0x3e8   : > { %v8399_v48 = vadd.f32 %v3590_v1, %v8226_v56  ;;  %v6422_v2 = vpop.f32.mrb[67].mxu1  ;;  %v4114_v45 = vrot.slane %v4112_v0, 1  ;;  %v4123_v1 = vrot.slane %v4121_v25, 1 }
 0x3e9   : > { %v4988_v2 = vsel %vm2444_vm7, %v4985_v61, %v4987_v30 }
 0x3ea   : > { %6534 = vmatmul.mubr.msk.bf16.gmra.mrb[172].mxu1 %vm470_vm2, %v4101_v36  ;;  %v4126_v36 = vrot.slane %v4124_v12, 2 }
 0x3eb   : > { %6537 = vmatprep.mubr.msk.bf16.mxu1 %vm7057_vm6, %v7056_v33 }
 0x3ed   : > { %v3595_v56 = vpop.f32.mrb[68].mxu1 }
 0x3ee   : > { %v8411_v57 = vadd.f32 %v3595_v56, %v8246_v58  ;;  %v6425_v62 = vpop.f32.mrb[69].mxu1  ;;  %6682 = vmatmul.mubr.msk.bf16.gmra.mrb[92].mxu0 %vm470_vm2, %v4986_v26  ;;  %v4118_v58 = vor.u32 %v4117_v37, %v4114_v45  ;;  %v4989_v56 = vrot.slane %v8280_v54, 3  ;;  %v4139_v26 = vshrl.u32 %v8306_v8, 16 }
 0x3ef   : > { %v3598_v43 = vpop.f32.mrb[70].mxu1  ;;  %6685 = vmatprep.mubr.msk.bf16.mxu0 %vm7057_vm6, %v7056_v33 }
 0x3f0   : > { %v8416_v55 = vadd.f32 %v3598_v43, %v8249_v9  ;;  %v6426_v53 = vpop.f32.mrb[71].mxu1  ;;  %v4119_v38 = vsel %vm1320_vm5, %v4109_v63, %v4118_v58  ;;  %v4133_v63 = vshll.u32 %v8288_v14, 16  ;;  %v4132_v43 = vrot.slane %v4130_v40, 1 }
 0x3f1   : > { %v4990_v53 = vsel %vm2444_vm7, %v4987_v30, %v4989_v56 }
 0x3f2   : > { %6538 = vmatmul.mubr.msk.bf16.gmra.mrb[176].mxu1 %vm470_vm2, %v4110_v31  ;;  %v4135_v31 = vrot.slane %v4133_v63, 2 }
 0x3f3   : > { %6541 = vmatprep.mubr.msk.bf16.mxu1 %vm7057_vm6, %v7056_v33 }
 0x3f5   : > { %v3603_v9 = vpop.f32.mrb[72].mxu1 }
 0x3f6   : > { %v8428_v19 = vadd.f32 %v3603_v9, %v8264_v5  ;;  %v6429_v28 = vpop.f32.mrb[73].mxu1  ;;  %6686 = vmatmul.mubr.msk.bf16.gmra.mrb[96].mxu0 %vm470_vm2, %v4988_v2  ;;  %v4127_v5 = vor.u32 %v4126_v36, %v4123_v1  ;;  %v4991_v9 = vrot.slane %v8298_v7, 3  ;;  %v8466_v1 = vld [vmem:[#allocation2 + $0x50] ss:$0 sps:$4 sm:$0x33]  }
 0x3f7   : > { %v3606_v49 = vpop.f32.mrb[74].mxu1  ;;  %6689 = vmatprep.mubr.msk.bf16.mxu0 %vm7057_vm6, %v7056_v33  ;;  %v4151_v40 = vshll.u32 %v8466_v1, 16 }
 0x3f8   : > { %v8433_v22 = vadd.f32 %v3606_v49, %v8267_v44  ;;  %v6430_v59 = vpop.f32.mrb[75].mxu1  ;;  %v4128_v61 = vsel %vm1320_vm5, %v4118_v58, %v4127_v5  ;;  %v4142_v58 = vshll.u32 %v8306_v8, 16  ;;  %v4141_v49 = vrot.slane %v4139_v26, 1 }
 0x3f9   : > { %v4992_v2 = vsel %vm2444_vm7, %v4989_v56, %v4991_v9 }
 0x3fa   : > { %6542 = vmatmul.mubr.msk.bf16.gmra.mrb[180].mxu1 %vm470_vm2, %v4119_v38  ;;  %v4144_v38 = vrot.slane %v4142_v58, 2 }
 0x3fb   : > { %6545 = vmatprep.mubr.msk.bf16.mxu1 %vm7057_vm6, %v7056_v33 }
 0x3fd   : > { %v3611_v44 = vpop.f32.mrb[76].mxu1 }
 0x3fe   : > { %v8445_v0 = vadd.f32 %v3611_v44, %v8282_v42  ;;  %v6433_v60 = vpop.f32.mrb[77].mxu1  ;;  %6690 = vmatmul.mubr.msk.bf16.gmra.mrb[100].mxu0 %vm470_vm2, %v4990_v53  ;;  %v4136_v42 = vor.u32 %v4135_v31, %v4132_v43  ;;  %v4153_v43 = vrot.slane %v4151_v40, 2 }
 0x3ff   : > { %v3614_v62 = vpop.f32.mrb[78].mxu1  ;;  %6693 = vmatprep.mubr.msk.bf16.mxu0 %vm7057_vm6, %v7056_v33  ;;  %v4993_v60 = vrot.slane %v8316_v27, 3 }
 0x400   : > { %v8450_v45 = vadd.f32 %v3614_v62, %v8285_v6  ;;  %v6434_v37 = vpop.f32.mrb[79].mxu1  ;;  %v4137_v30 = vsel %vm1320_vm5, %v4127_v5, %v4136_v42  ;;  %v4148_v5 = vshrl.u32 %v8466_v1, 16 }
 0x401   : > { %v4994_v53 = vsel %vm2444_vm7, %v4991_v9, %v4993_v60 }
 0x402   : > { %6546 = vmatmul.mubr.msk.bf16.gmra.mrb[184].mxu1 %vm470_vm2, %v4128_v61  ;;  %v4150_v61 = vrot.slane %v4148_v5, 1  ;;  %v4997_v5 = vrot.slane %v8352_v23, 3 }
 0x403   : > { %6549 = vmatprep.mubr.msk.bf16.mxu1 %vm7057_vm6, %v7056_v33 }
 0x405   : > { %v3619_v6 = vpop.f32.mrb[80].mxu1 }
 0x406   : > { %v8462_v25 = vadd.f32 %v3619_v6, %v8300_v11  ;;  %v6437_v12 = vpop.f32.mrb[81].mxu1  ;;  %6694 = vmatmul.mubr.msk.bf16.gmra.mrb[104].mxu0 %vm470_vm2, %v4992_v2  ;;  %v4145_v11 = vor.u32 %v4144_v38, %v4141_v49  ;;  %v4995_v6 = vrot.slane %v8335_v4, 3 }
 0x407   : > { %v3622_v28 = vpop.f32.mrb[82].mxu1  ;;  %6697 = vmatprep.mubr.msk.bf16.mxu0 %vm7057_vm6, %v7056_v33 }
 0x408   : > { %v8469_v36 = vadd.f32 %v3622_v28, %v8303_v35  ;;  %v6438_v59 = vpop.f32.mrb[83].mxu1  ;;  %v4146_v62 = vsel %vm1320_vm5, %v4136_v42, %v4145_v11  ;;  %v4309_v42 = vld [vmem:[#allocation2 + $0x8] sm:$0xc]  ;;  %v4996_v38 = vsel %vm2444_vm7, %v4993_v60, %v4995_v6 }
 0x409   : > { %v5776_v28 = vcombine.low %v4309_v42, %v8171_v10  ;;  %v4316_v59 = vrot.slane %v8177_v29, 2 }
 0x40a   : > { %6550 = vmatmul.mubr.msk.bf16.gmra.mrb[188].mxu1 %vm470_vm2, %v4137_v30 }
 0x40b   : > { %6553 = vmatprep.mubr.msk.bf16.mxu1 %vm7057_vm6, %v7056_v33 }
 0x40d   : > { %v3627_v35 = vpop.f32.mrb[84].mxu1 }
 0x40e   : > { %v8481_v63 = vadd.f32 %v3627_v35, %v8318_v39  ;;  %v6441_v44 = vpop.f32.mrb[85].mxu1  ;;  %6698 = vmatmul.mubr.msk.bf16.gmra.mrb[108].mxu0 %vm470_vm2, %v4994_v53  ;;  %v4154_v39 = vor.u32 %v4153_v43, %v4150_v61 }
 0x40f   : > { %v3630_v56 = vpop.f32.mrb[86].mxu1  ;;  %6701 = vmatprep.mubr.msk.bf16.mxu0 %vm7057_vm6, %v7056_v33 }
 0x410   : > { %v8486_v31 = vadd.f32 %v3630_v56, %v8321_v47  ;;  %v6442_v37 = vpop.f32.mrb[87].mxu1  ;;  %v4155_v9 = vsel %vm1320_vm5, %v4145_v11, %v4154_v39  ;;  %v4998_v56 = vsel %vm2444_vm7, %v4995_v6, %v4997_v5 }
 0x412   : > { %6554 = vmatmul.mubr.msk.bf16.gmra.mrb[192].mxu1 %vm470_vm2, %v4146_v62 }
 0x413   : > { %6557 = vmatprep.mubr.msk.bf16.mxu1 %vm7057_vm6, %v7056_v33 }
 0x415   : > { %v3635_v26 = vpop.f32.mrb[88].mxu1 }
 0x416   : > { %v8496_v58 = vadd.f32 %v3635_v26, %v8337_v15  ;;  %v6445_v47 = vpop.f32.mrb[89].mxu1  ;;  %6702 = vmatmul.mubr.msk.bf16.gmra.mrb[112].mxu0 %vm470_vm2, %v4996_v38  ;;  %v4315_v15 = vrot.slane %v5776_v28, 2  ;;  %v4322_v38 = vrot.slane %v8229_v52, 2 }
 0x417   : > { %v3638_v12 = vpop.f32.mrb[90].mxu1  ;;  %6705 = vmatprep.mubr.msk.bf16.mxu0 %vm7057_vm6, %v7056_v33 }
 0x418   : > { %v8502_v30 = vadd.f32 %v3638_v12, %v8341_v51  ;;  %v6446_v49 = vpop.f32.mrb[91].mxu1  ;;  %v5806_v51 = vld [vmem:[%s9072_s3 + $0x1c] sm:$0xf]  ;;  %v4317_v35 = vsel %vm1624_vm4, %v4315_v15, %v4316_v59 }
 0x419   : > { %v4851_v29 = vsel %vm507_vm0, %v5806_v51, 0  ;;  %vm9083_vm0 = vsmask.f32 5376 }
 0x41a   : > { %6558 = vmatmul.mubr.msk.bf16.gmra.mrb[196].mxu1 %vm470_vm2, %v4155_v9  ;;  %vm9084_vm1 = vmmov %vm9083_vm0 }
 0x41b   : > { %6563 = vmatprep.mubr.msk.bf16.mxu1 %vm7057_vm6, %v7056_v33  ;;  %vm9085_vm3 = vmmov %vm9083_vm0 }
 0x41c   : > { %vm9087_vm5 = vmmov %vm9083_vm0 }
 0x41d   : > { %v3731_v10 = vpop.f32.mrb[92].mxu1  ;;  %vm9089_vm12 = vmmov %vm9083_vm0 }
 0x41e   : > { %v8516_v2 = vadd.f32 %v3731_v10, %v8358_v41  ;;  %v6451_v11 = vpop.f32.mrb[93].mxu1  ;;  %6706 = vmatmul.mubr.msk.bf16.gmra.mrb[116].mxu0 %vm470_vm2, %v4998_v56  ;;  %v4318_v41 = vrot.slane %v8192_v3, 2  ;;  %v4320_v3 = vrot.slane %v8205_v21, 2  ;;  %vm9090_vm8 = vmmov %vm9083_vm0 }
 0x41f   : > { %v3734_v40 = vpop.f32.mrb[94].mxu1  ;;  %6709 = vmatprep.mubr.msk.bf16.mxu0 %vm7057_vm6, %v7056_v33  ;;  %v4324_v11 = vrot.slane %v8252_v46, 2  ;;  %vm9091_vm9 = vmmov %vm9083_vm0 }
 0x420   : > { %v8521_v44 = vadd.f32 %v3734_v40, %v8363_v50  ;;  %v6452_v60 = vpop.f32.mrb[95].mxu1  ;;  %v8532_v50 = vld [vmem:[#allocation2 + $0x58] ss:$0 sps:$4 sm:$0x77]   ;;  %v4319_v39 = vsel %vm1624_vm4, %v4316_v59, %v4318_v41  ;;  %v4323_v10 = vsel %vm1624_vm4, %v4320_v3, %v4322_v38 }
 0x421   : > { %v4999_v37 = vrot.slane %v8532_v50, 3 }
 0x422   : > { %6564 = vmatmul.mubr.msk.bf16.vlgmr.msra.gmra.mrb[200].mxu1 %vm470_vm2, %v4317_v35  ;;  %v4325_v35 = vsel %vm1624_vm4, %v4322_v38, %v4324_v11  ;;  %v4743_v38 = vshrl.u32 %v8219_v18, 16 }
 0x423   : > { %6638 = vmatpush3.bf16.msra.mxu1 %v4851_v29  ;;  %6567 = vmatprep.mubr.msk.bf16.mxu1 %vm7057_vm6, %v7056_v33  ;;  %v5000_v47 = vsel %vm2444_vm7, %v4997_v5, %v4999_v37  ;;  %v4326_v29 = vrot.slane %v8270_v17, 2  ;;  %v4328_v37 = vrot.slane %v8288_v14, 2  ;;  %vm9088_vm7 = vmmov %vm9083_vm0 }
 0x425   : > { %v3739_v62 = vpop.f32.mrb[96].mxu1 }
 0x426   : > { %v8535_v61 = vadd.f32 %v3739_v62, %v8377_v34  ;;  %v6455_v43 = vpop.f32.mrb[97].mxu1  ;;  %6710 = vmatmul.mubr.msk.bf16.gmra.mrb[120].mxu0 %vm470_vm2, %v5000_v47  ;;  %v4327_v62 = vsel %vm1624_vm4, %v4324_v11, %v4326_v29 }
 0x427   : > { %v3742_v53 = vpop.f32.mrb[98].mxu1 }
 0x428   : > { %v8540_v42 = vadd.f32 %v3742_v53, %v8381_v13  ;;  %v6456_v26 = vpop.f32.mrb[99].mxu1  ;;  %v4321_v13 = vsel %vm1624_vm4, %v4318_v41, %v4320_v3  ;;  %v4330_v3 = vrot.slane %v8306_v8, 2  ;;  %v4735_v8 = vshrl.u32 %v8217_v16, 16 }
 0x429   : > { %v4329_v26 = vsel %vm1624_vm4, %v4326_v29, %v4328_v37 }
 0x42a   : > { %6568 = vmatmul.mubr.msk.bf16.gmra.mrb[204].mxu1 %vm470_vm2, %v4319_v39 }
 0x42b   : > { %6571 = vmatprep.mubr.msk.bf16.mxu1 %vm7057_vm6, %v7056_v33 }
 0x42d   : > { %v3747_v34 = vpop.f32.mrb[100].mxu1 }
 0x42e   : > { %v8549_v6 = vadd.f32 %v3747_v34, %v8394_v20  ;;  %v6459_v12 = vpop.f32.mrb[101].mxu1 }
 0x42f   : > { %v3750_v9 = vpop.f32.mrb[102].mxu1 }
 0x430   : > { %v8553_v28 = vadd.f32 %v3750_v9, %v8399_v48  ;;  %v6460_v49 = vpop.f32.mrb[103].mxu1  ;;  %v4331_v9 = vsel %vm1624_vm4, %v4328_v37, %v4330_v3 }
 0x431   : > { %v4332_v49 = vrot.slane %v8466_v1, 2  ;;  %v4737_v1 = vrot.slane %v4735_v8, 2 }
 0x432   : > { %6572 = vmatmul.mubr.msk.bf16.gmra.mrb[208].mxu1 %vm470_vm2, %v4321_v13 }
 0x433   : > { %6575 = vmatprep.mubr.msk.bf16.mxu1 %vm7057_vm6, %v7056_v33 }
 0x435   : > { %v3755_v21 = vpop.f32.mrb[104].mxu1 }
 0x436   : > { %v8560_v15 = vadd.f32 %v3755_v21, %v8411_v57  ;;  %v6463_v20 = vpop.f32.mrb[105].mxu1  ;;  %v4746_v21 = vshll.u32 %v8219_v18, 16 }
 0x437   : > { %v3758_v59 = vpop.f32.mrb[106].mxu1 }
 0x438   : > { %v8564_v51 = vadd.f32 %v3758_v59, %v8416_v55  ;;  %v6464_v48 = vpop.f32.mrb[107].mxu1 }
 0x43a   : > { %6576 = vmatmul.mubr.msk.bf16.gmra.mrb[212].mxu1 %vm470_vm2, %v4323_v10  ;;  %v4333_v10 = vsel %vm1624_vm4, %v4330_v3, %v4332_v49  ;;  %v8654_v49 = vpop.f32.mrb[52].mxu0  ;;  %vm9086_vm4 = vmmov %vm9083_vm0 }
 0x43b   : > { %6579 = vmatprep.mubr.msk.bf16.mxu1 %vm7057_vm6, %v7056_v33 }
 0x43d   : > { %v3763_v52 = vpop.f32.mrb[108].mxu1 }
 0x43e   : > { %v8571_v5 = vadd.f32 %v3763_v52, %v8428_v19  ;;  %v6467_v57 = vpop.f32.mrb[109].mxu1  ;;  %v4745_v52 = vrot.slane %v4743_v38, 2 }
 0x43f   : > { %v3766_v40 = vpop.f32.mrb[110].mxu1  ;;  %v4748_v57 = vrot.slane %v4746_v21, 3 }
 0x440   : > { %v8575_v60 = vadd.f32 %v3766_v40, %v8433_v22  ;;  %v6468_v55 = vpop.f32.mrb[111].mxu1 }
 0x441   : > { %v4755_v55 = vshll.u32 %v8244_v32, 16 }
 0x442   : > { %6580 = vmatmul.mubr.msk.bf16.gmra.mrb[216].mxu1 %vm470_vm2, %v4325_v35  ;;  %v4752_v35 = vshrl.u32 %v8244_v32, 16 }
 0x443   : > { %6583 = vmatprep.mubr.msk.bf16.mxu1 %vm7057_vm6, %v7056_v33 }
 0x445   : > { %v3771_v46 = vpop.f32.mrb[112].mxu1 }
 0x446   : > { %v8582_v56 = vadd.f32 %v3771_v46, %v8445_v0  ;;  %v6471_v19 = vpop.f32.mrb[113].mxu1 }
 0x447   : > { %v3774_v41 = vpop.f32.mrb[114].mxu1 }
 0x448   : > { %v8586_v43 = vadd.f32 %v3774_v41, %v8450_v45  ;;  %v6472_v22 = vpop.f32.mrb[115].mxu1 }
 0x449   : > { %v4757_v22 = vrot.slane %v4755_v55, 3 }
 0x44a   : > { %6584 = vmatmul.mubr.msk.bf16.gmra.mrb[220].mxu1 %vm470_vm2, %v4327_v62  ;;  %v4754_v62 = vrot.slane %v4752_v35, 2 }
 0x44b   : > { %6587 = vmatprep.mubr.msk.bf16.mxu1 %vm7057_vm6, %v7056_v33 }
 0x44c   : > { %v4758_v32 = vor.u32 %v4757_v22, %v4754_v62 }
 0x44d   : > { %v3779_v17 = vpop.f32.mrb[116].mxu1 }
 0x44e   : > { %v8593_v53 = vadd.f32 %v3779_v17, %v8462_v25  ;;  %v6475_v0 = vpop.f32.mrb[117].mxu1 }
 0x44f   : > { %v3782_v39 = vpop.f32.mrb[118].mxu1  ;;  %v4761_v0 = vshrl.u32 %v8262_v24, 16 }
 0x450   : > { %v8597_v47 = vadd.f32 %v3782_v39, %v8469_v36  ;;  %v6476_v45 = vpop.f32.mrb[119].mxu1 }
 0x452   : > { %6588 = vmatmul.mubr.msk.bf16.gmra.mrb[224].mxu1 %vm470_vm2, %v4329_v26 }
 0x453   : > { %6591 = vmatprep.mubr.msk.bf16.mxu1 %vm7057_vm6, %v7056_v33 }
 0x455   : > { %v3787_v14 = vpop.f32.mrb[120].mxu1 }
 0x456   : > { %v8604_v34 = vadd.f32 %v3787_v14, %v8481_v63  ;;  %v6479_v25 = vpop.f32.mrb[121].mxu1  ;;  %v4738_v63 = vshll.u32 %v8217_v16, 16  ;;  %v4763_v14 = vrot.slane %v4761_v0, 2 }
 0x457   : > { %v3790_v12 = vpop.f32.mrb[122].mxu1 }
 0x458   : > { %v8608_v13 = vadd.f32 %v3790_v12, %v8486_v31  ;;  %v6480_v36 = vpop.f32.mrb[123].mxu1  ;;  %v4740_v11 = vrot.slane %v4738_v63, 3  ;;  %v6603_v63 = vpop.f32.mrb[53].mxu0 }
 0x459   : > { %v4770_v36 = vshrl.u32 %v8280_v54, 16  ;;  %v8659_v21 = vpop.f32.mrb[54].mxu0 }
 0x45a   : > { %6592 = vmatmul.mubr.msk.bf16.gmra.mrb[228].mxu1 %vm470_vm2, %v4331_v9  ;;  %v4741_v18 = vor.u32 %v4740_v11, %v4737_v1  ;;  %v6604_v1 = vpop.f32.mrb[55].mxu0 }
 0x45b   : > { %6595 = vmatprep.mubr.msk.bf16.mxu1 %vm7057_vm6, %v7056_v33 }
 0x45d   : > { %v3795_v20 = vpop.f32.mrb[124].mxu1 }
 0x45e   : > { %v8619_v31 = vadd.f32 %v3795_v20, %v8496_v58  ;;  %v6483_v59 = vpop.f32.mrb[125].mxu1  ;;  %v4749_v58 = vor.u32 %v4748_v57, %v4745_v52  ;;  %v4779_v52 = vshrl.u32 %v8298_v7, 16  ;;  %v4782_v57 = vshll.u32 %v8298_v7, 16 }
 0x45f   : > { %v3798_v48 = vpop.f32.mrb[126].mxu1 }
 0x460   : > { %v8623_v40 = vadd.f32 %v3798_v48, %v8502_v30  ;;  %v6484_v16 = vpop.f32.mrb[127].mxu1  ;;  %v4750_v30 = vsel %vm9083_vm0, %v4741_v18, %v4749_v58 }
 0x461   : > { %v8670_v16 = vpop.f32.mrb[56].mxu0 }
 0x462   : > { %6596 = vmatmul.mubr.msk.bf16.gmra.mrb[232].mxu1 %vm470_vm2, %v4333_v10  ;;  %v4772_v10 = vrot.slane %v4770_v36, 2 }
 0x463   : > { %6639 = vmatprep.mubr.msk.bf16.mxu1 %vm7057_vm6, %v7056_v33 }
 0x465   : > { %v3972_v29 = vpop.f32.mrb[128].mxu1 }
 0x466   : > { %v8631_v46 = vadd.f32 %v3972_v29, %v8516_v2  ;;  %v6489_v19 = vpop.f32.mrb[129].mxu1  ;;  %v4764_v2 = vshll.u32 %v8262_v24, 16 }
 0x467   : > { %v3975_v41 = vpop.f32.mrb[130].mxu1 }
 0x468   : > { %v8635_v37 = vadd.f32 %v3975_v41, %v8521_v44  ;;  %v6490_v17 = vpop.f32.mrb[131].mxu1  ;;  %v4759_v44 = vsel %vm9084_vm1, %v4749_v58, %v4758_v32  ;;  %v4766_v25 = vrot.slane %v4764_v2, 3  ;;  %v6607_v58 = vpop.f32.mrb[57].mxu0  ;;  %v4781_v41 = vrot.slane %v4779_v52, 2 }
 0x469   : > { %v8675_v55 = vpop.f32.mrb[58].mxu0  ;;  %v4788_v17 = vshrl.u32 %v8316_v27, 16  ;;  %v4809_v58 = vshll.u32 %v8352_v23, 16 }
 0x46a   : > { %6640 = vmatmul.mubr.msk.bf16.vlgmr.msra.gmra.mrb[236].mxu1 %vm470_vm2, %v4750_v30  ;;  %v4767_v24 = vor.u32 %v4766_v25, %v4763_v14  ;;  %v4784_v30 = vrot.slane %v4782_v57, 3  ;;  %v6608_v62 = vpop.f32.mrb[59].mxu0 }
 0x46b   : > { %6643 = vmatprep.mubr.msk.bf16.mxu1 %vm7057_vm6, %v7056_v33  ;;  %v8686_v0 = vpop.f32.mrb[60].mxu0  ;;  %v4790_v25 = vrot.slane %v4788_v17, 2  ;;  %v4811_v17 = vrot.slane %v4809_v58, 3 }
 0x46c   : > { %v4768_v59 = vsel %vm9085_vm3, %v4758_v32, %v4767_v24  ;;  %v4791_v32 = vshll.u32 %v8316_v27, 16 }
 0x46d   : > { %v3980_v39 = vpop.f32.mrb[132].mxu1 }
 0x46e   : > { %v8643_v26 = vadd.f32 %v3980_v39, %v8535_v61  ;;  %v6493_v45 = vpop.f32.mrb[133].mxu1  ;;  %v4773_v61 = vshll.u32 %v8280_v54, 16  ;;  %v6611_v39 = vpop.f32.mrb[61].mxu0 }
 0x46f   : > { %v3983_v3 = vpop.f32.mrb[134].mxu1  ;;  %v4815_v39 = vshrl.u32 %v8532_v50, 16 }
 0x470   : > { %v8647_v12 = vadd.f32 %v3983_v3, %v8540_v42  ;;  %v6494_v9 = vpop.f32.mrb[135].mxu1  ;;  %v4775_v48 = vrot.slane %v4773_v61, 3  ;;  %v8691_v3 = vpop.f32.mrb[62].mxu0  ;;  %v4797_v61 = vshrl.u32 %v8335_v4, 16 }
 0x471   : > { %v4793_v9 = vrot.slane %v4791_v32, 3 }
 0x472   : > { %6644 = vmatmul.mubr.msk.bf16.gmra.mrb[240].mxu1 %vm470_vm2, %v4759_v44 }
 0x473   : > { %6647 = vmatprep.mubr.msk.bf16.mxu1 %vm7057_vm6, %v7056_v33 }
 0x475   : > { %v3988_v8 = vpop.f32.mrb[136].mxu1 }
 0x476   : > { %v8657_v38 = vadd.f32 %v3988_v8, %v8549_v6  ;;  %v6497_v42 = vpop.f32.mrb[137].mxu1  ;;  %v4776_v6 = vor.u32 %v4775_v48, %v4772_v10  ;;  %v4800_v8 = vshll.u32 %v8335_v4, 16 }
 0x477   : > { %v3991_v20 = vpop.f32.mrb[138].mxu1 }
 0x478   : > { %v8663_v11 = vadd.f32 %v3991_v20, %v8553_v28  ;;  %v6498_v54 = vpop.f32.mrb[139].mxu1  ;;  %v4777_v19 = vsel %vm9086_vm4, %v4767_v24, %v4776_v6  ;;  %v6612_v24 = vpop.f32.mrb[63].mxu0 }
 0x479   : > { %v8702_v63 = vpop.f32.mrb[64].mxu0  ;;  %v4799_v54 = vrot.slane %v4797_v61, 2  ;;  %v4817_v61 = vrot.slane %v4815_v39, 2 }
 0x47a   : > { %6648 = vmatmul.mubr.msk.bf16.gmra.mrb[244].mxu1 %vm470_vm2, %v4768_v59  ;;  %v6615_v20 = vpop.f32.mrb[65].mxu0 }
 0x47b   : > { %6651 = vmatprep.mubr.msk.bf16.mxu1 %vm7057_vm6, %v7056_v33  ;;  %v8707_v10 = vpop.f32.mrb[66].mxu0 }
 0x47c   : > { %v6616_v52 = vpop.f32.mrb[67].mxu0 }
 0x47d   : > { %v3996_v18 = vpop.f32.mrb[140].mxu1 }
 0x47e   : > { %v8673_v35 = vadd.f32 %v3996_v18, %v8560_v15  ;;  %v6501_v28 = vpop.f32.mrb[141].mxu1  ;;  %v4785_v15 = vor.u32 %v4784_v30, %v4781_v41  ;;  %v4806_v18 = vshrl.u32 %v8352_v23, 16 }
 0x47f   : > { %v3999_v29 = vpop.f32.mrb[142].mxu1  ;;  %v8718_v28 = vpop.f32.mrb[68].mxu0 }
 0x480   : > { %v8679_v22 = vadd.f32 %v3999_v29, %v8564_v51  ;;  %v6502_v7 = vpop.f32.mrb[143].mxu1  ;;  %v4786_v14 = vsel %vm9087_vm5, %v4776_v6, %v4785_v15  ;;  %v4802_v6 = vrot.slane %v4800_v8, 3 }
 0x482   : > { %6652 = vmatmul.mubr.msk.bf16.gmra.mrb[248].mxu1 %vm470_vm2, %v4777_v19  ;;  %v6619_v19 = vpop.f32.mrb[69].mxu0 }
 0x483   : > { %6655 = vmatprep.mubr.msk.bf16.mxu1 %vm7057_vm6, %v7056_v33  ;;  %v8723_v30 = vpop.f32.mrb[70].mxu0 }
 0x484   : > { %v6620_v32 = vpop.f32.mrb[71].mxu0 }
 0x485   : > { %v4004_v2 = vpop.f32.mrb[144].mxu1 }
 0x486   : > { %v8689_v45 = vadd.f32 %v4004_v2, %v8571_v5  ;;  %v6505_v51 = vpop.f32.mrb[145].mxu1  ;;  %v4794_v5 = vor.u32 %v4793_v9, %v4790_v25 }
 0x487   : > { %v4007_v44 = vpop.f32.mrb[146].mxu1  ;;  %v4818_v51 = vshll.u32 %v8532_v50, 16 }
 0x488   : > { %v8695_v36 = vadd.f32 %v4007_v44, %v8575_v60  ;;  %v6506_v27 = vpop.f32.mrb[147].mxu1  ;;  %v4795_v1 = vsel %vm9088_vm7, %v4785_v15, %v4794_v5  ;;  %v4808_v15 = vrot.slane %v4806_v18, 2  ;;  %v8734_v44 = vpop.f32.mrb[72].mxu0 }
 0x489   : > { %v6623_v25 = vpop.f32.mrb[73].mxu0  ;;  %v4820_v8 = vrot.slane %v4818_v51, 3 }
 0x48a   : > { %6656 = vmatmul.mubr.msk.bf16.gmra.mrb[252].mxu1 %vm470_vm2, %v4786_v14  ;;  %v8739_v24 = vpop.f32.mrb[74].mxu0 }
 0x48b   : > { %6659 = vmatprep.mubr.msk.bf16.mxu1 %vm7057_vm6, %v7056_v33 }
 0x48d   : > { %v4012_v42 = vpop.f32.mrb[148].mxu1 }
 0x48e   : > { %v8705_v59 = vadd.f32 %v4012_v42, %v8582_v56  ;;  %v6509_v60 = vpop.f32.mrb[149].mxu1  ;;  %v4803_v56 = vor.u32 %v4802_v6, %v4799_v54  ;;  %v6624_v42 = vpop.f32.mrb[75].mxu0 }
 0x48f   : > { %v4015_v48 = vpop.f32.mrb[150].mxu1  ;;  %v8748_v60 = vpop.f32.mrb[76].mxu0 }
 0x490   : > { %v8711_v57 = vadd.f32 %v4015_v48, %v8586_v43  ;;  %v6510_v4 = vpop.f32.mrb[151].mxu1  ;;  %v4804_v7 = vsel %vm9089_vm12, %v4794_v5, %v4803_v56 }
 0x492   : > { %6660 = vmatmul.mubr.msk.bf16.gmra.mrb[16].mxu1 %vm470_vm2, %v4795_v1  ;;  %v6627_v1 = vpop.f32.mrb[77].mxu0 }
 0x493   : > { %6663 = vmatprep.mubr.msk.bf16.mxu1 %vm7057_vm6, %v7056_v33  ;;  %v8753_v52 = vpop.f32.mrb[78].mxu0 }
 0x495   : > { %v4020_v29 = vpop.f32.mrb[152].mxu1 }
 0x496   : > { %v8721_v41 = vadd.f32 %v4020_v29, %v8593_v53  ;;  %v6513_v43 = vpop.f32.mrb[153].mxu1  ;;  %v4812_v53 = vor.u32 %v4811_v17, %v4808_v15 }
 0x497   : > { %v4023_v62 = vpop.f32.mrb[154].mxu1 }
 0x498   : > { %v8727_v2 = vadd.f32 %v4023_v62, %v8597_v47  ;;  %v6514_v23 = vpop.f32.mrb[155].mxu1  ;;  %v4813_v5 = vsel %vm9090_vm8, %v4803_v56, %v4812_v53  ;;  %v6628_v56 = vpop.f32.mrb[79].mxu0 }
 0x49a   : > { %6664 = vmatmul.mubr.msk.bf16.gmra.mrb[0].mxu1 %vm470_vm2, %v4804_v7 }
 0x49b   : > { %6667 = vmatprep.mubr.msk.bf16.mxu1 %vm7057_vm6, %v7056_v33 }
 0x49d   : > { %v4028_v14 = vpop.f32.mrb[156].mxu1 }
 0x49e   : > { %v8737_v9 = vadd.f32 %v4028_v14, %v8604_v34  ;;  %v6517_v47 = vpop.f32.mrb[157].mxu1  ;;  %v4821_v34 = vor.u32 %v4820_v8, %v4817_v61 }
 0x49f   : > { %v4031_v27 = vpop.f32.mrb[158].mxu1 }
 0x4a0   : > { %v8743_v20 = vadd.f32 %v4031_v27, %v8608_v13  ;;  %v6518_v50 = vpop.f32.mrb[159].mxu1  ;;  %v4822_v13 = vsel %vm9091_vm9, %v4812_v53, %v4821_v34 }
 0x4a2   : > { %6668 = vmatmul.mubr.msk.bf16.gmra.mrb[4].mxu1 %vm470_vm2, %v4813_v5 }
 0x4a3   : > { %6671 = vmatprep.mubr.msk.bf16.mxu1 %vm7057_vm6, %v7056_v33  ;;  %v8760_v33 = vpop.f32.mrb[80].mxu0 }
 0x4a4   : > { %v6631_v19 = vpop.f32.mrb[81].mxu0 }
 0x4a5   : > { %v4036_v48 = vpop.f32.mrb[160].mxu1  ;;  %v8765_v62 = vpop.f32.mrb[82].mxu0 }
 0x4a6   : > { %v8751_v54 = vadd.f32 %v4036_v48, %v8619_v31  ;;  %v6521_v6 = vpop.f32.mrb[161].mxu1  ;;  %v6632_v15 = vpop.f32.mrb[83].mxu0 }
 0x4a7   : > { %v4039_v4 = vpop.f32.mrb[162].mxu1 }
 0x4a8   : > { %v8757_v18 = vadd.f32 %v4039_v4, %v8623_v40  ;;  %v6522_v58 = vpop.f32.mrb[163].mxu1 }
 0x4aa   : > { %6672 = vmatmul.mubr.msk.bf16.gmra.mrb[8].mxu1 %vm470_vm2, %v4822_v13  ;;  %v8770_v32 = vpop.f32.mrb[84].mxu0  ;;  %vm5236_vm2 = vcmask 1042432  }
 0x4ab   : > { %v6635_v53 = vpop.f32.mrb[85].mxu0 }
 0x4ac   : > { %v8775_v14 = vpop.f32.mrb[86].mxu0 }
 0x4ad   : > { %v4220_v29 = vpop.f32.mrb[164].mxu1  ;;  %v6636_v25 = vpop.f32.mrb[87].mxu0 }
 0x4ae   : > { %v8763_v31 = vadd.f32 %v4220_v29, %v8631_v46  ;;  %v6527_v43 = vpop.f32.mrb[165].mxu1 }
 0x4af   : > { %v4223_v7 = vpop.f32.mrb[166].mxu1 }
 0x4b0   : > { %v8768_v17 = vadd.f32 %v4223_v7, %v8635_v37  ;;  %v6528_v40 = vpop.f32.mrb[167].mxu1 }
 0x4b5   : > { %v4228_v23 = vpop.f32.mrb[168].mxu1 }
 0x4b6   : > { %v8773_v39 = vadd.f32 %v4228_v23, %v8643_v26  ;;  %v6531_v51 = vpop.f32.mrb[169].mxu1 }
 0x4b7   : > { %v4231_v46 = vpop.f32.mrb[170].mxu1 }
 0x4b8   : > { %v8778_v47 = vadd.f32 %v4231_v46, %v8647_v12  ;;  %v6532_v27 = vpop.f32.mrb[171].mxu1 }
 0x4b9   : > { %v8780_v5 = vpop.f32.mrb[88].mxu0 }
 0x4ba   : > { %v6679_v61 = vpop.f32.mrb[89].mxu0 }
 0x4bb   : > { %v8785_v50 = vpop.f32.mrb[90].mxu0 }
 0x4bc   : > { %v6680_v34 = vpop.f32.mrb[91].mxu0 }
 0x4bd   : > { %v4236_v37 = vpop.f32.mrb[172].mxu1 }
 0x4be   : > { %v8783_v8 = vadd.f32 %v4236_v37, %v8657_v38  ;;  %v6535_v42 = vpop.f32.mrb[173].mxu1 }
 0x4bf   : > { %v4239_v26 = vpop.f32.mrb[174].mxu1 }
 0x4c0   : > { %v8788_v48 = vadd.f32 %v4239_v26, %v8663_v11  ;;  %v6536_v1 = vpop.f32.mrb[175].mxu1 }
 0x4c1   : > { %v8790_v6 = vpop.f32.mrb[92].mxu0 }
 0x4c2   : > { %v6683_v4 = vpop.f32.mrb[93].mxu0 }
 0x4c3   : > { %v8795_v58 = vpop.f32.mrb[94].mxu0 }
 0x4c4   : > { %v6684_v29 = vpop.f32.mrb[95].mxu0 }
 0x4c5   : > { %v4244_v12 = vpop.f32.mrb[176].mxu1 }
 0x4c6   : > { %v8793_v13 = vadd.f32 %v4244_v12, %v8673_v35  ;;  %v6539_v56 = vpop.f32.mrb[177].mxu1 }
 0x4c7   : > { %v4247_v38 = vpop.f32.mrb[178].mxu1 }
 0x4c8   : > { %v8798_v19 = vadd.f32 %v4247_v38, %v8679_v22  ;;  %v6540_v43 = vpop.f32.mrb[179].mxu1 }
 0x4c9   : > { %v8800_v7 = vpop.f32.mrb[96].mxu0 }
 0x4ca   : > { %v6687_v15 = vpop.f32.mrb[97].mxu0 }
 0x4cb   : > { %v8805_v53 = vpop.f32.mrb[98].mxu0 }
 0x4cc   : > { %v6688_v51 = vpop.f32.mrb[99].mxu0 }
 0x4cd   : > { %v4252_v11 = vpop.f32.mrb[180].mxu1 }
 0x4ce   : > { %v8803_v40 = vadd.f32 %v4252_v11, %v8689_v45  ;;  %v6543_v23 = vpop.f32.mrb[181].mxu1 }
 0x4cf   : > { %v4255_v35 = vpop.f32.mrb[182].mxu1 }
 0x4d0   : > { %v8808_v46 = vadd.f32 %v4255_v35, %v8695_v36  ;;  %v6544_v25 = vpop.f32.mrb[183].mxu1 }
 0x4d1   : > { %v8810_v27 = vpop.f32.mrb[100].mxu0 }
 0x4d2   : > { %v6691_v37 = vpop.f32.mrb[101].mxu0 }
 0x4d3   : > { %v8815_v26 = vpop.f32.mrb[102].mxu0 }
 0x4d4   : > { %v6692_v34 = vpop.f32.mrb[103].mxu0 }
 0x4d5   : > { %v4260_v22 = vpop.f32.mrb[184].mxu1 }
 0x4d6   : > { %v8813_v61 = vadd.f32 %v4260_v22, %v8705_v59  ;;  %v6547_v42 = vpop.f32.mrb[185].mxu1 }
 0x4d7   : > { %v4263_v45 = vpop.f32.mrb[186].mxu1 }
 0x4d8   : > { %v8818_v1 = vadd.f32 %v4263_v45, %v8711_v57  ;;  %v6548_v12 = vpop.f32.mrb[187].mxu1 }
 0x4d9   : > { %v8820_v4 = vpop.f32.mrb[104].mxu0 }
 0x4da   : > { %v6695_v56 = vpop.f32.mrb[105].mxu0 }
 0x4db   : > { %v8825_v43 = vpop.f32.mrb[106].mxu0 }
 0x4dc   : > { %v6696_v11 = vpop.f32.mrb[107].mxu0 }
 0x4dd   : > { %v4268_v36 = vpop.f32.mrb[188].mxu1 }
 0x4de   : > { %v8823_v38 = vadd.f32 %v4268_v36, %v8721_v41  ;;  %v6551_v29 = vpop.f32.mrb[189].mxu1 }
 0x4df   : > { %v4271_v59 = vpop.f32.mrb[190].mxu1 }
 0x4e0   : > { %v8828_v15 = vadd.f32 %v4271_v59, %v8727_v2  ;;  %v6552_v23 = vpop.f32.mrb[191].mxu1 }
 0x4e1   : > { %v8830_v35 = vpop.f32.mrb[108].mxu0 }
 0x4e2   : > { %v6699_v51 = vpop.f32.mrb[109].mxu0 }
 0x4e3   : > { %v8835_v37 = vpop.f32.mrb[110].mxu0 }
 0x4e4   : > { %v6700_v42 = vpop.f32.mrb[111].mxu0 }
 0x4e5   : > { %v4276_v57 = vpop.f32.mrb[192].mxu1 }
 0x4e6   : > { %v8833_v25 = vadd.f32 %v4276_v57, %v8737_v9  ;;  %v6555_v22 = vpop.f32.mrb[193].mxu1 }
 0x4e7   : > { %v4279_v41 = vpop.f32.mrb[194].mxu1 }
 0x4e8   : > { %v8838_v45 = vadd.f32 %v4279_v41, %v8743_v20  ;;  %v6556_v34 = vpop.f32.mrb[195].mxu1 }
 0x4e9   : > { %v8840_v12 = vpop.f32.mrb[112].mxu0 }
 0x4ea   : > { %v6703_v36 = vpop.f32.mrb[113].mxu0 }
 0x4eb   : > { %v8845_v59 = vpop.f32.mrb[114].mxu0 }
 0x4ec   : > { %v6704_v11 = vpop.f32.mrb[115].mxu0 }
 0x4ed   : > { %v4284_v2 = vpop.f32.mrb[196].mxu1 }
 0x4ee   : > { %v8843_v56 = vadd.f32 %v4284_v2, %v8751_v54  ;;  %v6559_v29 = vpop.f32.mrb[197].mxu1 }
 0x4ef   : > { %v4287_v9 = vpop.f32.mrb[198].mxu1 }
 0x4f0   : > { %v8848_v23 = vadd.f32 %v4287_v9, %v8757_v18  ;;  %v6560_v57 = vpop.f32.mrb[199].mxu1 }
 0x4f1   : > { %v8850_v51 = vpop.f32.mrb[116].mxu0 }
 0x4f2   : > { %v6707_v22 = vpop.f32.mrb[117].mxu0 }
 0x4f3   : > { %v8853_v34 = vpop.f32.mrb[118].mxu0 }
 0x4f4   : > { %9092 = vst [vmem:[#allocation3_spill] sm:$0xff] %v8853_v34  ;;  %v6708_v2 = vpop.f32.mrb[119].mxu0 }
 0x4f5   : > { %v4398_v20 = vpop.f32.mrb[200].mxu1 }
 0x4f6   : > { %v4469_v41 = vadd.f32 %v4398_v20, %v8763_v31  ;;  %v6565_v42 = vpop.f32.mrb[201].mxu1 }
 0x4f7   : > { %v4401_v54 = vpop.f32.mrb[202].mxu1 }
 0x4f8   : > { %v4470_v36 = vadd.f32 %v4401_v54, %v8768_v17  ;;  %v6566_v29 = vpop.f32.mrb[203].mxu1  ;;  %v8857_v11 = vadd.f32 %v8654_v49, %v4469_v41 }
 0x4f9   : > { %v8862_v9 = vpop.f32.mrb[120].mxu0 }
 0x4fa   : > { %v8860_v18 = vadd.f32 %v8659_v21, %v4470_v36  ;;  %v6711_v22 = vpop.f32.mrb[121].mxu0 }
 0x4fb   : > { %v8865_v42 = vpop.f32.mrb[122].mxu0 }
 0x4fc   : > { %v6712_v2 = vpop.f32.mrb[123].mxu0 }
 0x4fd   : > { %v4406_v57 = vpop.f32.mrb[204].mxu1 }
 0x4fe   : > { %v4471_v31 = vadd.f32 %v4406_v57, %v8773_v39  ;;  %v6569_v20 = vpop.f32.mrb[205].mxu1 }
 0x4ff   : > { %v4409_v34 = vpop.f32.mrb[206].mxu1 }
 0x500   : > { %v4472_v17 = vadd.f32 %v4409_v34, %v8778_v47  ;;  %v6570_v54 = vpop.f32.mrb[207].mxu1  ;;  %v8869_v49 = vadd.f32 %v8670_v16, %v4471_v31 }
 0x502   : > { %v8872_v21 = vadd.f32 %v8675_v55, %v4472_v17 }
 0x505   : > { %v4414_v41 = vpop.f32.mrb[208].mxu1 }
 0x506   : > { %v4473_v36 = vadd.f32 %v4414_v41, %v8783_v8  ;;  %v6573_v29 = vpop.f32.mrb[209].mxu1 }
 0x507   : > { %v4417_v22 = vpop.f32.mrb[210].mxu1 }
 0x508   : > { %v4474_v39 = vadd.f32 %v4417_v22, %v8788_v48  ;;  %v6574_v57 = vpop.f32.mrb[211].mxu1  ;;  %v8877_v20 = vadd.f32 %v8686_v0, %v4473_v36 }
 0x50a   : > { %v8880_v47 = vadd.f32 %v8691_v3, %v4474_v39 }
 0x50d   : > { %v4422_v34 = vpop.f32.mrb[212].mxu1 }
 0x50e   : > { %v4475_v16 = vadd.f32 %v4422_v34, %v8793_v13  ;;  %v6577_v31 = vpop.f32.mrb[213].mxu1 }
 0x50f   : > { %v4425_v55 = vpop.f32.mrb[214].mxu1 }
 0x510   : > { %v4476_v2 = vadd.f32 %v4425_v55, %v8798_v19  ;;  %v6578_v17 = vpop.f32.mrb[215].mxu1  ;;  %v8885_v8 = vadd.f32 %v8702_v63, %v4475_v16 }
 0x512   : > { %v8888_v48 = vadd.f32 %v8707_v10, %v4476_v2 }
 0x515   : > { %v4430_v54 = vpop.f32.mrb[216].mxu1 }
 0x516   : > { %v4477_v0 = vadd.f32 %v4430_v54, %v8803_v40  ;;  %v6581_v41 = vpop.f32.mrb[217].mxu1 }
 0x517   : > { %v4433_v3 = vpop.f32.mrb[218].mxu1 }
 0x518   : > { %v4478_v36 = vadd.f32 %v4433_v3, %v8808_v46  ;;  %v6582_v29 = vpop.f32.mrb[219].mxu1  ;;  %v8893_v13 = vadd.f32 %v8718_v28, %v4477_v0 }
 0x519   : > { %v5180_v29 = vld [vmem:[%s7140_s17 + $0x14] sm:$0xf] }
 0x51a   : > { %v8896_v19 = vadd.f32 %v8723_v30, %v4478_v36  ;;  %v5179_v36 = vld [vmem:[%s7140_s17 + $0x10] sm:$0xc] }
 0x51d   : > { %v4438_v22 = vpop.f32.mrb[220].mxu1 }
 0x51e   : > { %v4479_v63 = vadd.f32 %v4438_v22, %v8813_v61  ;;  %v6585_v39 = vpop.f32.mrb[221].mxu1 }
 0x51f   : > { %v4441_v10 = vpop.f32.mrb[222].mxu1  ;;  %v5922_v39 = vld [vmem:[%s7140_s17 + $0x18] sm:$0xff]  }
 0x520   : > { %v4480_v57 = vadd.f32 %v4441_v10, %v8818_v1  ;;  %v6586_v34 = vpop.f32.mrb[223].mxu1  ;;  %v8901_v40 = vadd.f32 %v8734_v44, %v4479_v63  ;;  %v5198_v10 = vunpack.c.l.bf16 %v5179_v36 }
 0x522   : > { %v8904_v46 = vadd.f32 %v8739_v24, %v4480_v57  ;;  %v5892_v57 = vunpack.c.l.bf16 %v5922_v39 }
 0x525   : > { %v4446_v16 = vpop.f32.mrb[224].mxu1 }
 0x526   : > { %v4481_v28 = vadd.f32 %v4446_v16, %v8823_v38  ;;  %v6589_v31 = vpop.f32.mrb[225].mxu1 }
 0x527   : > { %v4449_v30 = vpop.f32.mrb[226].mxu1 }
 0x528   : > { %v4482_v55 = vadd.f32 %v4449_v30, %v8828_v15  ;;  %v6590_v61 = vpop.f32.mrb[227].mxu1  ;;  %v8909_v2 = vadd.f32 %v8748_v60, %v4481_v28  ;;  %v5240_v30 = vrot.slane %v5892_v57, 5 }
 0x52a   : > { %v8912_v1 = vadd.f32 %v8753_v52, %v4482_v55 }
 0x52d   : > { %v4454_v44 = vpop.f32.mrb[228].mxu1 }
 0x52e   : > { %v4483_v24 = vadd.f32 %v4454_v44, %v8833_v25  ;;  %v6593_v17 = vpop.f32.mrb[229].mxu1  ;;  %v5923_v44 = vld [vmem:[%s7140_s17 + $0x20] sm:$0xff]  }
 0x52f   : > { %v4457_v54 = vpop.f32.mrb[230].mxu1  ;;  %v5893_v17 = vunpack.c.h.bf16 %v5922_v39 }
 0x530   : > { %v4484_v38 = vadd.f32 %v4457_v54, %v8838_v45  ;;  %v6594_v0 = vpop.f32.mrb[231].mxu1  ;;  %v8917_v41 = vadd.f32 %v8760_v33, %v4483_v24  ;;  %v5199_v33 = vunpack.c.l.bf16 %v5180_v29 }
 0x531   : > { %v5896_v0 = vunpack.c.l.bf16 %v5923_v44 }
 0x532   : > { %v8920_v15 = vadd.f32 %v8765_v62, %v4484_v38  ;;  %v5238_v16 = vrot.slane %v5199_v33, 5 }
 0x534   : > { %v5241_v38 = vsel %vm5236_vm2, %v5238_v16, %v5240_v30 }
 0x535   : > { %v4462_v60 = vpop.f32.mrb[232].mxu1 }
 0x536   : > { %v4485_v3 = vadd.f32 %v4462_v60, %v8843_v56  ;;  %v6597_v52 = vpop.f32.mrb[233].mxu1  ;;  %v5237_v56 = vrot.slane %v5198_v10, 5 }
 0x537   : > { %v4465_v22 = vpop.f32.mrb[234].mxu1 }
 0x538   : > { %v4486_v25 = vadd.f32 %v4465_v22, %v8848_v23  ;;  %v6598_v63 = vpop.f32.mrb[235].mxu1  ;;  %v8928_v45 = vadd.f32 %v8770_v32, %v4485_v3  ;;  %v8937_v23 = vld [vmem:[%s9074_s5] ss:$0 sm:$0xff]  ;;  %v5239_v24 = vsel %vm5236_vm2, %v5237_v56, %v5238_v16  ;;  %v5897_v16 = vunpack.c.h.bf16 %v5923_v44 }
 0x539   : > { %v5244_v63 = vrot.slane %v5896_v0, 5 }
 0x53a   : > { %v8931_v62 = vadd.f32 %v8775_v14, %v4486_v25 }
 0x53d   : > { %v4887_v34 = vpop.f32.mrb[236].mxu1 }
 0x53e   : > { %v4958_v28 = vadd.f32 %v4887_v34, %v8857_v11  ;;  %v6641_v31 = vpop.f32.mrb[237].mxu1  ;;  %v5924_v34 = vld [vmem:[%s7140_s17 + $0x28] sm:$0xff]  }
 0x53f   : > { %v4890_v32 = vpop.f32.mrb[238].mxu1 }
 0x540   : > { %v5136_v55 = vadd.f32 %v8780_v5, %v4958_v28  ;;  %v4959_v14 = vadd.f32 %v4890_v32, %v8860_v18  ;;  %v6642_v61 = vpop.f32.mrb[239].mxu1  ;;  %v5242_v5 = vrot.slane %v5893_v17, 5 }
 0x542   : > { %v5161_v11 = vadd.f32 %v8937_v23, %v5136_v55  ;;  %v5137_v54 = vadd.f32 %v8785_v50, %v4959_v14  ;;  %v5243_v56 = vsel %vm5236_vm2, %v5240_v30, %v5242_v5  ;;  %v5245_v32 = vsel %vm5236_vm2, %v5242_v5, %v5244_v63 }
 0x543   : > { %v5900_v55 = vunpack.c.l.bf16 %v5924_v34  ;;  %v5246_v30 = vrot.slane %v5897_v16, 5 }
 0x544   : > { %v5292_v60 = vadd.f32 %v5239_v24, %v5161_v11  ;;  %v5162_v3 = vadd.f32 %v8937_v23, %v5137_v54 }
 0x545   : > { %v4895_v52 = vpop.f32.mrb[240].mxu1  ;;  %v5247_v5 = vsel %vm5236_vm2, %v5244_v63, %v5246_v30 }
 0x546   : > { %v5310_v18 = vmax.f32 %v5292_v60, 0.0  ;;  %v5293_v36 = vadd.f32 %v5241_v38, %v5162_v3  ;;  %v4960_v29 = vadd.f32 %v4895_v52, %v8869_v49  ;;  %v6645_v22 = vpop.f32.mrb[241].mxu1  ;;  %v5925_v52 = vld [vmem:[%s7140_s17 + $0x30] sm:$0xff]  }
 0x547   : > { %v4898_v25 = vpop.f32.mrb[242].mxu1 }
 0x548   : > { %v5872_v39 = vpack.c.bf16 %v5310_v18, %v5310_v18  ;;  %v5311_v50 = vmax.f32 %v5293_v36, 0.0  ;;  %v5138_v10 = vadd.f32 %v8790_v6, %v4960_v29  ;;  %v4961_v33 = vadd.f32 %v4898_v25, %v8872_v21  ;;  %v6646_v57 = vpop.f32.mrb[243].mxu1 }
 0x549   : > { %v5901_v18 = vunpack.c.h.bf16 %v5924_v34  ;;  %v5904_v25 = vunpack.c.l.bf16 %v5925_v52 }
 0x54a   : > { %5400 = vst.msk [vmem:[%s7152_s28] sm:$0xf] %vm3173_vm10, %v5872_v39  ;;  %v5873_v28 = vpack.c.bf16 %v5311_v50, %v5311_v50  ;;  %v5163_v49 = vadd.f32 %v8937_v23, %v5138_v10  ;;  %v5139_v31 = vadd.f32 %v8795_v58, %v4961_v33  ;;  %v5248_v58 = vrot.slane %v5900_v55, 5 }
 0x54b   : > { %v5250_v63 = vrot.slane %v5901_v18, 5  ;;  %v5927_v18 = vld [vmem:[%s7140_s17 + $0x40] sm:$0xff]  }
 0x54c   : > { %5401 = vst.msk [vmem:[%s7152_s28 + $0x4] sm:$0xf] %vm3173_vm10, %v5873_v28  ;;  %v5294_v6 = vadd.f32 %v5243_v56, %v5163_v49  ;;  %v5164_v21 = vadd.f32 %v8937_v23, %v5139_v31  ;;  %v5249_v22 = vsel %vm5236_vm2, %v5246_v30, %v5248_v58 }
 0x54d   : > { %v4903_v14 = vpop.f32.mrb[244].mxu1  ;;  %v5251_v55 = vsel %vm5236_vm2, %v5248_v58, %v5250_v63 }
 0x54e   : > { %v5312_v61 = vmax.f32 %v5294_v6, 0.0  ;;  %v5295_v44 = vadd.f32 %v5245_v32, %v5164_v21  ;;  %v4962_v24 = vadd.f32 %v4903_v14, %v8877_v20  ;;  %v6649_v17 = vpop.f32.mrb[245].mxu1  ;;  %v5926_v32 = vld [vmem:[%s7140_s17 + $0x38] sm:$0xff]   ;;  %v5905_v6 = vunpack.c.h.bf16 %v5925_v52 }
 0x54f   : > { %v4906_v11 = vpop.f32.mrb[246].mxu1 }
 0x550   : > { %v5874_v54 = vpack.c.bf16 %v5312_v61, %v5312_v61  ;;  %v5313_v38 = vmax.f32 %v5295_v44, 0.0  ;;  %v5140_v0 = vadd.f32 %v8800_v7, %v4962_v24  ;;  %v4963_v60 = vadd.f32 %v4906_v11, %v8880_v47  ;;  %v6650_v3 = vpop.f32.mrb[247].mxu1 }
 0x551   : > { %v5908_v61 = vunpack.c.l.bf16 %v5926_v32  ;;  %v5254_v24 = vrot.slane %v5905_v6, 5 }
 0x552   : > { %5402 = vst.msk [vmem:[%s7152_s28 + $0x8] sm:$0xf] %vm3173_vm10, %v5874_v54  ;;  %v5875_v36 = vpack.c.bf16 %v5313_v38, %v5313_v38  ;;  %v5165_v20 = vadd.f32 %v8937_v23, %v5140_v0  ;;  %v5141_v29 = vadd.f32 %v8805_v53, %v4963_v60  ;;  %v5252_v53 = vrot.slane %v5904_v25, 5 }
 0x554   : > { %5403 = vst.msk [vmem:[%s7152_s28 + $0xc] sm:$0xf] %vm3173_vm10, %v5875_v36  ;;  %v5296_v7 = vadd.f32 %v5247_v5, %v5165_v20  ;;  %v5166_v47 = vadd.f32 %v8937_v23, %v5141_v29  ;;  %v5253_v30 = vsel %vm5236_vm2, %v5250_v63, %v5252_v53  ;;  %v5255_v36 = vsel %vm5236_vm2, %v5252_v53, %v5254_v24 }
 0x555   : > { %v4911_v39 = vpop.f32.mrb[248].mxu1  ;;  %v5909_v20 = vunpack.c.h.bf16 %v5926_v32  ;;  %v5913_v32 = vunpack.c.h.bf16 %v5927_v18 }
 0x556   : > { %v5314_v50 = vmax.f32 %v5296_v7, 0.0  ;;  %v5297_v10 = vadd.f32 %v5249_v22, %v5166_v47  ;;  %v4964_v33 = vadd.f32 %v4911_v39, %v8885_v8  ;;  %v6653_v57 = vpop.f32.mrb[249].mxu1  ;;  %v5912_v7 = vunpack.c.l.bf16 %v5927_v18 }
 0x557   : > { %v4914_v34 = vpop.f32.mrb[250].mxu1  ;;  %v5258_v39 = vrot.slane %v5909_v20, 5 }
 0x558   : > { %v5876_v56 = vpack.c.bf16 %v5314_v50, %v5314_v50  ;;  %v5315_v16 = vmax.f32 %v5297_v10, 0.0  ;;  %v5142_v28 = vadd.f32 %v8810_v27, %v4964_v33  ;;  %v4965_v49 = vadd.f32 %v4914_v34, %v8888_v48  ;;  %v6654_v31 = vpop.f32.mrb[251].mxu1 }
 0x55a   : > { %5404 = vst.msk [vmem:[%s7152_s28 + $0x10] sm:$0xf] %vm3173_vm10, %v5876_v56  ;;  %v5877_v21 = vpack.c.bf16 %v5315_v16, %v5315_v16  ;;  %v5167_v8 = vadd.f32 %v8937_v23, %v5142_v28  ;;  %v5143_v14 = vadd.f32 %v8815_v26, %v4965_v49  ;;  %v5256_v26 = vrot.slane %v5908_v61, 5  ;;  %v5928_v49 = vld [vmem:[%s7140_s17 + $0x48] sm:$0xff]  }
 0x55c   : > { %5405 = vst.msk [vmem:[%s7152_s28 + $0x14] sm:$0xf] %vm3173_vm10, %v5877_v21  ;;  %v5298_v27 = vadd.f32 %v5251_v55, %v5167_v8  ;;  %v5168_v48 = vadd.f32 %v8937_v23, %v5143_v14  ;;  %v5257_v25 = vsel %vm5236_vm2, %v5254_v24, %v5256_v26  ;;  %v5259_v31 = vsel %vm5236_vm2, %v5256_v26, %v5258_v39  ;;  %v5929_v26 = vld [vmem:[%s7140_s17 + $0x50] sm:$0xff]  }
 0x55d   : > { %v4919_v44 = vpop.f32.mrb[252].mxu1  ;;  %v5916_v8 = vunpack.c.l.bf16 %v5928_v49  ;;  %v5920_v18 = vunpack.c.l.bf16 %v5929_v26 }
 0x55e   : > { %v5316_v17 = vmax.f32 %v5298_v27, 0.0  ;;  %v5299_v11 = vadd.f32 %v5253_v30, %v5168_v48  ;;  %v4966_v58 = vadd.f32 %v4919_v44, %v8893_v13  ;;  %v6657_v54 = vpop.f32.mrb[253].mxu1  ;;  %v5262_v30 = vrot.slane %v5913_v32, 5 }
 0x55f   : > { %v4922_v38 = vpop.f32.mrb[254].mxu1 }
 0x560   : > { %v5878_v0 = vpack.c.bf16 %v5316_v17, %v5316_v17  ;;  %v5317_v60 = vmax.f32 %v5299_v11, 0.0  ;;  %v5144_v3 = vadd.f32 %v8820_v4, %v4966_v58  ;;  %v4967_v52 = vadd.f32 %v4922_v38, %v8896_v19  ;;  %v6658_v5 = vpop.f32.mrb[255].mxu1 }
 0x562   : > { %5406 = vst.msk [vmem:[%s7152_s28 + $0x18] sm:$0xf] %vm3173_vm10, %v5878_v0  ;;  %v5879_v29 = vpack.c.bf16 %v5317_v60, %v5317_v60  ;;  %v5169_v13 = vadd.f32 %v8937_v23, %v5144_v3  ;;  %v5145_v22 = vadd.f32 %v8825_v43, %v4967_v52  ;;  %v5260_v43 = vrot.slane %v5912_v7, 5 }
 0x563   : > { %v5917_v60 = vunpack.c.h.bf16 %v5928_v49 }
 0x564   : > { %5407 = vst.msk [vmem:[%s7152_s28 + $0x1c] sm:$0xf] %vm3173_vm10, %v5879_v29  ;;  %v5300_v4 = vadd.f32 %v5255_v36, %v5169_v13  ;;  %v5170_v19 = vadd.f32 %v8937_v23, %v5145_v22  ;;  %v5261_v21 = vsel %vm5236_vm2, %v5258_v39, %v5260_v43  ;;  %v5263_v0 = vsel %vm5236_vm2, %v5260_v43, %v5262_v30  ;;  %v9093_v43 = vld [vmem:[#allocation3_spill] sm:$0xff] }
 0x565   : > { %v4927_v47 = vpop.f32.mrb[16].mxu1  ;;  %v5266_v20 = vrot.slane %v5917_v60, 5 }
 0x566   : > { %v5318_v63 = vmax.f32 %v5300_v4, 0.0  ;;  %v5301_v50 = vadd.f32 %v5257_v25, %v5170_v19  ;;  %v4968_v10 = vadd.f32 %v4927_v47, %v8901_v40  ;;  %v6661_v33 = vpop.f32.mrb[17].mxu1 }
 0x567   : > { %v4930_v57 = vpop.f32.mrb[18].mxu1  ;;  %v5921_v33 = vunpack.c.h.bf16 %v5929_v26 }
 0x568   : > { %v5880_v34 = vpack.c.bf16 %v5318_v63, %v5318_v63  ;;  %v5319_v53 = vmax.f32 %v5301_v50, 0.0  ;;  %v5146_v56 = vadd.f32 %v8830_v35, %v4968_v10  ;;  %v4969_v16 = vadd.f32 %v4930_v57, %v8904_v46  ;;  %v6662_v28 = vpop.f32.mrb[19].mxu1  ;;  %v5197_v50 = vld [vmem:[%s7140_s17 + $0x58] sm:$0x7] }
 0x569   : > { %v5270_v28 = vrot.slane %v5921_v33, 5 }
 0x56a   : > { %5408 = vst.msk [vmem:[%s7152_s28 + $0x20] sm:$0xf] %vm3173_vm10, %v5880_v34  ;;  %v5881_v55 = vpack.c.bf16 %v5319_v53, %v5319_v53  ;;  %v5171_v40 = vadd.f32 %v8937_v23, %v5146_v56  ;;  %v5147_v6 = vadd.f32 %v8835_v37, %v4969_v16  ;;  %v5264_v37 = vrot.slane %v5916_v8, 5 }
 0x56b   : > { %v5216_v56 = vunpack.c.l.bf16 %v5197_v50 }
 0x56c   : > { %5409 = vst.msk [vmem:[%s7152_s28 + $0x24] sm:$0xf] %vm3173_vm10, %v5881_v55  ;;  %v5302_v35 = vadd.f32 %v5259_v31, %v5171_v40  ;;  %v5172_v46 = vadd.f32 %v8937_v23, %v5147_v6  ;;  %v5265_v5 = vsel %vm5236_vm2, %v5262_v30, %v5264_v37  ;;  %v5267_v10 = vsel %vm5236_vm2, %v5264_v37, %v5266_v20 }
 0x56d   : > { %v4935_v14 = vpop.f32.mrb[0].mxu1  ;;  %v5272_v6 = vrot.slane %v5216_v56, 5 }
 0x56e   : > { %v5320_v61 = vmax.f32 %v5302_v35, 0.0  ;;  %v5303_v27 = vadd.f32 %v5261_v21, %v5172_v46  ;;  %v4970_v48 = vadd.f32 %v4935_v14, %v8909_v2  ;;  %v6665_v44 = vpop.f32.mrb[1].mxu1 }
 0x56f   : > { %v4938_v24 = vpop.f32.mrb[2].mxu1 }
 0x570   : > { %v5882_v17 = vpack.c.bf16 %v5320_v61, %v5320_v61  ;;  %v5321_v11 = vmax.f32 %v5303_v27, 0.0  ;;  %v5148_v58 = vadd.f32 %v8840_v12, %v4970_v48  ;;  %v4971_v54 = vadd.f32 %v4938_v24, %v8912_v1  ;;  %v6666_v38 = vpop.f32.mrb[3].mxu1 }
 0x571   : > { %v5273_v48 = vsel %vm5236_vm2, %v5270_v28, %v5272_v6 }
 0x572   : > { %5410 = vst.msk [vmem:[%s7152_s28 + $0x28] sm:$0xf] %vm3173_vm10, %v5882_v17  ;;  %v5883_v3 = vpack.c.bf16 %v5321_v11, %v5321_v11  ;;  %v5173_v2 = vadd.f32 %v8937_v23, %v5148_v58  ;;  %v5149_v52 = vadd.f32 %v8845_v59, %v4971_v54  ;;  %v5268_v59 = vrot.slane %v5920_v18, 5 }
 0x574   : > { %5411 = vst.msk [vmem:[%s7152_s28 + $0x2c] sm:$0xf] %vm3173_vm10, %v5883_v3  ;;  %v5304_v12 = vadd.f32 %v5263_v0, %v5173_v2  ;;  %v5174_v1 = vadd.f32 %v8937_v23, %v5149_v52  ;;  %v5269_v53 = vsel %vm5236_vm2, %v5266_v20, %v5268_v59  ;;  %v5271_v30 = vsel %vm5236_vm2, %v5268_v59, %v5270_v28 }
 0x575   : > { %v4943_v36 = vpop.f32.mrb[4].mxu1 }
 0x576   : > { %v5322_v29 = vmax.f32 %v5304_v12, 0.0  ;;  %v5305_v13 = vadd.f32 %v5265_v5, %v5174_v1  ;;  %v4972_v22 = vadd.f32 %v4943_v36, %v8917_v41  ;;  %v6669_v25 = vpop.f32.mrb[5].mxu1 }
 0x577   : > { %v4946_v7 = vpop.f32.mrb[6].mxu1 }
 0x578   : > { %v5884_v4 = vpack.c.bf16 %v5322_v29, %v5322_v29  ;;  %v5323_v19 = vmax.f32 %v5305_v13, 0.0  ;;  %v5150_v47 = vadd.f32 %v8850_v51, %v4972_v22  ;;  %v4973_v39 = vadd.f32 %v4946_v7, %v8920_v15  ;;  %v6670_v63 = vpop.f32.mrb[7].mxu1 }
 0x57a   : > { %5412 = vst.msk [vmem:[%s7152_s28 + $0x30] sm:$0xf] %vm3173_vm10, %v5884_v4  ;;  %v5885_v57 = vpack.c.bf16 %v5323_v19, %v5323_v19  ;;  %v5175_v41 = vadd.f32 %v8937_v23, %v5150_v47  ;;  %v5151_v34 = vadd.f32 %v9093_v43, %v4973_v39 }
 0x57c   : > { %5413 = vst.msk [vmem:[%s7152_s28 + $0x34] sm:$0xf] %vm3173_vm10, %v5885_v57  ;;  %v5306_v51 = vadd.f32 %v5267_v10, %v5175_v41  ;;  %v5176_v15 = vadd.f32 %v8937_v23, %v5151_v34 }
 0x57d   : > { %v4951_v16 = vpop.f32.mrb[8].mxu1 }
 0x57e   : > { %v5324_v49 = vmax.f32 %v5306_v51, 0.0  ;;  %v5307_v31 = vadd.f32 %v5269_v53, %v5176_v15  ;;  %v4974_v32 = vadd.f32 %v4951_v16, %v8928_v45  ;;  %v6673_v55 = vpop.f32.mrb[9].mxu1 }
 0x57f   : > { %v4954_v40 = vpop.f32.mrb[10].mxu1 }
 0x580   : > { %v5886_v21 = vpack.c.bf16 %v5324_v49, %v5324_v49  ;;  %v5325_v8 = vmax.f32 %v5307_v31, 0.0  ;;  %v5152_v35 = vadd.f32 %v8862_v9, %v4974_v32  ;;  %v4975_v46 = vadd.f32 %v4954_v40, %v8931_v62  ;;  %v6674_v14 = vpop.f32.mrb[11].mxu1 }
 0x582   : > { %5414 = vst.msk [vmem:[%s7152_s28 + $0x38] sm:$0xf] %vm3173_vm10, %v5886_v21  ;;  %v5887_v61 = vpack.c.bf16 %v5325_v8, %v5325_v8  ;;  %v5177_v27 = vadd.f32 %v8937_v23, %v5152_v35  ;;  %v5153_v45 = vadd.f32 %v8865_v42, %v4975_v46 }
 0x584   : > { %5415 = vst.msk [vmem:[%s7152_s28 + $0x3c] sm:$0xf] %vm3173_vm10, %v5887_v61  ;;  %v5308_v44 = vadd.f32 %v5271_v30, %v5177_v27  ;;  %v5178_v9 = vadd.f32 %v8937_v23, %v5153_v45 }
 0x586   : > { %v5326_v24 = vmax.f32 %v5308_v44, 0.0  ;;  %v5309_v62 = vadd.f32 %v5273_v48, %v5178_v9 }
 0x588   : > { %v5888_v37 = vpack.c.bf16 %v5326_v24, %v5326_v24  ;;  %v5327_v17 = vmax.f32 %v5309_v62, 0.0 }
 0x58a   : > { %5416 = vst.msk [vmem:[%s7152_s28 + $0x40] sm:$0xf] %vm3173_vm10, %v5888_v37  ;;  %v5889_v11 = vpack.c.bf16 %v5327_v17, %v5327_v17 }
 0x58c   : > { %5417 = vst.msk [vmem:[%s7152_s28 + $0x44] sm:$0xf] %vm3173_vm10, %v5889_v11 }
 0x58d PF: > { %s16_s25 = sadd.s32 1, %s7051_s25   ;;  %s9094_s21 = smov %s7043_s23 }
 0x58e   : > { %p13_p9 = scmp.ge.s32.totalorder %s16_s25, 6   ;;  %s9095_s22 = smov %s7047_s24 }
 0x58f   : > { %s9096_s23 = smov %s9099_s26  ;;  %s9097_s24 = smov %s9103_s27 }
 0x590   :  { %15 = sbr.rel (!%p13_p9) target bundleno = 3 (0x3), region = 98 }

</bundles_post_ra>
